<compile_context>
chip_gen: v7x
topology: tpu7x:2x2x1
jax: 0.10.0
libtpu: 0.0.40
codegen_flags: <defaults>
</compile_context>

<pallas_src>
import math
import jax
import jax.numpy as jnp
from jax import lax
from jax.experimental import pallas as pl
from jax.experimental.pallas import tpu as pltpu

_VOCAB_CHUNK = 1024        # vocab rows per multi-hot chunk (bounds VMEM/VALU work)
_MAX_UNROLL_LAYERS = 4     # above this, residual blocks run in a lax.fori_loop


def _round_up(x, m):
    return (x + m - 1) // m * m


def _vmem_cap_bytes():
    """Physical VMEM per core; falls back to v7x's 64 MiB (smallest of v5e/v6e/v7x)."""
    try:
        info = pltpu.get_tpu_info()
        cap = getattr(info, "vmem_capacity_bytes", None)
        if cap:
            return int(cap)
    except Exception:
        pass
    return 64 * 1024 * 1024


# ----------------------------- kernel ------------------------------------- #

def _layernorm_cols(x, ones_row, inv_d, gamma, beta, eps=1e-5):
    """LayerNorm over the feature axis (axis 0) for (features, batch) layout.

    The axis-0 (sublane) reductions are done on the MXU via dot(ones(1,d), .)
    so VPU/XLU slots stay free; matches nn.LayerNorm (biased variance).
    """
    mean = jnp.dot(ones_row, x, preferred_element_type=jnp.float32) * inv_d
    xc = x - mean
    var = jnp.dot(ones_row, xc * xc, preferred_element_type=jnp.float32) * inv_d
    return xc * lax.rsqrt(var + eps) * gamma + beta


def resnet_kernel(xnum_ref, xcat_ref,            # (d_num, Tb) f32, (n_cat, Tb) i32
                  wf_ref, bf_ref,                # (d, d_num) mm_dtype, (d, 1) f32
                  wcat_ref,                      # (d, n_total_p) mm_dtype (emb folded)
                  lnw_ref, lnb_ref,              # (L, d, 1) f32 each
                  w0_ref, b0_ref,                # (L, d_hidden_p, d), (L, d_hidden_p, 1)
                  w1_ref, b1_ref,                # (L, d, d_hidden_p), (L, d, 1)
                  lnwL_ref, lnbL_ref,            # (d, 1) f32 each
                  wh_ref, bh_ref,                # (d_out, d) mm_dtype, (d_out, 1) f32
                  out_ref):                      # (d_out, Tb) f32 -- lane-dense
    tile_b = xnum_ref.shape[1]
    d = wf_ref.shape[0]
    n_cat = xcat_ref.shape[0]
    n_total_p = wcat_ref.shape[1]
    mm_dtype = wf_ref.dtype                      # bf16 (fast path) or f32
    inv_d = 1.0 / d
    ones_row = jnp.ones((1, d), jnp.float32)     # hoisted; reused by every LayerNorm

    # ---- first layer: numerical features ----
    x = jnp.dot(wf_ref[...], xnum_ref[...].astype(mm_dtype),
                preferred_element_type=jnp.float32)
    x = x + bf_ref[...]

    # ---- first layer: categorical features (embedding folded into one weight) ----
    chunk = min(_VOCAB_CHUNK, n_total_p)
    iota = lax.broadcasted_iota(jnp.int32, (chunk, tile_b), 0)
    for c in range(n_total_p // chunk):          # static; 1 chunk for small vocabs
        base = c * chunk
        mh = jnp.zeros((chunk, tile_b), mm_dtype)
        for j in range(n_cat):                   # static, small
            idx = xcat_ref[j:j + 1, :]           # (1, Tb) global row index
            mh = mh + ((iota + base) == idx).astype(mm_dtype)
        x = x + jnp.dot(wcat_ref[:, base:base + chunk], mh,
                        preferred_element_type=jnp.float32)

    # ---- residual blocks ----
    def block(xx, l):
        z = _layernorm_cols(xx, ones_row, inv_d, lnw_ref[l], lnb_ref[l])
        z = jnp.dot(w0_ref[l], z.astype(mm_dtype),
                    preferred_element_type=jnp.float32) + b0_ref[l]
        z = jnp.maximum(z, 0.0)                  # main_activation = relu
        # TODO(synk): hidden_dropout / residual_dropout omitted (inference => identity).
        z = jnp.dot(w1_ref[l], z.astype(mm_dtype),
                    preferred_element_type=jnp.float32) + b1_ref[l]
        return xx + z

    n_layers = w0_ref.shape[0]
    if n_layers <= _MAX_UNROLL_LAYERS:
        for l in range(n_layers):                # small L: static unroll
            x = block(x, l)
    else:                                        # deep configs: bounded live ranges
        x = lax.fori_loop(0, n_layers, lambda l, xx: block(xx, l), x)

    # ---- head ----
    x = _layernorm_cols(x, ones_row, inv_d, lnwL_ref[...], lnbL_ref[...])
    x = jnp.maximum(x, 0.0)                      # last_activation = relu
    out_ref[...] = (jnp.dot(wh_ref[...], x.astype(mm_dtype),
                            preferred_element_type=jnp.float32) + bh_ref[...])


# ----------------------------- wrapper ------------------------------------- #

def resnet_forward(x_num, x_cat, params, *, max_tile_b=1024, use_bf16=True,
                   d_hidden_pad_multiple=128, single_buffer_weights=True):
    """Full forward pass; everything after tiny host-side weight prep runs in one kernel."""
    B, d_numerical = x_num.shape
    n_cat = x_cat.shape[1]
    emb_table = params["emb_table"]
    n_total, d_emb = emb_table.shape
    w_first = params["w_first"]                           # (d_in, d)
    d = w_first.shape[1]
    d_out = params["w_head"].shape[1]
    n_layers, _, d_hidden = params["w0"].shape

    mm_dtype = jnp.bfloat16 if use_bf16 else jnp.float32

    # ---- batch tiling: no host zero-pad; Pallas masks the partial last block ----
    tile_b = min(max_tile_b, _round_up(B, 128))
    if B >= 256:
        # ensure >= 2 grid steps so ("parallel",) shards across v7x's 2 TensorCores
        tile_b = min(tile_b, _round_up(pl.cdiv(B, 2), 128))
    grid = (pl.cdiv(B, tile_b),)

    # ---- activations: batch-on-lanes layout (features x batch) ----
    x_num_T = x_num.astype(jnp.float32).T                 # (d_num, B)
    x_cat_T = (x_cat + params["category_offsets"][None, :]).astype(jnp.int32).T

    # ---- weights: transpose to (out, in); fold embedding into ONE combined weight ----
    w_num_T = w_first[:d_numerical].T.astype(mm_dtype)    # (d, d_num)
    cat_id = jnp.searchsorted(params["category_offsets"],
                              jnp.arange(n_total), side="right") - 1
    w_emb = w_first[d_numerical:].reshape(n_cat, d_emb, d)
    wcat_rows = jnp.einsum("ve,ved->vd", emb_table, w_emb[cat_id])   # (n_total, d)
    n_total_p = _round_up(n_total, _VOCAB_CHUNK) if n_total > _VOCAB_CHUNK else n_total
    wcat_T = jnp.zeros((d, n_total_p), mm_dtype).at[:, :n_total].set(
        wcat_rows.T.astype(mm_dtype))                     # (d, n_total_p)

    d_hidden_p = _round_up(d_hidden, d_hidden_pad_multiple)   # pad is numerically free
    bf = params["b_first"].reshape(d, 1).astype(jnp.float32)
    lnw = params["ln_w"].reshape(n_layers, d, 1)
    lnb = params["ln_b"].reshape(n_layers, d, 1)
    w0_T = jnp.zeros((n_layers, d_hidden_p, d), mm_dtype).at[:, :d_hidden, :].set(
        jnp.swapaxes(params["w0"], 1, 2).astype(mm_dtype))
    b0 = jnp.zeros((n_layers, d_hidden_p, 1), jnp.float32).at[:, :d_hidden, :].set(
        params["b0"].reshape(n_layers, d_hidden, 1))
    w1_T = jnp.zeros((n_layers, d, d_hidden_p), mm_dtype).at[:, :, :d_hidden].set(
        jnp.swapaxes(params["w1"], 1, 2).astype(mm_dtype))
    b1 = params["b1"].reshape(n_layers, d, 1).astype(jnp.float32)
    lnwL = params["ln_w_last"].reshape(d, 1)
    lnbL = params["ln_b_last"].reshape(d, 1)
    wh_T = params["w_head"].T.astype(mm_dtype)            # (d_out, d)
    bh = params["b_head"].reshape(d_out, 1).astype(jnp.float32)

    weights = (w_num_T, bf, wcat_T, lnw, lnb, w0_T, b0, w1_T, b1,
               lnwL, lnbL, wh_T, bh)

    def _call(single_buffer):
        def resident(arr):
            """Keep the whole array VMEM-resident across grid steps."""
            idx_map = lambda i, n=arr.ndim: (0,) * n
            if single_buffer:
                # constant index_map => double-buffering is pure VMEM waste
                return pl.BlockSpec(arr.shape, idx_map,
                                    pipeline_mode=pl.Buffered(1))
            return pl.BlockSpec(arr.shape, idx_map)

        in_specs = ([pl.BlockSpec((d_numerical, tile_b), lambda i: (0, i)),
                     pl.BlockSpec((n_cat, tile_b), lambda i: (0, i))]
                    + [resident(w) for w in weights])
        out_specs = pl.BlockSpec((d_out, tile_b), lambda i: (0, i))

        # Explicit VMEM budget: residents x buffer count + pipelined tiles + temps.
        wbuf = 1 if single_buffer else 2
        weight_bytes = sum(int(w.size) * w.dtype.itemsize for w in weights)
        act_bytes = 2 * tile_b * 4 * (d_numerical + n_cat + d_out)
        chunk = min(_VOCAB_CHUNK, n_total_p)
        temp_bytes = tile_b * 4 * (3 * d + 2 * d_hidden_p + chunk + 16)
        vmem_limit = int(1.5 * (weight_bytes * wbuf + act_bytes + temp_bytes))
        vmem_limit = max(vmem_limit, 32 * 1024 * 1024)
        vmem_limit = min(vmem_limit, _vmem_cap_bytes() - 8 * 1024 * 1024)
        vmem_limit = max(vmem_limit, 16 * 1024 * 1024)

        return pl.pallas_call(
            resnet_kernel,
            out_shape=jax.ShapeDtypeStruct((d_out, B), jnp.float32),
            grid=grid,
            in_specs=in_specs,
            out_specs=out_specs,
            compiler_params=pltpu.CompilerParams(
                dimension_semantics=("parallel",),       # 2x on v7x (2 TCs)
                vmem_limit_bytes=vmem_limit),
        )(x_num_T, x_cat_T, *weights)

    if single_buffer_weights:
        try:
            out = _call(True)
        except Exception:
            # pl.Buffered(1) not supported by this jax build -> default buffering.
            out = _call(False)
    else:
        out = _call(False)

    res = out.T                                            # (B, d_out)
    return res[:, 0] if d_out == 1 else res                # matches x.squeeze(-1)


# ----------------------------- params -------------------------------------- #

def make_params(key, d_numerical, categories, d_embedding, d,
                d_hidden_factor, n_layers, d_out):
    n_cat = len(categories)
    d_in = d_numerical + n_cat * d_embedding
    d_hidden = int(d * d_hidden_factor)

    keys = jax.random.split(key, 8)

    def lin_init(k, fan_in, shape):
        bound = 1.0 / math.sqrt(fan_in)
        return jax.random.uniform(k, shape, jnp.float32, -bound, bound)

    params = {
        "category_offsets": jnp.array(
            [0] + list(jnp.cumsum(jnp.array(categories))[:-1]), dtype=jnp.int32),
        "emb_table": jax.random.normal(
            keys[0], (sum(categories), d_embedding), jnp.float32) * 0.1,
        "w_first": lin_init(keys[1], d_in, (d_in, d)),
        "b_first": lin_init(keys[2], d_in, (1, d)),
        "ln_w": jnp.ones((n_layers, 1, d), jnp.float32),
        "ln_b": jnp.zeros((n_layers, 1, d), jnp.float32),
        "w0": lin_init(keys[3], d, (n_layers, d, d_hidden)),
        "b0": lin_init(keys[4], d, (n_layers, 1, d_hidden)),
        "w1": lin_init(keys[5], d_hidden, (n_layers, d_hidden, d)),
        "b1": lin_init(keys[6], d_hidden, (n_layers, 1, d)),
        "ln_w_last": jnp.ones((1, d), jnp.float32),
        "ln_b_last": jnp.zeros((1, d), jnp.float32),
        "w_head": lin_init(keys[7], d, (d, d_out)),
        "b_head": jnp.zeros((1, d_out), jnp.float32),
    }
    return params


# ----------------------------- reference (plain JAX) ----------------------- #

def _layernorm_rows(x, gamma, beta, eps=1e-5):
    mean = jnp.mean(x, axis=-1, keepdims=True)
    var = jnp.mean((x - mean) ** 2, axis=-1, keepdims=True)
    return (x - mean) * lax.rsqrt(var + eps) * gamma + beta


def resnet_reference(x_num, x_cat, params):
    offsets = params["category_offsets"]
    emb = jnp.take(params["emb_table"], x_cat + offsets[None, :], axis=0)
    emb = emb.reshape(x_cat.shape[0], -1)
    x = jnp.concatenate([x_num, emb], axis=-1).astype(jnp.float32)
    x = x @ params["w_first"] + params["b_first"]
    for l in range(params["w0"].shape[0]):
        z = _layernorm_rows(x, params["ln_w"][l], params["ln_b"][l])
        z = z @ params["w0"][l] + params["b0"][l]
        z = jnp.maximum(z, 0.0)
        z = z @ params["w1"][l] + params["b1"][l]
        x = x + z
    x = _layernorm_rows(x, params["ln_w_last"], params["ln_b_last"])
    x = jnp.maximum(x, 0.0)
    x = x @ params["w_head"] + params["b_head"]
    return x.squeeze(-1)


# ----------------------------- main ----------------------------------------- #

if __name__ == "__main__":
    # Small config.
    B = 8
    d_numerical = 20
    categories = [3, 5, 7]
    d_embedding = 4
    d = 32
    d_hidden_factor = 2.0
    n_layers = 2
    d_out = 1

    key = jax.random.PRNGKey(0)
    k_params, k_num, k_cat = jax.random.split(key, 3)

    params = make_params(k_params, d_numerical, categories, d_embedding, d,
                         d_hidden_factor, n_layers, d_out)

    x_num = jax.random.normal(k_num, (B, d_numerical), jnp.float32)
    cat_keys = jax.random.split(k_cat, len(categories))
    x_cat = jnp.stack(
        [jax.random.randint(cat_keys[i], (B,), 0, categories[i], jnp.int32)
         for i in range(len(categories))], axis=-1)          # (B, n_cat)

    ref = resnet_reference(x_num, x_cat, params)

    # f32-operand path (tight numerical check).
    out_f32 = resnet_forward(x_num, x_cat, params, use_bf16=False)
    out_f32 = jax.block_until_ready(out_f32)
    assert out_f32.shape == (B,)
    assert jnp.allclose(out_f32, ref, atol=1e-4, rtol=1e-4), (out_f32, ref)

    # bf16 MXU path (default, fast; looser check vs. f32 reference).
    out_bf16 = resnet_forward(x_num, x_cat, params, use_bf16=True)
    out_bf16 = jax.block_until_ready(out_bf16)
    assert out_bf16.shape == (B,)
    assert jnp.allclose(out_bf16, ref, atol=3e-2, rtol=3e-2), (out_bf16, ref)

    print("KERNEL_OK")
</pallas_src>

<mosaic_0001>
module attributes {stable_mosaic.version = 11 : i64} {
  func.func @resnet_kernel(%arg0: i32, %arg1: memref<20x128xf32, #tpu.memory_space<vmem>>, %arg2: memref<3x128xi32, #tpu.memory_space<vmem>>, %arg3: memref<32x20xf32, #tpu.memory_space<vmem>>, %arg4: memref<32x1xf32, #tpu.memory_space<vmem>>, %arg5: memref<32x15xf32, #tpu.memory_space<vmem>>, %arg6: memref<2x32x1xf32, #tpu.memory_space<vmem>>, %arg7: memref<2x32x1xf32, #tpu.memory_space<vmem>>, %arg8: memref<2x128x32xf32, #tpu.memory_space<vmem>>, %arg9: memref<2x128x1xf32, #tpu.memory_space<vmem>>, %arg10: memref<2x32x128xf32, #tpu.memory_space<vmem>>, %arg11: memref<2x32x1xf32, #tpu.memory_space<vmem>>, %arg12: memref<32x1xf32, #tpu.memory_space<vmem>>, %arg13: memref<32x1xf32, #tpu.memory_space<vmem>>, %arg14: memref<1x32xf32, #tpu.memory_space<vmem>>, %arg15: memref<1x1xf32, #tpu.memory_space<vmem>>, %arg16: memref<1x128xf32, #tpu.memory_space<vmem>>) attributes {dimension_semantics = [#tpu.dimension_semantics<parallel>], iteration_bounds = array<i64: 1>, scalar_prefetch = 0 : i64, scratch_operands = 0 : i64, tpu.core_type = #tpu.core_type<tc>, window_params = [{transform_indices = @transform_0, window_bounds = array<i64: 20, 128>}, {transform_indices = @transform_1, window_bounds = array<i64: 3, 128>}, {pipeline_mode = #tpu.pipeline_mode<synchronous>, transform_indices = @transform_2, window_bounds = array<i64: 32, 20>}, {pipeline_mode = #tpu.pipeline_mode<synchronous>, transform_indices = @transform_3, window_bounds = array<i64: 32, 1>}, {pipeline_mode = #tpu.pipeline_mode<synchronous>, transform_indices = @transform_4, window_bounds = array<i64: 32, 15>}, {pipeline_mode = #tpu.pipeline_mode<synchronous>, transform_indices = @transform_5, window_bounds = array<i64: 2, 32, 1>}, {pipeline_mode = #tpu.pipeline_mode<synchronous>, transform_indices = @transform_6, window_bounds = array<i64: 2, 32, 1>}, {pipeline_mode = #tpu.pipeline_mode<synchronous>, transform_indices = @transform_7, window_bounds = array<i64: 2, 128, 32>}, {pipeline_mode = #tpu.pipeline_mode<synchronous>, transform_indices = @transform_8, window_bounds = array<i64: 2, 128, 1>}, {pipeline_mode = #tpu.pipeline_mode<synchronous>, transform_indices = @transform_9, window_bounds = array<i64: 2, 32, 128>}, {pipeline_mode = #tpu.pipeline_mode<synchronous>, transform_indices = @transform_10, window_bounds = array<i64: 2, 32, 1>}, {pipeline_mode = #tpu.pipeline_mode<synchronous>, transform_indices = @transform_11, window_bounds = array<i64: 32, 1>}, {pipeline_mode = #tpu.pipeline_mode<synchronous>, transform_indices = @transform_12, window_bounds = array<i64: 32, 1>}, {pipeline_mode = #tpu.pipeline_mode<synchronous>, transform_indices = @transform_13, window_bounds = array<i64: 1, 32>}, {pipeline_mode = #tpu.pipeline_mode<synchronous>, transform_indices = @transform_14, window_bounds = array<i64: 1, 1>}, {transform_indices = @transform_15, window_bounds = array<i64: 1, 128>}]} {
    %cst = arith.constant 1.000000e+00 : f32
    %0 = vector.broadcast %cst : f32 to vector<1x32xf32>
    %c0 = arith.constant 0 : index
    %c0_0 = arith.constant 0 : index
    %1 = vector.load %arg3[%c0, %c0_0] : memref<32x20xf32, #tpu.memory_space<vmem>>, vector<32x20xf32>
    %c0_1 = arith.constant 0 : index
    %c0_2 = arith.constant 0 : index
    %2 = vector.load %arg1[%c0_1, %c0_2] : memref<20x128xf32, #tpu.memory_space<vmem>>, vector<20x128xf32>
    %cst_3 = arith.constant dense<0.000000e+00> : vector<32x128xf32>
    %3 = tpu.matmul %1, %2, %cst_3 {dimension_numbers = #tpu.dot_dimension_numbers<[1], [0], [0], [1], [0, 0, 1, 1], [], []>} : vector<32x20xf32>, vector<20x128xf32>, vector<32x128xf32> -> vector<32x128xf32>
    %c0_4 = arith.constant 0 : index
    %c0_5 = arith.constant 0 : index
    %4 = vector.load %arg4[%c0_4, %c0_5] : memref<32x1xf32, #tpu.memory_space<vmem>>, vector<32x1xf32>
    %5 = vector.broadcast %4 : vector<32x1xf32> to vector<32x128xf32>
    %6 = arith.addf %3, %5 : vector<32x128xf32>
    %7 = tpu.iota {dimensions = array<i32: 0>} : vector<15x128xi32>
    %cst_6 = arith.constant 0.000000e+00 : f32
    %8 = vector.broadcast %cst_6 : f32 to vector<15x128xf32>
    %c0_7 = arith.constant 0 : index
    %c0_8 = arith.constant 0 : index
    %9 = vector.load %arg2[%c0_7, %c0_8] : memref<3x128xi32, #tpu.memory_space<vmem>>, vector<1x128xi32>
    %c0_i32 = arith.constant 0 : i32
    %10 = vector.broadcast %c0_i32 : i32 to vector<15x128xi32>
    %11 = arith.addi %7, %10 : vector<15x128xi32>
    %12 = vector.broadcast %9 : vector<1x128xi32> to vector<15x128xi32>
    %13 = arith.cmpi eq, %11, %12 : vector<15x128xi32>
    %14 = arith.extui %13 : vector<15x128xi1> to vector<15x128xi32>
    %15 = arith.sitofp %14 : vector<15x128xi32> to vector<15x128xf32>
    %16 = arith.addf %8, %15 : vector<15x128xf32>
    %c1 = arith.constant 1 : index
    %c0_9 = arith.constant 0 : index
    %17 = vector.load %arg2[%c1, %c0_9] : memref<3x128xi32, #tpu.memory_space<vmem>>, vector<1x128xi32>
    %c0_i32_10 = arith.constant 0 : i32
    %18 = vector.broadcast %c0_i32_10 : i32 to vector<15x128xi32>
    %19 = arith.addi %7, %18 : vector<15x128xi32>
    %20 = vector.broadcast %17 : vector<1x128xi32> to vector<15x128xi32>
    %21 = arith.cmpi eq, %19, %20 : vector<15x128xi32>
    %22 = arith.extui %21 : vector<15x128xi1> to vector<15x128xi32>
    %23 = arith.sitofp %22 : vector<15x128xi32> to vector<15x128xf32>
    %24 = arith.addf %16, %23 : vector<15x128xf32>
    %c2 = arith.constant 2 : index
    %c0_11 = arith.constant 0 : index
    %25 = vector.load %arg2[%c2, %c0_11] : memref<3x128xi32, #tpu.memory_space<vmem>>, vector<1x128xi32>
    %c0_i32_12 = arith.constant 0 : i32
    %26 = vector.broadcast %c0_i32_12 : i32 to vector<15x128xi32>
    %27 = arith.addi %7, %26 : vector<15x128xi32>
    %28 = vector.broadcast %25 : vector<1x128xi32> to vector<15x128xi32>
    %29 = arith.cmpi eq, %27, %28 : vector<15x128xi32>
    %30 = arith.extui %29 : vector<15x128xi1> to vector<15x128xi32>
    %31 = arith.sitofp %30 : vector<15x128xi32> to vector<15x128xf32>
    %32 = arith.addf %24, %31 : vector<15x128xf32>
    %c0_13 = arith.constant 0 : index
    %c0_14 = arith.constant 0 : index
    %33 = vector.load %arg5[%c0_13, %c0_14] : memref<32x15xf32, #tpu.memory_space<vmem>>, vector<32x15xf32>
    %cst_15 = arith.constant dense<0.000000e+00> : vector<32x128xf32>
    %34 = tpu.matmul %33, %32, %cst_15 {dimension_numbers = #tpu.dot_dimension_numbers<[1], [0], [0], [1], [0, 0, 1, 1], [], []>} : vector<32x15xf32>, vector<15x128xf32>, vector<32x128xf32> -> vector<32x128xf32>
    %35 = arith.addf %6, %34 : vector<32x128xf32>
    %c0_16 = arith.constant 0 : index
    %c0_17 = arith.constant 0 : index
    %c0_18 = arith.constant 0 : index
    %36 = vector.load %arg6[%c0_16, %c0_17, %c0_18] : memref<2x32x1xf32, #tpu.memory_space<vmem>>, vector<1x32x1xf32>
    %37 = vector.shape_cast %36 : vector<1x32x1xf32> to vector<32x1xf32>
    %c0_19 = arith.constant 0 : index
    %c0_20 = arith.constant 0 : index
    %c0_21 = arith.constant 0 : index
    %38 = vector.load %arg7[%c0_19, %c0_20, %c0_21] : memref<2x32x1xf32, #tpu.memory_space<vmem>>, vector<1x32x1xf32>
    %39 = vector.shape_cast %38 : vector<1x32x1xf32> to vector<32x1xf32>
    %cst_22 = arith.constant dense<0.000000e+00> : vector<1x128xf32>
    %40 = tpu.matmul %0, %35, %cst_22 {dimension_numbers = #tpu.dot_dimension_numbers<[1], [0], [0], [1], [0, 0, 1, 1], [], []>} : vector<1x32xf32>, vector<32x128xf32>, vector<1x128xf32> -> vector<1x128xf32>
    %cst_23 = arith.constant 3.125000e-02 : f32
    %41 = vector.broadcast %cst_23 : f32 to vector<1x128xf32>
    %42 = arith.mulf %40, %41 : vector<1x128xf32>
    %43 = vector.broadcast %42 : vector<1x128xf32> to vector<32x128xf32>
    %44 = arith.subf %35, %43 : vector<32x128xf32>
    %45 = arith.mulf %44, %44 : vector<32x128xf32>
    %cst_24 = arith.constant dense<0.000000e+00> : vector<1x128xf32>
    %46 = tpu.matmul %0, %45, %cst_24 {dimension_numbers = #tpu.dot_dimension_numbers<[1], [0], [0], [1], [0, 0, 1, 1], [], []>} : vector<1x32xf32>, vector<32x128xf32>, vector<1x128xf32> -> vector<1x128xf32>
    %cst_25 = arith.constant 3.125000e-02 : f32
    %47 = vector.broadcast %cst_25 : f32 to vector<1x128xf32>
    %48 = arith.mulf %46, %47 : vector<1x128xf32>
    %cst_26 = arith.constant 9.99999974E-6 : f32
    %49 = vector.broadcast %cst_26 : f32 to vector<1x128xf32>
    %50 = arith.addf %48, %49 : vector<1x128xf32>
    %51 = math.rsqrt %50 : vector<1x128xf32>
    %52 = vector.broadcast %51 : vector<1x128xf32> to vector<32x128xf32>
    %53 = arith.mulf %44, %52 : vector<32x128xf32>
    %54 = vector.broadcast %37 : vector<32x1xf32> to vector<32x128xf32>
    %55 = arith.mulf %53, %54 : vector<32x128xf32>
    %56 = vector.broadcast %39 : vector<32x1xf32> to vector<32x128xf32>
    %57 = arith.addf %55, %56 : vector<32x128xf32>
    %c0_27 = arith.constant 0 : index
    %c0_28 = arith.constant 0 : index
    %c0_29 = arith.constant 0 : index
    %58 = vector.load %arg8[%c0_27, %c0_28, %c0_29] : memref<2x128x32xf32, #tpu.memory_space<vmem>>, vector<1x128x32xf32>
    %59 = vector.shape_cast %58 : vector<1x128x32xf32> to vector<128x32xf32>
    %cst_30 = arith.constant dense<0.000000e+00> : vector<128x128xf32>
    %60 = tpu.matmul %59, %57, %cst_30 {dimension_numbers = #tpu.dot_dimension_numbers<[1], [0], [0], [1], [0, 0, 1, 1], [], []>} : vector<128x32xf32>, vector<32x128xf32>, vector<128x128xf32> -> vector<128x128xf32>
    %c0_31 = arith.constant 0 : index
    %c0_32 = arith.constant 0 : index
    %c0_33 = arith.constant 0 : index
    %61 = vector.load %arg9[%c0_31, %c0_32, %c0_33] : memref<2x128x1xf32, #tpu.memory_space<vmem>>, vector<1x128x1xf32>
    %62 = vector.shape_cast %61 : vector<1x128x1xf32> to vector<128x1xf32>
    %63 = vector.broadcast %62 : vector<128x1xf32> to vector<128x128xf32>
    %64 = arith.addf %60, %63 : vector<128x128xf32>
    %cst_34 = arith.constant 0.000000e+00 : f32
    %65 = vector.broadcast %cst_34 : f32 to vector<128x128xf32>
    %66 = arith.maximumf %64, %65 : vector<128x128xf32>
    %c0_35 = arith.constant 0 : index
    %c0_36 = arith.constant 0 : index
    %c0_37 = arith.constant 0 : index
    %67 = vector.load %arg10[%c0_35, %c0_36, %c0_37] : memref<2x32x128xf32, #tpu.memory_space<vmem>>, vector<1x32x128xf32>
    %68 = vector.shape_cast %67 : vector<1x32x128xf32> to vector<32x128xf32>
    %cst_38 = arith.constant dense<0.000000e+00> : vector<32x128xf32>
    %69 = tpu.matmul %68, %66, %cst_38 {dimension_numbers = #tpu.dot_dimension_numbers<[1], [0], [0], [1], [0, 0, 1, 1], [], []>} : vector<32x128xf32>, vector<128x128xf32>, vector<32x128xf32> -> vector<32x128xf32>
    %c0_39 = arith.constant 0 : index
    %c0_40 = arith.constant 0 : index
    %c0_41 = arith.constant 0 : index
    %70 = vector.load %arg11[%c0_39, %c0_40, %c0_41] : memref<2x32x1xf32, #tpu.memory_space<vmem>>, vector<1x32x1xf32>
    %71 = vector.shape_cast %70 : vector<1x32x1xf32> to vector<32x1xf32>
    %72 = vector.broadcast %71 : vector<32x1xf32> to vector<32x128xf32>
    %73 = arith.addf %69, %72 : vector<32x128xf32>
    %74 = arith.addf %35, %73 : vector<32x128xf32>
    %c1_42 = arith.constant 1 : index
    %c0_43 = arith.constant 0 : index
    %c0_44 = arith.constant 0 : index
    %75 = vector.load %arg6[%c1_42, %c0_43, %c0_44] : memref<2x32x1xf32, #tpu.memory_space<vmem>>, vector<1x32x1xf32>
    %76 = vector.shape_cast %75 : vector<1x32x1xf32> to vector<32x1xf32>
    %c1_45 = arith.constant 1 : index
    %c0_46 = arith.constant 0 : index
    %c0_47 = arith.constant 0 : index
    %77 = vector.load %arg7[%c1_45, %c0_46, %c0_47] : memref<2x32x1xf32, #tpu.memory_space<vmem>>, vector<1x32x1xf32>
    %78 = vector.shape_cast %77 : vector<1x32x1xf32> to vector<32x1xf32>
    %cst_48 = arith.constant dense<0.000000e+00> : vector<1x128xf32>
    %79 = tpu.matmul %0, %74, %cst_48 {dimension_numbers = #tpu.dot_dimension_numbers<[1], [0], [0], [1], [0, 0, 1, 1], [], []>} : vector<1x32xf32>, vector<32x128xf32>, vector<1x128xf32> -> vector<1x128xf32>
    %cst_49 = arith.constant 3.125000e-02 : f32
    %80 = vector.broadcast %cst_49 : f32 to vector<1x128xf32>
    %81 = arith.mulf %79, %80 : vector<1x128xf32>
    %82 = vector.broadcast %81 : vector<1x128xf32> to vector<32x128xf32>
    %83 = arith.subf %74, %82 : vector<32x128xf32>
    %84 = arith.mulf %83, %83 : vector<32x128xf32>
    %cst_50 = arith.constant dense<0.000000e+00> : vector<1x128xf32>
    %85 = tpu.matmul %0, %84, %cst_50 {dimension_numbers = #tpu.dot_dimension_numbers<[1], [0], [0], [1], [0, 0, 1, 1], [], []>} : vector<1x32xf32>, vector<32x128xf32>, vector<1x128xf32> -> vector<1x128xf32>
    %cst_51 = arith.constant 3.125000e-02 : f32
    %86 = vector.broadcast %cst_51 : f32 to vector<1x128xf32>
    %87 = arith.mulf %85, %86 : vector<1x128xf32>
    %cst_52 = arith.constant 9.99999974E-6 : f32
    %88 = vector.broadcast %cst_52 : f32 to vector<1x128xf32>
    %89 = arith.addf %87, %88 : vector<1x128xf32>
    %90 = math.rsqrt %89 : vector<1x128xf32>
    %91 = vector.broadcast %90 : vector<1x128xf32> to vector<32x128xf32>
    %92 = arith.mulf %83, %91 : vector<32x128xf32>
    %93 = vector.broadcast %76 : vector<32x1xf32> to vector<32x128xf32>
    %94 = arith.mulf %92, %93 : vector<32x128xf32>
    %95 = vector.broadcast %78 : vector<32x1xf32> to vector<32x128xf32>
    %96 = arith.addf %94, %95 : vector<32x128xf32>
    %c1_53 = arith.constant 1 : index
    %c0_54 = arith.constant 0 : index
    %c0_55 = arith.constant 0 : index
    %97 = vector.load %arg8[%c1_53, %c0_54, %c0_55] : memref<2x128x32xf32, #tpu.memory_space<vmem>>, vector<1x128x32xf32>
    %98 = vector.shape_cast %97 : vector<1x128x32xf32> to vector<128x32xf32>
    %cst_56 = arith.constant dense<0.000000e+00> : vector<128x128xf32>
    %99 = tpu.matmul %98, %96, %cst_56 {dimension_numbers = #tpu.dot_dimension_numbers<[1], [0], [0], [1], [0, 0, 1, 1], [], []>} : vector<128x32xf32>, vector<32x128xf32>, vector<128x128xf32> -> vector<128x128xf32>
    %c1_57 = arith.constant 1 : index
    %c0_58 = arith.constant 0 : index
    %c0_59 = arith.constant 0 : index
    %100 = vector.load %arg9[%c1_57, %c0_58, %c0_59] : memref<2x128x1xf32, #tpu.memory_space<vmem>>, vector<1x128x1xf32>
    %101 = vector.shape_cast %100 : vector<1x128x1xf32> to vector<128x1xf32>
    %102 = vector.broadcast %101 : vector<128x1xf32> to vector<128x128xf32>
    %103 = arith.addf %99, %102 : vector<128x128xf32>
    %cst_60 = arith.constant 0.000000e+00 : f32
    %104 = vector.broadcast %cst_60 : f32 to vector<128x128xf32>
    %105 = arith.maximumf %103, %104 : vector<128x128xf32>
    %c1_61 = arith.constant 1 : index
    %c0_62 = arith.constant 0 : index
    %c0_63 = arith.constant 0 : index
    %106 = vector.load %arg10[%c1_61, %c0_62, %c0_63] : memref<2x32x128xf32, #tpu.memory_space<vmem>>, vector<1x32x128xf32>
    %107 = vector.shape_cast %106 : vector<1x32x128xf32> to vector<32x128xf32>
    %cst_64 = arith.constant dense<0.000000e+00> : vector<32x128xf32>
    %108 = tpu.matmul %107, %105, %cst_64 {dimension_numbers = #tpu.dot_dimension_numbers<[1], [0], [0], [1], [0, 0, 1, 1], [], []>} : vector<32x128xf32>, vector<128x128xf32>, vector<32x128xf32> -> vector<32x128xf32>
    %c1_65 = arith.constant 1 : index
    %c0_66 = arith.constant 0 : index
    %c0_67 = arith.constant 0 : index
    %109 = vector.load %arg11[%c1_65, %c0_66, %c0_67] : memref<2x32x1xf32, #tpu.memory_space<vmem>>, vector<1x32x1xf32>
    %110 = vector.shape_cast %109 : vector<1x32x1xf32> to vector<32x1xf32>
    %111 = vector.broadcast %110 : vector<32x1xf32> to vector<32x128xf32>
    %112 = arith.addf %108, %111 : vector<32x128xf32>
    %113 = arith.addf %74, %112 : vector<32x128xf32>
    %c0_68 = arith.constant 0 : index
    %c0_69 = arith.constant 0 : index
    %114 = vector.load %arg12[%c0_68, %c0_69] : memref<32x1xf32, #tpu.memory_space<vmem>>, vector<32x1xf32>
    %c0_70 = arith.constant 0 : index
    %c0_71 = arith.constant 0 : index
    %115 = vector.load %arg13[%c0_70, %c0_71] : memref<32x1xf32, #tpu.memory_space<vmem>>, vector<32x1xf32>
    %cst_72 = arith.constant dense<0.000000e+00> : vector<1x128xf32>
    %116 = tpu.matmul %0, %113, %cst_72 {dimension_numbers = #tpu.dot_dimension_numbers<[1], [0], [0], [1], [0, 0, 1, 1], [], []>} : vector<1x32xf32>, vector<32x128xf32>, vector<1x128xf32> -> vector<1x128xf32>
    %cst_73 = arith.constant 3.125000e-02 : f32
    %117 = vector.broadcast %cst_73 : f32 to vector<1x128xf32>
    %118 = arith.mulf %116, %117 : vector<1x128xf32>
    %119 = vector.broadcast %118 : vector<1x128xf32> to vector<32x128xf32>
    %120 = arith.subf %113, %119 : vector<32x128xf32>
    %121 = arith.mulf %120, %120 : vector<32x128xf32>
    %cst_74 = arith.constant dense<0.000000e+00> : vector<1x128xf32>
    %122 = tpu.matmul %0, %121, %cst_74 {dimension_numbers = #tpu.dot_dimension_numbers<[1], [0], [0], [1], [0, 0, 1, 1], [], []>} : vector<1x32xf32>, vector<32x128xf32>, vector<1x128xf32> -> vector<1x128xf32>
    %cst_75 = arith.constant 3.125000e-02 : f32
    %123 = vector.broadcast %cst_75 : f32 to vector<1x128xf32>
    %124 = arith.mulf %122, %123 : vector<1x128xf32>
    %cst_76 = arith.constant 9.99999974E-6 : f32
    %125 = vector.broadcast %cst_76 : f32 to vector<1x128xf32>
    %126 = arith.addf %124, %125 : vector<1x128xf32>
    %127 = math.rsqrt %126 : vector<1x128xf32>
    %128 = vector.broadcast %127 : vector<1x128xf32> to vector<32x128xf32>
    %129 = arith.mulf %120, %128 : vector<32x128xf32>
    %130 = vector.broadcast %114 : vector<32x1xf32> to vector<32x128xf32>
    %131 = arith.mulf %129, %130 : vector<32x128xf32>
    %132 = vector.broadcast %115 : vector<32x1xf32> to vector<32x128xf32>
    %133 = arith.addf %131, %132 : vector<32x128xf32>
    %cst_77 = arith.constant 0.000000e+00 : f32
    %134 = vector.broadcast %cst_77 : f32 to vector<32x128xf32>
    %135 = arith.maximumf %133, %134 : vector<32x128xf32>
    %c0_78 = arith.constant 0 : index
    %c0_79 = arith.constant 0 : index
    %136 = vector.load %arg14[%c0_78, %c0_79] : memref<1x32xf32, #tpu.memory_space<vmem>>, vector<1x32xf32>
    %cst_80 = arith.constant dense<0.000000e+00> : vector<1x128xf32>
    %137 = tpu.matmul %136, %135, %cst_80 {dimension_numbers = #tpu.dot_dimension_numbers<[1], [0], [0], [1], [0, 0, 1, 1], [], []>} : vector<1x32xf32>, vector<32x128xf32>, vector<1x128xf32> -> vector<1x128xf32>
    %c0_81 = arith.constant 0 : index
    %c0_82 = arith.constant 0 : index
    %138 = vector.load %arg15[%c0_81, %c0_82] : memref<1x1xf32, #tpu.memory_space<vmem>>, vector<1x1xf32>
    %139 = vector.broadcast %138 : vector<1x1xf32> to vector<1x128xf32>
    %140 = arith.addf %137, %139 : vector<1x128xf32>
    %c0_83 = arith.constant 0 : index
    %c0_84 = arith.constant 0 : index
    %141 = vector.load %arg16[%c0_83, %c0_84] : memref<1x128xf32, #tpu.memory_space<vmem>>, vector<1x128xf32>
    tpu.vector_store %arg16[%c0_83, %c0_84], %140 {strides = array<i32>} : memref<1x128xf32, #tpu.memory_space<vmem>>, vector<1x128xf32>,
    return
  }
  func.func @transform_0(%arg0: i32) -> (i32, i32) {
    %c0_i32 = arith.constant 0 : i32
    %c0_i32_0 = arith.constant 0 : i32
    return %c0_i32, %arg0 : i32, i32
  }
  func.func @transform_1(%arg0: i32) -> (i32, i32) {
    %c0_i32 = arith.constant 0 : i32
    %c0_i32_0 = arith.constant 0 : i32
    return %c0_i32, %arg0 : i32, i32
  }
  func.func @transform_2(%arg0: i32) -> (i32, i32) {
    %c0_i32 = arith.constant 0 : i32
    %c0_i32_0 = arith.constant 0 : i32
    %c0_i32_1 = arith.constant 0 : i32
    return %c0_i32, %c0_i32_0 : i32, i32
  }
  func.func @transform_3(%arg0: i32) -> (i32, i32) {
    %c0_i32 = arith.constant 0 : i32
    %c0_i32_0 = arith.constant 0 : i32
    %c0_i32_1 = arith.constant 0 : i32
    return %c0_i32, %c0_i32_0 : i32, i32
  }
  func.func @transform_4(%arg0: i32) -> (i32, i32) {
    %c0_i32 = arith.constant 0 : i32
    %c0_i32_0 = arith.constant 0 : i32
    %c0_i32_1 = arith.constant 0 : i32
    return %c0_i32, %c0_i32_0 : i32, i32
  }
  func.func @transform_5(%arg0: i32) -> (i32, i32, i32) {
    %c0_i32 = arith.constant 0 : i32
    %c0_i32_0 = arith.constant 0 : i32
    %c0_i32_1 = arith.constant 0 : i32
    %c0_i32_2 = arith.constant 0 : i32
    return %c0_i32, %c0_i32_0, %c0_i32_1 : i32, i32, i32
  }
  func.func @transform_6(%arg0: i32) -> (i32, i32, i32) {
    %c0_i32 = arith.constant 0 : i32
    %c0_i32_0 = arith.constant 0 : i32
    %c0_i32_1 = arith.constant 0 : i32
    %c0_i32_2 = arith.constant 0 : i32
    return %c0_i32, %c0_i32_0, %c0_i32_1 : i32, i32, i32
  }
  func.func @transform_7(%arg0: i32) -> (i32, i32, i32) {
    %c0_i32 = arith.constant 0 : i32
    %c0_i32_0 = arith.constant 0 : i32
    %c0_i32_1 = arith.constant 0 : i32
    %c0_i32_2 = arith.constant 0 : i32
    return %c0_i32, %c0_i32_0, %c0_i32_1 : i32, i32, i32
  }
  func.func @transform_8(%arg0: i32) -> (i32, i32, i32) {
    %c0_i32 = arith.constant 0 : i32
    %c0_i32_0 = arith.constant 0 : i32
    %c0_i32_1 = arith.constant 0 : i32
    %c0_i32_2 = arith.constant 0 : i32
    return %c0_i32, %c0_i32_0, %c0_i32_1 : i32, i32, i32
  }
  func.func @transform_9(%arg0: i32) -> (i32, i32, i32) {
    %c0_i32 = arith.constant 0 : i32
    %c0_i32_0 = arith.constant 0 : i32
    %c0_i32_1 = arith.constant 0 : i32
    %c0_i32_2 = arith.constant 0 : i32
    return %c0_i32, %c0_i32_0, %c0_i32_1 : i32, i32, i32
  }
  func.func @transform_10(%arg0: i32) -> (i32, i32, i32) {
    %c0_i32 = arith.constant 0 : i32
    %c0_i32_0 = arith.constant 0 : i32
    %c0_i32_1 = arith.constant 0 : i32
    %c0_i32_2 = arith.constant 0 : i32
    return %c0_i32, %c0_i32_0, %c0_i32_1 : i32, i32, i32
  }
  func.func @transform_11(%arg0: i32) -> (i32, i32) {
    %c0_i32 = arith.constant 0 : i32
    %c0_i32_0 = arith.constant 0 : i32
    %c0_i32_1 = arith.constant 0 : i32
    return %c0_i32, %c0_i32_0 : i32, i32
  }
  func.func @transform_12(%arg0: i32) -> (i32, i32) {
    %c0_i32 = arith.constant 0 : i32
    %c0_i32_0 = arith.constant 0 : i32
    %c0_i32_1 = arith.constant 0 : i32
    return %c0_i32, %c0_i32_0 : i32, i32
  }
  func.func @transform_13(%arg0: i32) -> (i32, i32) {
    %c0_i32 = arith.constant 0 : i32
    %c0_i32_0 = arith.constant 0 : i32
    %c0_i32_1 = arith.constant 0 : i32
    return %c0_i32, %c0_i32_0 : i32, i32
  }
  func.func @transform_14(%arg0: i32) -> (i32, i32) {
    %c0_i32 = arith.constant 0 : i32
    %c0_i32_0 = arith.constant 0 : i32
    %c0_i32_1 = arith.constant 0 : i32
    return %c0_i32, %c0_i32_0 : i32, i32
  }
  func.func @transform_15(%arg0: i32) -> (i32, i32) {
    %c0_i32 = arith.constant 0 : i32
    %c0_i32_0 = arith.constant 0 : i32
    return %c0_i32, %arg0 : i32, i32
  }
}

module attributes {stable_mosaic.version = 11 : i64} {
  func.func @resnet_kernel(%arg0: i32, %arg1: memref<20x128xf32, #tpu.memory_space<vmem>>, %arg2: memref<3x128xi32, #tpu.memory_space<vmem>>, %arg3: memref<32x20xf32, #tpu.memory_space<vmem>>, %arg4: memref<32x1xf32, #tpu.memory_space<vmem>>, %arg5: memref<32x15xf32, #tpu.memory_space<vmem>>, %arg6: memref<2x32x1xf32, #tpu.memory_space<vmem>>, %arg7: memref<2x32x1xf32, #tpu.memory_space<vmem>>, %arg8: memref<2x128x32xf32, #tpu.memory_space<vmem>>, %arg9: memref<2x128x1xf32, #tpu.memory_space<vmem>>, %arg10: memref<2x32x128xf32, #tpu.memory_space<vmem>>, %arg11: memref<2x32x1xf32, #tpu.memory_space<vmem>>, %arg12: memref<32x1xf32, #tpu.memory_space<vmem>>, %arg13: memref<32x1xf32, #tpu.memory_space<vmem>>, %arg14: memref<1x32xf32, #tpu.memory_space<vmem>>, %arg15: memref<1x1xf32, #tpu.memory_space<vmem>>, %arg16: memref<1x128xf32, #tpu.memory_space<vmem>>) attributes {dimension_semantics = [#tpu.dimension_semantics<parallel>], iteration_bounds = array<i64: 1>, scalar_prefetch = 0 : i64, scratch_operands = 0 : i64, tpu.core_type = #tpu.core_type<tc>, window_params = [{transform_indices = @transform_0, window_bounds = array<i64: 20, 128>}, {transform_indices = @transform_1, window_bounds = array<i64: 3, 128>}, {pipeline_mode = #tpu.pipeline_mode<synchronous>, transform_indices = @transform_2, window_bounds = array<i64: 32, 20>}, {pipeline_mode = #tpu.pipeline_mode<synchronous>, transform_indices = @transform_3, window_bounds = array<i64: 32, 1>}, {pipeline_mode = #tpu.pipeline_mode<synchronous>, transform_indices = @transform_4, window_bounds = array<i64: 32, 15>}, {pipeline_mode = #tpu.pipeline_mode<synchronous>, transform_indices = @transform_5, window_bounds = array<i64: 2, 32, 1>}, {pipeline_mode = #tpu.pipeline_mode<synchronous>, transform_indices = @transform_6, window_bounds = array<i64: 2, 32, 1>}, {pipeline_mode = #tpu.pipeline_mode<synchronous>, transform_indices = @transform_7, window_bounds = array<i64: 2, 128, 32>}, {pipeline_mode = #tpu.pipeline_mode<synchronous>, transform_indices = @transform_8, window_bounds = array<i64: 2, 128, 1>}, {pipeline_mode = #tpu.pipeline_mode<synchronous>, transform_indices = @transform_9, window_bounds = array<i64: 2, 32, 128>}, {pipeline_mode = #tpu.pipeline_mode<synchronous>, transform_indices = @transform_10, window_bounds = array<i64: 2, 32, 1>}, {pipeline_mode = #tpu.pipeline_mode<synchronous>, transform_indices = @transform_11, window_bounds = array<i64: 32, 1>}, {pipeline_mode = #tpu.pipeline_mode<synchronous>, transform_indices = @transform_12, window_bounds = array<i64: 32, 1>}, {pipeline_mode = #tpu.pipeline_mode<synchronous>, transform_indices = @transform_13, window_bounds = array<i64: 1, 32>}, {pipeline_mode = #tpu.pipeline_mode<synchronous>, transform_indices = @transform_14, window_bounds = array<i64: 1, 1>}, {transform_indices = @transform_15, window_bounds = array<i64: 1, 128>}]} {
    %cst = arith.constant 1.000000e+00 : f32
    %0 = vector.broadcast %cst : f32 to vector<1x32xf32>
    %c0 = arith.constant 0 : index
    %c0_0 = arith.constant 0 : index
    %1 = vector.load %arg3[%c0, %c0_0] : memref<32x20xf32, #tpu.memory_space<vmem>>, vector<32x20xf32>
    %c0_1 = arith.constant 0 : index
    %c0_2 = arith.constant 0 : index
    %2 = vector.load %arg1[%c0_1, %c0_2] : memref<20x128xf32, #tpu.memory_space<vmem>>, vector<20x128xf32>
    %cst_3 = arith.constant dense<0.000000e+00> : vector<32x128xf32>
    %3 = tpu.matmul %1, %2, %cst_3 {dimension_numbers = #tpu.dot_dimension_numbers<[1], [0], [0], [1], [0, 0, 1, 1], [], []>} : vector<32x20xf32>, vector<20x128xf32>, vector<32x128xf32> -> vector<32x128xf32>
    %c0_4 = arith.constant 0 : index
    %c0_5 = arith.constant 0 : index
    %4 = vector.load %arg4[%c0_4, %c0_5] : memref<32x1xf32, #tpu.memory_space<vmem>>, vector<32x1xf32>
    %5 = vector.broadcast %4 : vector<32x1xf32> to vector<32x128xf32>
    %6 = arith.addf %3, %5 : vector<32x128xf32>
    %7 = tpu.iota {dimensions = array<i32: 0>} : vector<15x128xi32>
    %cst_6 = arith.constant 0.000000e+00 : f32
    %8 = vector.broadcast %cst_6 : f32 to vector<15x128xf32>
    %c0_7 = arith.constant 0 : index
    %c0_8 = arith.constant 0 : index
    %9 = vector.load %arg2[%c0_7, %c0_8] : memref<3x128xi32, #tpu.memory_space<vmem>>, vector<1x128xi32>
    %c0_i32 = arith.constant 0 : i32
    %10 = vector.broadcast %c0_i32 : i32 to vector<15x128xi32>
    %11 = arith.addi %7, %10 : vector<15x128xi32>
    %12 = vector.broadcast %9 : vector<1x128xi32> to vector<15x128xi32>
    %13 = arith.cmpi eq, %11, %12 : vector<15x128xi32>
    %14 = arith.extui %13 : vector<15x128xi1> to vector<15x128xi32>
    %15 = arith.sitofp %14 : vector<15x128xi32> to vector<15x128xf32>
    %16 = arith.addf %8, %15 : vector<15x128xf32>
    %c1 = arith.constant 1 : index
    %c0_9 = arith.constant 0 : index
    %17 = vector.load %arg2[%c1, %c0_9] : memref<3x128xi32, #tpu.memory_space<vmem>>, vector<1x128xi32>
    %c0_i32_10 = arith.constant 0 : i32
    %18 = vector.broadcast %c0_i32_10 : i32 to vector<15x128xi32>
    %19 = arith.addi %7, %18 : vector<15x128xi32>
    %20 = vector.broadcast %17 : vector<1x128xi32> to vector<15x128xi32>
    %21 = arith.cmpi eq, %19, %20 : vector<15x128xi32>
    %22 = arith.extui %21 : vector<15x128xi1> to vector<15x128xi32>
    %23 = arith.sitofp %22 : vector<15x128xi32> to vector<15x128xf32>
    %24 = arith.addf %16, %23 : vector<15x128xf32>
    %c2 = arith.constant 2 : index
    %c0_11 = arith.constant 0 : index
    %25 = vector.load %arg2[%c2, %c0_11] : memref<3x128xi32, #tpu.memory_space<vmem>>, vector<1x128xi32>
    %c0_i32_12 = arith.constant 0 : i32
    %26 = vector.broadcast %c0_i32_12 : i32 to vector<15x128xi32>
    %27 = arith.addi %7, %26 : vector<15x128xi32>
    %28 = vector.broadcast %25 : vector<1x128xi32> to vector<15x128xi32>
    %29 = arith.cmpi eq, %27, %28 : vector<15x128xi32>
    %30 = arith.extui %29 : vector<15x128xi1> to vector<15x128xi32>
    %31 = arith.sitofp %30 : vector<15x128xi32> to vector<15x128xf32>
    %32 = arith.addf %24, %31 : vector<15x128xf32>
    %c0_13 = arith.constant 0 : index
    %c0_14 = arith.constant 0 : index
    %33 = vector.load %arg5[%c0_13, %c0_14] : memref<32x15xf32, #tpu.memory_space<vmem>>, vector<32x15xf32>
    %cst_15 = arith.constant dense<0.000000e+00> : vector<32x128xf32>
    %34 = tpu.matmul %33, %32, %cst_15 {dimension_numbers = #tpu.dot_dimension_numbers<[1], [0], [0], [1], [0, 0, 1, 1], [], []>} : vector<32x15xf32>, vector<15x128xf32>, vector<32x128xf32> -> vector<32x128xf32>
    %35 = arith.addf %6, %34 : vector<32x128xf32>
    %c0_16 = arith.constant 0 : index
    %c0_17 = arith.constant 0 : index
    %c0_18 = arith.constant 0 : index
    %36 = vector.load %arg6[%c0_16, %c0_17, %c0_18] : memref<2x32x1xf32, #tpu.memory_space<vmem>>, vector<1x32x1xf32>
    %37 = vector.shape_cast %36 : vector<1x32x1xf32> to vector<32x1xf32>
    %c0_19 = arith.constant 0 : index
    %c0_20 = arith.constant 0 : index
    %c0_21 = arith.constant 0 : index
    %38 = vector.load %arg7[%c0_19, %c0_20, %c0_21] : memref<2x32x1xf32, #tpu.memory_space<vmem>>, vector<1x32x1xf32>
    %39 = vector.shape_cast %38 : vector<1x32x1xf32> to vector<32x1xf32>
    %cst_22 = arith.constant dense<0.000000e+00> : vector<1x128xf32>
    %40 = tpu.matmul %0, %35, %cst_22 {dimension_numbers = #tpu.dot_dimension_numbers<[1], [0], [0], [1], [0, 0, 1, 1], [], []>} : vector<1x32xf32>, vector<32x128xf32>, vector<1x128xf32> -> vector<1x128xf32>
    %cst_23 = arith.constant 3.125000e-02 : f32
    %41 = vector.broadcast %cst_23 : f32 to vector<1x128xf32>
    %42 = arith.mulf %40, %41 : vector<1x128xf32>
    %43 = vector.broadcast %42 : vector<1x128xf32> to vector<32x128xf32>
    %44 = arith.subf %35, %43 : vector<32x128xf32>
    %45 = arith.mulf %44, %44 : vector<32x128xf32>
    %cst_24 = arith.constant dense<0.000000e+00> : vector<1x128xf32>
    %46 = tpu.matmul %0, %45, %cst_24 {dimension_numbers = #tpu.dot_dimension_numbers<[1], [0], [0], [1], [0, 0, 1, 1], [], []>} : vector<1x32xf32>, vector<32x128xf32>, vector<1x128xf32> -> vector<1x128xf32>
    %cst_25 = arith.constant 3.125000e-02 : f32
    %47 = vector.broadcast %cst_25 : f32 to vector<1x128xf32>
    %48 = arith.mulf %46, %47 : vector<1x128xf32>
    %cst_26 = arith.constant 9.99999974E-6 : f32
    %49 = vector.broadcast %cst_26 : f32 to vector<1x128xf32>
    %50 = arith.addf %48, %49 : vector<1x128xf32>
    %51 = math.rsqrt %50 : vector<1x128xf32>
    %52 = vector.broadcast %51 : vector<1x128xf32> to vector<32x128xf32>
    %53 = arith.mulf %44, %52 : vector<32x128xf32>
    %54 = vector.broadcast %37 : vector<32x1xf32> to vector<32x128xf32>
    %55 = arith.mulf %53, %54 : vector<32x128xf32>
    %56 = vector.broadcast %39 : vector<32x1xf32> to vector<32x128xf32>
    %57 = arith.addf %55, %56 : vector<32x128xf32>
    %c0_27 = arith.constant 0 : index
    %c0_28 = arith.constant 0 : index
    %c0_29 = arith.constant 0 : index
    %58 = vector.load %arg8[%c0_27, %c0_28, %c0_29] : memref<2x128x32xf32, #tpu.memory_space<vmem>>, vector<1x128x32xf32>
    %59 = vector.shape_cast %58 : vector<1x128x32xf32> to vector<128x32xf32>
    %cst_30 = arith.constant dense<0.000000e+00> : vector<128x128xf32>
    %60 = tpu.matmul %59, %57, %cst_30 {dimension_numbers = #tpu.dot_dimension_numbers<[1], [0], [0], [1], [0, 0, 1, 1], [], []>} : vector<128x32xf32>, vector<32x128xf32>, vector<128x128xf32> -> vector<128x128xf32>
    %c0_31 = arith.constant 0 : index
    %c0_32 = arith.constant 0 : index
    %c0_33 = arith.constant 0 : index
    %61 = vector.load %arg9[%c0_31, %c0_32, %c0_33] : memref<2x128x1xf32, #tpu.memory_space<vmem>>, vector<1x128x1xf32>
    %62 = vector.shape_cast %61 : vector<1x128x1xf32> to vector<128x1xf32>
    %63 = vector.broadcast %62 : vector<128x1xf32> to vector<128x128xf32>
    %64 = arith.addf %60, %63 : vector<128x128xf32>
    %cst_34 = arith.constant 0.000000e+00 : f32
    %65 = vector.broadcast %cst_34 : f32 to vector<128x128xf32>
    %66 = arith.maximumf %64, %65 : vector<128x128xf32>
    %c0_35 = arith.constant 0 : index
    %c0_36 = arith.constant 0 : index
    %c0_37 = arith.constant 0 : index
    %67 = vector.load %arg10[%c0_35, %c0_36, %c0_37] : memref<2x32x128xf32, #tpu.memory_space<vmem>>, vector<1x32x128xf32>
    %68 = vector.shape_cast %67 : vector<1x32x128xf32> to vector<32x128xf32>
    %cst_38 = arith.constant dense<0.000000e+00> : vector<32x128xf32>
    %69 = tpu.matmul %68, %66, %cst_38 {dimension_numbers = #tpu.dot_dimension_numbers<[1], [0], [0], [1], [0, 0, 1, 1], [], []>} : vector<32x128xf32>, vector<128x128xf32>, vector<32x128xf32> -> vector<32x128xf32>
    %c0_39 = arith.constant 0 : index
    %c0_40 = arith.constant 0 : index
    %c0_41 = arith.constant 0 : index
    %70 = vector.load %arg11[%c0_39, %c0_40, %c0_41] : memref<2x32x1xf32, #tpu.memory_space<vmem>>, vector<1x32x1xf32>
    %71 = vector.shape_cast %70 : vector<1x32x1xf32> to vector<32x1xf32>
    %72 = vector.broadcast %71 : vector<32x1xf32> to vector<32x128xf32>
    %73 = arith.addf %69, %72 : vector<32x128xf32>
    %74 = arith.addf %35, %73 : vector<32x128xf32>
    %c1_42 = arith.constant 1 : index
    %c0_43 = arith.constant 0 : index
    %c0_44 = arith.constant 0 : index
    %75 = vector.load %arg6[%c1_42, %c0_43, %c0_44] : memref<2x32x1xf32, #tpu.memory_space<vmem>>, vector<1x32x1xf32>
    %76 = vector.shape_cast %75 : vector<1x32x1xf32> to vector<32x1xf32>
    %c1_45 = arith.constant 1 : index
    %c0_46 = arith.constant 0 : index
    %c0_47 = arith.constant 0 : index
    %77 = vector.load %arg7[%c1_45, %c0_46, %c0_47] : memref<2x32x1xf32, #tpu.memory_space<vmem>>, vector<1x32x1xf32>
    %78 = vector.shape_cast %77 : vector<1x32x1xf32> to vector<32x1xf32>
    %cst_48 = arith.constant dense<0.000000e+00> : vector<1x128xf32>
    %79 = tpu.matmul %0, %74, %cst_48 {dimension_numbers = #tpu.dot_dimension_numbers<[1], [0], [0], [1], [0, 0, 1, 1], [], []>} : vector<1x32xf32>, vector<32x128xf32>, vector<1x128xf32> -> vector<1x128xf32>
    %cst_49 = arith.constant 3.125000e-02 : f32
    %80 = vector.broadcast %cst_49 : f32 to vector<1x128xf32>
    %81 = arith.mulf %79, %80 : vector<1x128xf32>
    %82 = vector.broadcast %81 : vector<1x128xf32> to vector<32x128xf32>
    %83 = arith.subf %74, %82 : vector<32x128xf32>
    %84 = arith.mulf %83, %83 : vector<32x128xf32>
    %cst_50 = arith.constant dense<0.000000e+00> : vector<1x128xf32>
    %85 = tpu.matmul %0, %84, %cst_50 {dimension_numbers = #tpu.dot_dimension_numbers<[1], [0], [0], [1], [0, 0, 1, 1], [], []>} : vector<1x32xf32>, vector<32x128xf32>, vector<1x128xf32> -> vector<1x128xf32>
    %cst_51 = arith.constant 3.125000e-02 : f32
    %86 = vector.broadcast %cst_51 : f32 to vector<1x128xf32>
    %87 = arith.mulf %85, %86 : vector<1x128xf32>
    %cst_52 = arith.constant 9.99999974E-6 : f32
    %88 = vector.broadcast %cst_52 : f32 to vector<1x128xf32>
    %89 = arith.addf %87, %88 : vector<1x128xf32>
    %90 = math.rsqrt %89 : vector<1x128xf32>
    %91 = vector.broadcast %90 : vector<1x128xf32> to vector<32x128xf32>
    %92 = arith.mulf %83, %91 : vector<32x128xf32>
    %93 = vector.broadcast %76 : vector<32x1xf32> to vector<32x128xf32>
    %94 = arith.mulf %92, %93 : vector<32x128xf32>
    %95 = vector.broadcast %78 : vector<32x1xf32> to vector<32x128xf32>
    %96 = arith.addf %94, %95 : vector<32x128xf32>
    %c1_53 = arith.constant 1 : index
    %c0_54 = arith.constant 0 : index
    %c0_55 = arith.constant 0 : index
    %97 = vector.load %arg8[%c1_53, %c0_54, %c0_55] : memref<2x128x32xf32, #tpu.memory_space<vmem>>, vector<1x128x32xf32>
    %98 = vector.shape_cast %97 : vector<1x128x32xf32> to vector<128x32xf32>
    %cst_56 = arith.constant dense<0.000000e+00> : vector<128x128xf32>
    %99 = tpu.matmul %98, %96, %cst_56 {dimension_numbers = #tpu.dot_dimension_numbers<[1], [0], [0], [1], [0, 0, 1, 1], [], []>} : vector<128x32xf32>, vector<32x128xf32>, vector<128x128xf32> -> vector<128x128xf32>
    %c1_57 = arith.constant 1 : index
    %c0_58 = arith.constant 0 : index
    %c0_59 = arith.constant 0 : index
    %100 = vector.load %arg9[%c1_57, %c0_58, %c0_59] : memref<2x128x1xf32, #tpu.memory_space<vmem>>, vector<1x128x1xf32>
    %101 = vector.shape_cast %100 : vector<1x128x1xf32> to vector<128x1xf32>
    %102 = vector.broadcast %101 : vector<128x1xf32> to vector<128x128xf32>
    %103 = arith.addf %99, %102 : vector<128x128xf32>
    %cst_60 = arith.constant 0.000000e+00 : f32
    %104 = vector.broadcast %cst_60 : f32 to vector<128x128xf32>
    %105 = arith.maximumf %103, %104 : vector<128x128xf32>
    %c1_61 = arith.constant 1 : index
    %c0_62 = arith.constant 0 : index
    %c0_63 = arith.constant 0 : index
    %106 = vector.load %arg10[%c1_61, %c0_62, %c0_63] : memref<2x32x128xf32, #tpu.memory_space<vmem>>, vector<1x32x128xf32>
    %107 = vector.shape_cast %106 : vector<1x32x128xf32> to vector<32x128xf32>
    %cst_64 = arith.constant dense<0.000000e+00> : vector<32x128xf32>
    %108 = tpu.matmul %107, %105, %cst_64 {dimension_numbers = #tpu.dot_dimension_numbers<[1], [0], [0], [1], [0, 0, 1, 1], [], []>} : vector<32x128xf32>, vector<128x128xf32>, vector<32x128xf32> -> vector<32x128xf32>
    %c1_65 = arith.constant 1 : index
    %c0_66 = arith.constant 0 : index
    %c0_67 = arith.constant 0 : index
    %109 = vector.load %arg11[%c1_65, %c0_66, %c0_67] : memref<2x32x1xf32, #tpu.memory_space<vmem>>, vector<1x32x1xf32>
    %110 = vector.shape_cast %109 : vector<1x32x1xf32> to vector<32x1xf32>
    %111 = vector.broadcast %110 : vector<32x1xf32> to vector<32x128xf32>
    %112 = arith.addf %108, %111 : vector<32x128xf32>
    %113 = arith.addf %74, %112 : vector<32x128xf32>
    %c0_68 = arith.constant 0 : index
    %c0_69 = arith.constant 0 : index
    %114 = vector.load %arg12[%c0_68, %c0_69] : memref<32x1xf32, #tpu.memory_space<vmem>>, vector<32x1xf32>
    %c0_70 = arith.constant 0 : index
    %c0_71 = arith.constant 0 : index
    %115 = vector.load %arg13[%c0_70, %c0_71] : memref<32x1xf32, #tpu.memory_space<vmem>>, vector<32x1xf32>
    %cst_72 = arith.constant dense<0.000000e+00> : vector<1x128xf32>
    %116 = tpu.matmul %0, %113, %cst_72 {dimension_numbers = #tpu.dot_dimension_numbers<[1], [0], [0], [1], [0, 0, 1, 1], [], []>} : vector<1x32xf32>, vector<32x128xf32>, vector<1x128xf32> -> vector<1x128xf32>
    %cst_73 = arith.constant 3.125000e-02 : f32
    %117 = vector.broadcast %cst_73 : f32 to vector<1x128xf32>
    %118 = arith.mulf %116, %117 : vector<1x128xf32>
    %119 = vector.broadcast %118 : vector<1x128xf32> to vector<32x128xf32>
    %120 = arith.subf %113, %119 : vector<32x128xf32>
    %121 = arith.mulf %120, %120 : vector<32x128xf32>
    %cst_74 = arith.constant dense<0.000000e+00> : vector<1x128xf32>
    %122 = tpu.matmul %0, %121, %cst_74 {dimension_numbers = #tpu.dot_dimension_numbers<[1], [0], [0], [1], [0, 0, 1, 1], [], []>} : vector<1x32xf32>, vector<32x128xf32>, vector<1x128xf32> -> vector<1x128xf32>
    %cst_75 = arith.constant 3.125000e-02 : f32
    %123 = vector.broadcast %cst_75 : f32 to vector<1x128xf32>
    %124 = arith.mulf %122, %123 : vector<1x128xf32>
    %cst_76 = arith.constant 9.99999974E-6 : f32
    %125 = vector.broadcast %cst_76 : f32 to vector<1x128xf32>
    %126 = arith.addf %124, %125 : vector<1x128xf32>
    %127 = math.rsqrt %126 : vector<1x128xf32>
    %128 = vector.broadcast %127 : vector<1x128xf32> to vector<32x128xf32>
    %129 = arith.mulf %120, %128 : vector<32x128xf32>
    %130 = vector.broadcast %114 : vector<32x1xf32> to vector<32x128xf32>
    %131 = arith.mulf %129, %130 : vector<32x128xf32>
    %132 = vector.broadcast %115 : vector<32x1xf32> to vector<32x128xf32>
    %133 = arith.addf %131, %132 : vector<32x128xf32>
    %cst_77 = arith.constant 0.000000e+00 : f32
    %134 = vector.broadcast %cst_77 : f32 to vector<32x128xf32>
    %135 = arith.maximumf %133, %134 : vector<32x128xf32>
    %c0_78 = arith.constant 0 : index
    %c0_79 = arith.constant 0 : index
    %136 = vector.load %arg14[%c0_78, %c0_79] : memref<1x32xf32, #tpu.memory_space<vmem>>, vector<1x32xf32>
    %cst_80 = arith.constant dense<0.000000e+00> : vector<1x128xf32>
    %137 = tpu.matmul %136, %135, %cst_80 {dimension_numbers = #tpu.dot_dimension_numbers<[1], [0], [0], [1], [0, 0, 1, 1], [], []>} : vector<1x32xf32>, vector<32x128xf32>, vector<1x128xf32> -> vector<1x128xf32>
    %c0_81 = arith.constant 0 : index
    %c0_82 = arith.constant 0 : index
    %138 = vector.load %arg15[%c0_81, %c0_82] : memref<1x1xf32, #tpu.memory_space<vmem>>, vector<1x1xf32>
    %139 = vector.broadcast %138 : vector<1x1xf32> to vector<1x128xf32>
    %140 = arith.addf %137, %139 : vector<1x128xf32>
    %c0_83 = arith.constant 0 : index
    %c0_84 = arith.constant 0 : index
    %141 = vector.load %arg16[%c0_83, %c0_84] : memref<1x128xf32, #tpu.memory_space<vmem>>, vector<1x128xf32>
    tpu.vector_store %arg16[%c0_83, %c0_84], %140 {strides = array<i32>} : memref<1x128xf32, #tpu.memory_space<vmem>>, vector<1x128xf32>,
    return
  }
  func.func @transform_0(%arg0: i32) -> (i32, i32) {
    %c0_i32 = arith.constant 0 : i32
    %c0_i32_0 = arith.constant 0 : i32
    return %c0_i32, %arg0 : i32, i32
  }
  func.func @transform_1(%arg0: i32) -> (i32, i32) {
    %c0_i32 = arith.constant 0 : i32
    %c0_i32_0 = arith.constant 0 : i32
    return %c0_i32, %arg0 : i32, i32
  }
  func.func @transform_2(%arg0: i32) -> (i32, i32) {
    %c0_i32 = arith.constant 0 : i32
    %c0_i32_0 = arith.constant 0 : i32
    %c0_i32_1 = arith.constant 0 : i32
    return %c0_i32, %c0_i32_0 : i32, i32
  }
  func.func @transform_3(%arg0: i32) -> (i32, i32) {
    %c0_i32 = arith.constant 0 : i32
    %c0_i32_0 = arith.constant 0 : i32
    %c0_i32_1 = arith.constant 0 : i32
    return %c0_i32, %c0_i32_0 : i32, i32
  }
  func.func @transform_4(%arg0: i32) -> (i32, i32) {
    %c0_i32 = arith.constant 0 : i32
    %c0_i32_0 = arith.constant 0 : i32
    %c0_i32_1 = arith.constant 0 : i32
    return %c0_i32, %c0_i32_0 : i32, i32
  }
  func.func @transform_5(%arg0: i32) -> (i32, i32, i32) {
    %c0_i32 = arith.constant 0 : i32
    %c0_i32_0 = arith.constant 0 : i32
    %c0_i32_1 = arith.constant 0 : i32
    %c0_i32_2 = arith.constant 0 : i32
    return %c0_i32, %c0_i32_0, %c0_i32_1 : i32, i32, i32
  }
  func.func @transform_6(%arg0: i32) -> (i32, i32, i32) {
    %c0_i32 = arith.constant 0 : i32
    %c0_i32_0 = arith.constant 0 : i32
    %c0_i32_1 = arith.constant 0 : i32
    %c0_i32_2 = arith.constant 0 : i32
    return %c0_i32, %c0_i32_0, %c0_i32_1 : i32, i32, i32
  }
  func.func @transform_7(%arg0: i32) -> (i32, i32, i32) {
    %c0_i32 = arith.constant 0 : i32
    %c0_i32_0 = arith.constant 0 : i32
    %c0_i32_1 = arith.constant 0 : i32
    %c0_i32_2 = arith.constant 0 : i32
    return %c0_i32, %c0_i32_0, %c0_i32_1 : i32, i32, i32
  }
  func.func @transform_8(%arg0: i32) -> (i32, i32, i32) {
    %c0_i32 = arith.constant 0 : i32
    %c0_i32_0 = arith.constant 0 : i32
    %c0_i32_1 = arith.constant 0 : i32
    %c0_i32_2 = arith.constant 0 : i32
    return %c0_i32, %c0_i32_0, %c0_i32_1 : i32, i32, i32
  }
  func.func @transform_9(%arg0: i32) -> (i32, i32, i32) {
    %c0_i32 = arith.constant 0 : i32
    %c0_i32_0 = arith.constant 0 : i32
    %c0_i32_1 = arith.constant 0 : i32
    %c0_i32_2 = arith.constant 0 : i32
    return %c0_i32, %c0_i32_0, %c0_i32_1 : i32, i32, i32
  }
  func.func @transform_10(%arg0: i32) -> (i32, i32, i32) {
    %c0_i32 = arith.constant 0 : i32
    %c0_i32_0 = arith.constant 0 : i32
    %c0_i32_1 = arith.constant 0 : i32
    %c0_i32_2 = arith.constant 0 : i32
    return %c0_i32, %c0_i32_0, %c0_i32_1 : i32, i32, i32
  }
  func.func @transform_11(%arg0: i32) -> (i32, i32) {
    %c0_i32 = arith.constant 0 : i32
    %c0_i32_0 = arith.constant 0 : i32
    %c0_i32_1 = arith.constant 0 : i32
    return %c0_i32, %c0_i32_0 : i32, i32
  }
  func.func @transform_12(%arg0: i32) -> (i32, i32) {
    %c0_i32 = arith.constant 0 : i32
    %c0_i32_0 = arith.constant 0 : i32
    %c0_i32_1 = arith.constant 0 : i32
    return %c0_i32, %c0_i32_0 : i32, i32
  }
  func.func @transform_13(%arg0: i32) -> (i32, i32) {
    %c0_i32 = arith.constant 0 : i32
    %c0_i32_0 = arith.constant 0 : i32
    %c0_i32_1 = arith.constant 0 : i32
    return %c0_i32, %c0_i32_0 : i32, i32
  }
  func.func @transform_14(%arg0: i32) -> (i32, i32) {
    %c0_i32 = arith.constant 0 : i32
    %c0_i32_0 = arith.constant 0 : i32
    %c0_i32_1 = arith.constant 0 : i32
    return %c0_i32, %c0_i32_0 : i32, i32
  }
  func.func @transform_15(%arg0: i32) -> (i32, i32) {
    %c0_i32 = arith.constant 0 : i32
    %c0_i32_0 = arith.constant 0 : i32
    return %c0_i32, %arg0 : i32, i32
  }
}

</mosaic_0001>

<bundles_post_ra>
// kernel: tpu_custom_call.1
= control target key start
LH: loop header
LB: loop body
LE: loop exit
PB: predicated region body
PF: predicated region fallthrough
CT: control target
= control target key end

     0   :  { %s3255_s0 = inlined_call_operand.vmem [shape: f32[20,8], index: 0, kind: input, shape index: {}]   ;;  %s3256_s1 = inlined_call_operand.vmem [shape: s32[3,8], index: 1, kind: input, shape index: {}]   ;;  %s3257_s2 = inlined_call_operand.vmem [shape: f32[32,20], index: 2, kind: input, shape index: {}]   ;;  %s3258_s3 = inlined_call_operand.vmem [shape: f32[32,1], index: 3, kind: input, shape index: {}]   ;;  %s3259_s4 = inlined_call_operand.vmem [shape: f32[32,15], index: 4, kind: input, shape index: {}]   ;;  %s3260_s5 = inlined_call_operand.vmem [shape: f32[2,32,1], index: 5, kind: input, shape index: {}]   ;;  %s3261_s6 = inlined_call_operand.vmem [shape: f32[2,32,1], index: 6, kind: input, shape index: {}]   ;;  %s3262_s7 = inlined_call_operand.vmem [shape: f32[2,128,32], index: 7, kind: input, shape index: {}]   ;;  %s3263_s8 = inlined_call_operand.vmem [shape: f32[2,128,1], index: 8, kind: input, shape index: {}]   ;;  %s3264_s9 = inlined_call_operand.vmem [shape: f32[2,32,128], index: 9, kind: input, shape index: {}]   ;;  %s3265_s10 = inlined_call_operand.vmem [shape: f32[2,32,1], index: 10, kind: input, shape index: {}]   ;;  %s3266_s11 = inlined_call_operand.vmem [shape: f32[32,1], index: 11, kind: input, shape index: {}]   ;;  %s3267_s12 = inlined_call_operand.vmem [shape: f32[32,1], index: 12, kind: input, shape index: {}]   ;;  %s3268_s13 = inlined_call_operand.vmem [shape: f32[1,32], index: 13, kind: input, shape index: {}]   ;;  %s3269_s14 = inlined_call_operand.<no memory space> [shape: f32[1,1], index: 14, kind: input, shape index: {}]   ;;  %s3270_s15 = inlined_call_operand.hbm [shape: f32[1,8], index: 15, kind: output, shape index: {}]  }
   0x1   :  { %v20_v0 = vstv %s3269_s14 }
   0x2   :  { %21 = vst [vmem:[#allocation2] sm:$0x1] %v20_v0 }
   0x3   :  { %v62_v1 = vld [vmem:[%s3258_s3 + $0x10] sm:$0xff]  ;;  %v60_v2 = vld [vmem:[%s3258_s3] sm:$0xff]  ;;  %v186_v3 = vlaneseq  ;;  %v2639_v4 = vmov 0   ;;  %v58_v6 = vld [vmem:[%s3255_s0 + $0x8] sm:$0xff]  ;;  %vm84_vm0 = vcmask 162816   ;;  %vm97_vm1 = vcmask 1043456  }
   0x4   :  { %2608 = vset.pattern.permute.xlu1 %v2639_v4  ;;  %2607 = vset.pattern.permute.xlu0 %v2639_v4  ;;  %v57_v5 = vld [vmem:[%s3255_s0] sm:$0xff]  ;;  %v63_v7 = vld [vmem:[%s3258_s3 + $0x18] sm:$0xff]  ;;  %v61_v8 = vld [vmem:[%s3258_s3 + $0x8] sm:$0xff]  ;;  %vm232_vm3 = vcmask 121856   ;;  %v2640_v17 = vmov 0.0   ;;  %vm245_vm9 = vcmask 1046528  }
   0x5   :  { %76 = vperm.xlu1 %2608, %v62_v1   ;;  %66 = vperm.xlu0 %2607, %v60_v2   ;;  %v2460_v9 = vpack.c.bf16 %v58_v6, %v57_v5  ;;  %v2747_v10 = vshrl.u32 %v186_v3, 7  ;;  %v59_v11 = vld [vmem:[%s3255_s0 + $0x10] sm:$0xf]  ;;  %v53_v12 = vld [vmem:[%s3257_s2] sm:$0xff]  ;;  %v339_v21 = vld [vmem:[%s3260_s5 + $0x8] sm:$0xff]  ;;  %vm2641_vm10 = vmmov 1  }
   0x6   :  { %v1992_v13 = vld [vmem:[%s3256_s1] ss:$0 sm:$0xff]  ;;  %2227 = vmatprep.mubr.msk.f32.mxu0 %vm84_vm0, %v53_v12  ;;  %v1995_v15 = vld [vmem:[%s3256_s1 + $0x1] ss:$0 sm:$0xff]  ;;  %v1998_v16 = vld [vmem:[%s3256_s1 + $0x2] ss:$0 sm:$0xff] }
   0x7   :  { %2461 = vmatprep.subr.bf16.mxu0 %v2460_v9  ;;  %v188_v14 = vadd.s32 8, %v2747_v10  ;;  %vm194_vm2 = vcmp.eq.s32.totalorder %v2747_v10, %v1992_v13  ;;  %vm207_vm4 = vcmp.eq.s32.totalorder %v2747_v10, %v1995_v15  ;;  %vm220_vm5 = vcmp.eq.s32.totalorder %v2747_v10, %v1998_v16  ;;  %v228_v20 = vld [vmem:[%s3259_s4] sm:$0xff]  ;;  %v54_v27 = vld [vmem:[%s3257_s2 + $0x8] sm:$0xff]  ;;  %v55_v31 = vld [vmem:[%s3257_s2 + $0x10] sm:$0xff] }
   0x8   :  { %2463 = vmatpush3.bf16.msra.mxu0 %v2460_v9  ;;  %v1993_v18 = vsel %vm194_vm2, 1.0, %v2640_v17  ;;  %v1996_v19 = vsel %vm207_vm4, 1.0, %v2640_v17  ;;  %v338_v22 = vld [vmem:[%s3260_s5] sm:$0xff]  ;;  %v1999_v26 = vsel %vm220_vm5, 1.0, %v2640_v17  ;;  %2237 = vmatprep.mubr.msk.f32.mxu1 %vm232_vm3, %v228_v20  ;;  %vm2465_vm11 = vmpackc.low %vm245_vm9, %vm2641_vm10  ;;  %v343_v33 = vld [vmem:[%s3261_s6 + $0x8] sm:$0xff] }
   0x9   :  { %81 = vperm.xlu1 %2608, %v63_v7   ;;  %71 = vperm.xlu0 %2607, %v61_v8   ;;  %vm195_vm6 = vcmp.eq.s32.totalorder %v188_v14, %v1992_v13  ;;  %vm208_vm7 = vcmp.eq.s32.totalorder %v188_v14, %v1995_v15  ;;  %vm221_vm8 = vcmp.eq.s32.totalorder %v188_v14, %v1998_v16  ;;  %v342_v35 = vld [vmem:[%s3261_s6] sm:$0xff]  ;;  %v56_v36 = vld [vmem:[%s3257_s2 + $0x18] sm:$0xff]  ;;  %v229_v37 = vld [vmem:[%s3259_s4 + $0x8] sm:$0xff] }
   0xa   :  { %2225 = vmatprep.subr.msk.mxu0 %vm97_vm1, %v59_v11  ;;  %v1994_v23 = vsel %vm195_vm6, 1.0, %v2640_v17  ;;  %v1997_v24 = vsel %vm208_vm7, 1.0, %v2640_v17  ;;  %v213_v25 = vadd.f32 %v1996_v19, %v1993_v18  ;;  %v2000_v29 = vsel %vm221_vm8, 1.0, %v2640_v17  ;;  %v341_v38 = vld [vmem:[%s3260_s5 + $0x18] sm:$0xff]  ;;  %v340_v39 = vld [vmem:[%s3260_s5 + $0x10] sm:$0xff]  ;;  %v579_v44 = vld [vmem:[%s3263_s8 + $0x8] sm:$0xff] }
   0xb   :  { %v214_v28 = vadd.f32 %v1997_v24, %v1994_v23  ;;  %v230_v40 = vld [vmem:[%s3259_s4 + $0x10] sm:$0xff]  ;;  %v231_v41 = vld [vmem:[%s3259_s4 + $0x18] sm:$0xff]  ;;  %v578_v45 = vld [vmem:[%s3263_s8] sm:$0xff] }
   0xc   :  { %2226 = vmatpush3.msk.msra.mxu0 %vm97_vm1, %v59_v11  ;;  %v226_v30 = vadd.f32 %v1999_v26, %v213_v25  ;;  %v345_v42 = vld [vmem:[%s3261_s6 + $0x18] sm:$0xff]  ;;  %v344_v43 = vld [vmem:[%s3261_s6 + $0x10] sm:$0xff] }
   0xd   :  { %521 = vperm.xlu1 %2608, %v339_v21   ;;  %516 = vperm.xlu0 %2607, %v338_v22   ;;  %v227_v32 = vadd.f32 %v2000_v29, %v214_v28  ;;  %v581_v46 = vld [vmem:[%s3263_s8 + $0x18] sm:$0xff]  ;;  %v580_v47 = vld [vmem:[%s3263_s8 + $0x10] sm:$0xff] }
   0xe   :  { %2228 = vmatmul.mubr.msk.f32.vlgmr.msra.gmra.mrb[0].mxu0 %vm84_vm0, %v54_v27 }
   0xf   :  { %v2464_v34 = vpack.c.bf16 %v227_v32, %v226_v30  ;;  %2230 = vmatprep.mubr.msk.f32.mxu0 %vm84_vm0, %v55_v31 }
  0x11   :  { %2466 = vmatprep.subr.msk.bf16.mxu1 %vm2465_vm11, %v2464_v34  ;;  %545 = vperm.xlu1 %2608, %v343_v33  }
  0x12   :  { %540 = vperm.xlu0 %2607, %v342_v35   ;;  %2469 = vmatpush3.bf16.msk.msra.mxu1 %vm2465_vm11, %v2464_v34 }
  0x13   :  { %2231 = vmatmul.mubr.msk.f32.gmra.mrb[2].mxu0 %vm84_vm0, %v56_v36 }
  0x15   :  { %2238 = vmatmul.mubr.msk.f32.vlgmr.msra.gmra.mrb[0].mxu1 %vm232_vm3, %v229_v37  ;;  %531 = vperm.xlu1 %2608, %v341_v38  }
  0x16   :  { %526 = vperm.xlu0 %2607, %v340_v39   ;;  %2240 = vmatprep.mubr.msk.f32.mxu1 %vm232_vm3, %v230_v40 }
  0x19   :  { %2241 = vmatmul.mubr.msk.f32.gmra.mrb[2].mxu1 %vm232_vm3, %v231_v41  ;;  %555 = vperm.xlu1 %2608, %v345_v42  }
  0x1a   :  { %550 = vperm.xlu0 %2607, %v344_v43  }
  0x1d   :  { %601 = vperm.xlu1 %2608, %v579_v44  }
  0x1e   :  { %596 = vperm.xlu0 %2607, %v578_v45  }
  0x1f   :  { %22 = vsyncpa [#allocation4], 0  ;;  %v583_v48 = vld [vmem:[%s3263_s8 + $0x28] sm:$0xff]  ;;  %v582_v49 = vld [vmem:[%s3263_s8 + $0x20] sm:$0xff]  ;;  %v2642_v25 = vmov 0.0|0.0   ;;  %vm2643_vm12 = vmmov 0  }
  0x20   :  { %v585_v50 = vld [vmem:[%s3263_s8 + $0x38] sm:$0xff]  ;;  %v584_v51 = vld [vmem:[%s3263_s8 + $0x30] sm:$0xff]  ;;  %v587_v52 = vld [vmem:[%s3263_s8 + $0x48] sm:$0xff]  ;;  %2470 = vmatprep.subr.bf16.mxu1 %v2642_v25  ;;  %2251 = vmatprep.mubr.msk.f32.mxu1 %vm2643_vm12, %v2640_v17  ;;  %vm346_vm13 = vcmask 261120   ;;  %s2645_s16 = smov [#allocation3]  }
  0x21   :  { %611 = vperm.xlu1 %2608, %v581_v46   ;;  %v586_v53 = vld [vmem:[%s3263_s8 + $0x40] sm:$0xff]  ;;  %v589_v54 = vld [vmem:[%s3263_s8 + $0x58] sm:$0xff]  ;;  %v588_v55 = vld [vmem:[%s3263_s8 + $0x50] sm:$0xff] }
  0x22   :  { %606 = vperm.xlu0 %2607, %v580_v47   ;;  %v591_v56 = vld [vmem:[%s3263_s8 + $0x68] sm:$0xff]  ;;  %v590_v57 = vld [vmem:[%s3263_s8 + $0x60] sm:$0xff]  ;;  %v593_v58 = vld [vmem:[%s3263_s8 + $0x78] sm:$0xff] }
  0x23   :  { %v592_v59 = vld [vmem:[%s3263_s8 + $0x70] sm:$0xff]  ;;  %v888_v60 = vld [vmem:[%s3265_s10 + $0x8] sm:$0xff]  ;;  %v887_v61 = vld [vmem:[%s3265_s10] sm:$0xff] }
  0x24   :  { %v890_v62 = vld [vmem:[%s3265_s10 + $0x18] sm:$0xff]  ;;  %v889_v63 = vld [vmem:[%s3265_s10 + $0x10] sm:$0xff]  ;;  %v2025_v0 = vld [vmem:[%s3260_s5 + $0x28] sm:$0xff] }
  0x25   :  { %621 = vperm.xlu1 %2608, %v583_v48   ;;  %v2024_v1 = vld [vmem:[%s3260_s5 + $0x20] sm:$0xff]  ;;  %v2029_v2 = vld [vmem:[%s3261_s6 + $0x28] sm:$0xff]  ;;  %v2027_v4 = vld [vmem:[%s3260_s5 + $0x38] sm:$0xff] }
  0x26   :  { %616 = vperm.xlu0 %2607, %v582_v49   ;;  %v2028_v3 = vld [vmem:[%s3261_s6 + $0x20] sm:$0xff]  ;;  %v2026_v5 = vld [vmem:[%s3260_s5 + $0x30] sm:$0xff]  ;;  %v2031_v6 = vld [vmem:[%s3261_s6 + $0x38] sm:$0xff] }
  0x27   :  { %v2030_v7 = vld [vmem:[%s3261_s6 + $0x30] sm:$0xff]  ;;  %v2051_v8 = vld [vmem:[%s3263_s8 + $0x88] sm:$0xff]  ;;  %v2050_v9 = vld [vmem:[%s3263_s8 + $0x80] sm:$0xff] }
  0x28   :  { %v2053_v11 = vld [vmem:[%s3263_s8 + $0x98] sm:$0xff]  ;;  %v2052_v12 = vld [vmem:[%s3263_s8 + $0x90] sm:$0xff]  ;;  %v2055_v13 = vld [vmem:[%s3263_s8 + $0xa8] sm:$0xff] }
  0x29   :  { %631 = vperm.xlu1 %2608, %v585_v50   ;;  %v2054_v14 = vld [vmem:[%s3263_s8 + $0xa0] sm:$0xff]  ;;  %v2057_v15 = vld [vmem:[%s3263_s8 + $0xb8] sm:$0xff]  ;;  %v2056_v16 = vld [vmem:[%s3263_s8 + $0xb0] sm:$0xff] }
  0x2a   :  { %626 = vperm.xlu0 %2607, %v584_v51   ;;  %v2059_v18 = vld [vmem:[%s3263_s8 + $0xc8] sm:$0xff]  ;;  %v2058_v19 = vld [vmem:[%s3263_s8 + $0xc0] sm:$0xff]  ;;  %v2061_v20 = vld [vmem:[%s3263_s8 + $0xd8] sm:$0xff] }
  0x2b   :  { %v2060_v21 = vld [vmem:[%s3263_s8 + $0xd0] sm:$0xff]  ;;  %v2063_v22 = vld [vmem:[%s3263_s8 + $0xe8] sm:$0xff]  ;;  %v2062_v23 = vld [vmem:[%s3263_s8 + $0xe0] sm:$0xff] }
  0x2c   :  { %v2065_v24 = vld [vmem:[%s3263_s8 + $0xf8] sm:$0xff]  ;;  %v2064_v26 = vld [vmem:[%s3263_s8 + $0xf0] sm:$0xff]  ;;  %v2087_v27 = vld [vmem:[%s3265_s10 + $0x28] sm:$0xff] }
  0x2d   :  { %641 = vperm.xlu1 %2608, %v587_v52   ;;  %v2086_v28 = vld [vmem:[%s3265_s10 + $0x20] sm:$0xff]  ;;  %v2089_v29 = vld [vmem:[%s3265_s10 + $0x38] sm:$0xff]  ;;  %v2088_v30 = vld [vmem:[%s3265_s10 + $0x30] sm:$0xff] }
  0x2e   :  { %636 = vperm.xlu0 %2607, %v586_v53   ;;  %v1665_v31 = vld [vmem:[%s3266_s11 + $0x8] sm:$0xff]  ;;  %v1664_v32 = vld [vmem:[%s3266_s11] sm:$0xff]  ;;  %v1667_v35 = vld [vmem:[%s3266_s11 + $0x18] sm:$0xff] }
  0x2f   :  { %v1669_v33 = vld [vmem:[%s3267_s12 + $0x8] sm:$0xff]  ;;  %v1668_v34 = vld [vmem:[%s3267_s12] sm:$0xff]  ;;  %v1666_v36 = vld [vmem:[%s3266_s11 + $0x10] sm:$0xff]  ;;  %s1979_s11 = sshll.u32 %s2645_s16, 4  ;;  %s1980_s11 = int_to_ptr.vmem [resolvable:$true] %s1979_s11 }
  0x30   :  { %v1671_v37 = vld [vmem:[%s3267_s12 + $0x18] sm:$0xff]  ;;  %v1670_v38 = vld [vmem:[%s3267_s12 + $0x10] sm:$0xff]  ;;  %v1889_v39 = vld [vmem:[#allocation2] sm:$0x1]  ;;  %s2615_s12 = scalar_lea.vmem %s1980_s11, 16  ;;  %s2619_s6 = scalar_lea.vmem %s1980_s11, 32 }
  0x31   :  { %651 = vperm.xlu1 %2608, %v589_v54   ;;  %p2616_p0 = scmp.ne.s32.totalorder %s1980_s11, %s2615_s12  ;;  %p2620_p1 = scmp.lt.s32.totalorder %s1980_s11, %s1980_s11 }
  0x32   :  { %646 = vperm.xlu0 %2607, %v588_v55   ;;  %p2621_p2 = scmp.lt.s32.totalorder %s2619_s6, %s2615_s12 }
  0x34   :  { %p2622_p3 = por %p2621_p2, %p2620_p1 }
  0x35   :  { %661 = vperm.xlu1 %2608, %v591_v56  }
  0x36   :  { %656 = vperm.xlu0 %2607, %v590_v57   ;;  %p2623_p4 = pnand %p2622_p3, %p2616_p0 }
  0x39   :  { %671 = vperm.xlu1 %2608, %v593_v58  }
  0x3a   :  { %666 = vperm.xlu0 %2607, %v592_v59  }
  0x3d   :  { %898 = vperm.xlu1 %2608, %v888_v60  }
  0x3e   :  { %893 = vperm.xlu0 %2607, %v887_v61  }
  0x41   :  { %908 = vperm.xlu1 %2608, %v890_v62   ;;  %v2644_v62 = vmov 1.0  }
  0x42   :  { %903 = vperm.xlu0 %2607, %v889_v63  }
  0x45   :  { %1181 = vperm.xlu1 %2608, %v2025_v0   ;;  %v3019_v0 = vsub.s32 0, %v2747_v10 }
  0x46   :  { %1176 = vperm.xlu0 %2607, %v2024_v1  }
  0x49   :  { %1205 = vperm.xlu1 %2608, %v2029_v2  }
  0x4a   :  { %1200 = vperm.xlu0 %2607, %v2028_v3  }
  0x4d   :  { %1191 = vperm.xlu1 %2608, %v2027_v4  }
  0x4e   :  { %1186 = vperm.xlu0 %2607, %v2026_v5  }
  0x51   :  { %1215 = vperm.xlu1 %2608, %v2031_v6  }
  0x52   :  { %1210 = vperm.xlu0 %2607, %v2030_v7  }
  0x55   :  { %1263 = vperm.xlu1 %2608, %v2051_v8  }
  0x56   :  { %1258 = vperm.xlu0 %2607, %v2050_v9  }
  0x59   :  { %1273 = vperm.xlu1 %2608, %v2053_v11  }
  0x5a   :  { %1268 = vperm.xlu0 %2607, %v2052_v12  }
  0x5d   :  { %1283 = vperm.xlu1 %2608, %v2055_v13  }
  0x5e   :  { %1278 = vperm.xlu0 %2607, %v2054_v14   ;;  %v562_v14 = vld [vmem:[%s3262_s7] sm:$0xff] }
  0x5f   :  { %2273 = vmatprep.mubr.msk.f32.mxu0 %vm346_vm13, %v562_v14 }
  0x61   :  { %1293 = vperm.xlu1 %2608, %v2057_v15  }
  0x62   :  { %1288 = vperm.xlu0 %2607, %v2056_v16  }
  0x65   :  { %1303 = vperm.xlu1 %2608, %v2059_v18  }
  0x66   :  { %1298 = vperm.xlu0 %2607, %v2058_v19  }
  0x69   :  { %1313 = vperm.xlu1 %2608, %v2061_v20  }
  0x6a   :  { %1308 = vperm.xlu0 %2607, %v2060_v21  }
  0x6d   :  { %1323 = vperm.xlu1 %2608, %v2063_v22  }
  0x6e   :  { %1318 = vperm.xlu0 %2607, %v2062_v23  }
  0x71   :  { %1333 = vperm.xlu1 %2608, %v2065_v24  }
  0x72   :  { %1328 = vperm.xlu0 %2607, %v2064_v26  }
  0x75   :  { %1562 = vperm.xlu1 %2608, %v2087_v27  }
  0x76   :  { %1557 = vperm.xlu0 %2607, %v2086_v28  }
  0x79   :  { %1572 = vperm.xlu1 %2608, %v2089_v29  }
  0x7a   :  { %1567 = vperm.xlu0 %2607, %v2088_v30  }
  0x7d   :  { %1843 = vperm.xlu1 %2608, %v1665_v31  }
  0x7e   :  { %1838 = vperm.xlu0 %2607, %v1664_v32  }
  0x81   :  { %1867 = vperm.xlu1 %2608, %v1669_v33  }
  0x82   :  { %1862 = vperm.xlu0 %2607, %v1668_v34  }
  0x84   :  { %v67_v40 = vpop.permute.xlu0 %66  ;;  %v77_v43 = vpop.permute.xlu1 %76 }
  0x85   :  { %1853 = vperm.xlu1 %2608, %v1667_v35  }
  0x86   :  { %1848 = vperm.xlu0 %2607, %v1666_v36  }
  0x88   :  { %v72_v44 = vpop.permute.xlu0 %71  ;;  %v82_v52 = vpop.permute.xlu1 %81 }
  0x89   :  { %1877 = vperm.xlu1 %2608, %v1671_v37  }
  0x8a   :  { %1872 = vperm.xlu0 %2607, %v1670_v38  }
  0x8c   :  { %v522_v19 = vpop.permute.xlu1 %521  ;;  %v517_v20 = vpop.permute.xlu0 %516 }
  0x8e   :  { %1892 = vperm.xlu0 %2607, %v1889_v39  }
  0x90   :  { %v546_v22 = vpop.permute.xlu1 %545 }
  0x91   :  { %v541_v23 = vpop.permute.xlu0 %540 }
  0x94   :  { %v532_v26 = vpop.permute.xlu1 %531 }
  0x95   :  { %v527_v27 = vpop.permute.xlu0 %526 }
  0x98   :  { %v556_v37 = vpop.permute.xlu1 %555 }
  0x99   :  { %v551_v38 = vpop.permute.xlu0 %550 }
  0xe1   :  { %v2229_v41 = vpop.f32.mrb[0].mxu0 }
  0xe2   :  { %v167_v42 = vpop.f32.mrb[1].mxu0  ;;  %v173_v46 = vadd.f32 %v2229_v41, %v72_v44 }
  0xe3   :  { %v168_v48 = vadd.f32 %v167_v42, %v67_v40 }
  0xe6   :  { %v2232_v45 = vpop.f32.mrb[2].mxu0 }
  0xe7   :  { %v177_v47 = vpop.f32.mrb[3].mxu0  ;;  %v183_v54 = vadd.f32 %v2232_v45, %v82_v52  ;;  %v563_v45 = vld [vmem:[%s3262_s7 + $0x8] sm:$0xff]  ;;  %v569_v52 = vld [vmem:[%s3262_s7 + $0x38] sm:$0xff] }
  0xe8   :  { %v2239_v49 = vpop.f32.mrb[0].mxu1  ;;  %v178_v55 = vadd.f32 %v177_v47, %v77_v43  ;;  %v565_v47 = vld [vmem:[%s3262_s7 + $0x18] sm:$0xff] }
  0xe9   :  { %v3000_v50 = vadd.f32 %v2239_v49, %v173_v46  ;;  %v315_v51 = vpop.f32.mrb[1].mxu1  ;;  %v564_v46 = vld [vmem:[%s3262_s7 + $0x10] sm:$0xff]  ;;  %v567_v49 = vld [vmem:[%s3262_s7 + $0x28] sm:$0xff] }
  0xea   :  { %v3002_v53 = vadd.f32 %v315_v51, %v168_v48  ;;  %v566_v48 = vld [vmem:[%s3262_s7 + $0x20] sm:$0xff]  ;;  %v568_v51 = vld [vmem:[%s3262_s7 + $0x30] sm:$0xff] }
  0xec   :  { %v2471_v56 = vpack.c.bf16 %v3000_v50, %v3002_v53  ;;  %v2242_v57 = vpop.f32.mrb[2].mxu1 }
  0xed   :  { %v3006_v58 = vadd.f32 %v2242_v57, %v183_v54  ;;  %v325_v59 = vpop.f32.mrb[3].mxu1  ;;  %v570_v54 = vld [vmem:[%s3262_s7 + $0x40] sm:$0xff]  ;;  %v573_v57 = vld [vmem:[%s3262_s7 + $0x58] sm:$0xff] }
  0xee   :  { %v3008_v60 = vadd.f32 %v325_v59, %v178_v55  ;;  %2472 = vmatpush3.bf16.msra.mxu1 %v2471_v56  ;;  %v571_v55 = vld [vmem:[%s3262_s7 + $0x48] sm:$0xff]  ;;  %v572_v56 = vld [vmem:[%s3262_s7 + $0x50] sm:$0xff]  ;;  %v574_v59 = vld [vmem:[%s3262_s7 + $0x60] sm:$0xff] }
  0xef   :  { %2473 = vmatprep.subr.bf16.mxu1 %v2642_v25 }
  0xf0   :  { %v2474_v61 = vpack.c.bf16 %v3006_v58, %v3008_v60 }
  0xf2   :  { %2475 = vmatpush3.bf16.msra.mxu1 %v2474_v61  ;;  %v575_v61 = vld [vmem:[%s3262_s7 + $0x68] sm:$0xff] }
  0xf3   :  { %2476 = vmatprep.subr.bf16.mxu1 %v2642_v25 }
  0xf5   :  { %2252 = vmatmul.mubr.msk.f32.vlgmr.msra.gmra.mrb[4].mxu1 %vm346_vm13, %v2644_v62 }
  0xf6   :  { %2262 = vmatprep.mubr.msk.f32.mxu1 %vm2643_vm12, %v2640_v17 }
 0x1c8   :  { %v416_v63 = vpop.f32.mrb[4].mxu1 }
 0x1c9   :  { %v420_v1 = vmul.f32 0.03125, %v416_v63  ;;  %v2253_v2 = vpop.f32.mrb[5].mxu1  ;;  %v576_v63 = vld [vmem:[%s3262_s7 + $0x70] sm:$0xff] }
 0x1ca   :  { %v883_v2 = vld [vmem:[%s3264_s9] sm:$0xff] }
 0x1cb   :  { %v424_v3 = vrot.slane %v420_v1, %v3019_v0  ;;  %v577_v1 = vld [vmem:[%s3262_s7 + $0x78] sm:$0xff] }
 0x1cd   :  { %v425_v4 = vsub.f32 %v3002_v53, %v424_v3  ;;  %v426_v5 = vsub.f32 %v3000_v50, %v424_v3  ;;  %v427_v6 = vsub.f32 %v3008_v60, %v424_v3  ;;  %v428_v7 = vsub.f32 %v3006_v58, %v424_v3  ;;  %v602_v3 = vpop.permute.xlu1 %601 }
 0x1cf   :  { %v429_v8 = vmul.f32 %v425_v4, %v425_v4  ;;  %v430_v9 = vmul.f32 %v426_v5, %v426_v5  ;;  %v431_v12 = vmul.f32 %v427_v6, %v427_v6  ;;  %v432_v13 = vmul.f32 %v428_v7, %v428_v7 }
 0x1d1   :  { %v2477_v11 = vpack.c.bf16 %v430_v9, %v429_v8  ;;  %v2480_v10 = vpack.c.bf16 %v432_v13, %v431_v12 }
 0x1d3   :  { %2478 = vmatpush3.bf16.msra.mxu1 %v2477_v11 }
 0x1d4   :  { %2479 = vmatprep.subr.bf16.mxu1 %v2642_v25 }
 0x1d7   :  { %2481 = vmatpush3.bf16.msra.mxu1 %v2480_v10 }
 0x1da   :  { %2263 = vmatmul.mubr.msk.f32.vlgmr.msra.gmra.mrb[6].mxu1 %vm346_vm13, %v2644_v62 }
 0x1db   :  { %2329 = vmatprep.mubr.f32.mxu1 %v883_v2 }
 0x2ad   :  { %v499_v15 = vpop.f32.mrb[6].mxu1 }
 0x2ae   :  { %v503_v16 = vmul.f32 0.03125, %v499_v15  ;;  %v2264_v18 = vpop.f32.mrb[7].mxu1 }
 0x2b0   :  { %v504_v21 = vadd.f32 1e-05, %v503_v16 }
 0x2b2   :  { %2609 = vrsqrt.f32 %v504_v21 }
 0x2bc   :  { %v2610_v24 = vpop.eup %2609 }
 0x2bd   :  { %v509_v28 = vrot.slane %v2610_v24, %v3019_v0 }
 0x2bf   :  { %v510_v29 = vmul.f32 %v509_v28, %v425_v4  ;;  %v511_v30 = vmul.f32 %v509_v28, %v426_v5  ;;  %v512_v31 = vmul.f32 %v509_v28, %v427_v6  ;;  %v513_v32 = vmul.f32 %v509_v28, %v428_v7  ;;  %v597_v4 = vpop.permute.xlu0 %596  ;;  %v612_v5 = vpop.permute.xlu1 %611 }
 0x2c1   :  { %v534_v33 = vmul.f32 %v517_v20, %v510_v29  ;;  %v535_v34 = vmul.f32 %v522_v19, %v511_v30  ;;  %v536_v35 = vmul.f32 %v527_v27, %v512_v31  ;;  %v537_v36 = vmul.f32 %v532_v26, %v513_v32 }
 0x2c3   :  { %v558_v39 = vadd.f32 %v541_v23, %v534_v33  ;;  %v559_v40 = vadd.f32 %v546_v22, %v535_v34  ;;  %v560_v41 = vadd.f32 %v551_v38, %v536_v35  ;;  %v561_v42 = vadd.f32 %v556_v37, %v537_v36  ;;  %v607_v6 = vpop.permute.xlu0 %606  ;;  %v622_v7 = vpop.permute.xlu1 %621 }
 0x2c5   :  { %v2482_v43 = vpack.c.bf16 %v559_v40, %v558_v39  ;;  %v2486_v44 = vpack.c.bf16 %v561_v42, %v560_v41 }
 0x2c7   :  { %2483 = vmatprep.subr.bf16.mxu0 %v2482_v43  ;;  %v617_v8 = vpop.permute.xlu0 %616  ;;  %v632_v14 = vpop.permute.xlu1 %631 }
 0x2c8   :  { %2485 = vmatpush3.bf16.msra.mxu0 %v2482_v43 }
 0x2c9   :  { %2487 = vmatprep.subr.bf16.mxu0 %v2486_v44 }
 0x2cb   :  { %v627_v18 = vpop.permute.xlu0 %626  ;;  %v642_v29 = vpop.permute.xlu1 %641 }
 0x2cc   :  { %2489 = vmatpush3.bf16.msra.mxu0 %v2486_v44 }
 0x2cd   :  { %2522 = vmatprep.subr.bf16.mxu0 %v2642_v25 }
 0x2cf   :  { %2274 = vmatmul.mubr.msk.f32.vlgmr.msra.gmra.mrb[4].mxu0 %vm346_vm13, %v563_v45  ;;  %v637_v32 = vpop.permute.xlu0 %636  ;;  %v652_v41 = vpop.permute.xlu1 %651 }
 0x2d0   :  { %2276 = vmatprep.mubr.msk.f32.mxu0 %vm346_vm13, %v564_v46 }
 0x2d3   :  { %2277 = vmatmul.mubr.msk.f32.gmra.mrb[6].mxu0 %vm346_vm13, %v565_v47  ;;  %v647_v44 = vpop.permute.xlu0 %646 }
 0x2d4   :  { %2279 = vmatprep.mubr.msk.f32.mxu0 %vm346_vm13, %v566_v48 }
 0x2d7   :  { %2280 = vmatmul.mubr.msk.f32.gmra.mrb[8].mxu0 %vm346_vm13, %v567_v49 }
 0x2d8   :  { %2282 = vmatprep.mubr.msk.f32.mxu0 %vm346_vm13, %v568_v51 }
 0x2db   :  { %2283 = vmatmul.mubr.msk.f32.gmra.mrb[10].mxu0 %vm346_vm13, %v569_v52 }
 0x2dc   :  { %2285 = vmatprep.mubr.msk.f32.mxu0 %vm346_vm13, %v570_v54 }
 0x2df   :  { %2286 = vmatmul.mubr.msk.f32.gmra.mrb[12].mxu0 %vm346_vm13, %v571_v55 }
 0x2e0   :  { %2288 = vmatprep.mubr.msk.f32.mxu0 %vm346_vm13, %v572_v56  ;;  %v662_v56 = vpop.permute.xlu1 %661 }
 0x2e3   :  { %2289 = vmatmul.mubr.msk.f32.gmra.mrb[14].mxu0 %vm346_vm13, %v573_v57 }
 0x2e4   :  { %2291 = vmatprep.mubr.msk.f32.mxu0 %vm346_vm13, %v574_v59 }
 0x2e7   :  { %2292 = vmatmul.mubr.msk.f32.gmra.mrb[16].mxu0 %vm346_vm13, %v575_v61  ;;  %v657_v61 = vpop.permute.xlu0 %656 }
 0x2e8   :  { %2294 = vmatprep.mubr.msk.f32.mxu0 %vm346_vm13, %v576_v63 }
 0x2eb   :  { %2295 = vmatmul.mubr.msk.f32.gmra.mrb[18].mxu0 %vm346_vm13, %v577_v1 }
 0x2ec   :  { %2343 = vmatprep.mubr.msk.f32.mxu0 %vm2643_vm12, %v2640_v17 }
 0x3a2   :  { %v2275_v9 = vpop.f32.mrb[4].mxu0 }
 0x3a3   :  { %v794_v11 = vadd.f32 %v2275_v9, %v602_v3  ;;  %v788_v12 = vpop.f32.mrb[5].mxu0 }
 0x3a4   :  { %v789_v13 = vadd.f32 %v788_v12, %v597_v4  ;;  %v667_v12 = vpop.permute.xlu0 %666 }
 0x3a5   :  { %v868_v10 = vmax.f32 %v794_v11, 0.0 }
 0x3a6   :  { %v867_v15 = vmax.f32 %v789_v13, 0.0  ;;  %v2278_v16 = vpop.f32.mrb[6].mxu0 }
 0x3a7   :  { %v804_v19 = vadd.f32 %v2278_v16, %v612_v5  ;;  %v798_v20 = vpop.f32.mrb[7].mxu0 }
 0x3a8   :  { %v2490_v21 = vpack.c.bf16 %v868_v10, %v867_v15  ;;  %v799_v22 = vadd.f32 %v798_v20, %v607_v6  ;;  %v884_v20 = vld [vmem:[%s3264_s9 + $0x8] sm:$0xff] }
 0x3a9   :  { %v870_v23 = vmax.f32 %v804_v19, 0.0 }
 0x3aa   :  { %v869_v24 = vmax.f32 %v799_v22, 0.0  ;;  %v2281_v26 = vpop.f32.mrb[8].mxu0  ;;  %2491 = vmatprep.subr.bf16.mxu1 %v2490_v21  ;;  %v886_v22 = vld [vmem:[%s3264_s9 + $0x18] sm:$0xff] }
 0x3ab   :  { %v814_v27 = vadd.f32 %v2281_v26, %v622_v7  ;;  %v808_v28 = vpop.f32.mrb[9].mxu0  ;;  %2493 = vmatpush3.bf16.msra.mxu1 %v2490_v21  ;;  %v885_v21 = vld [vmem:[%s3264_s9 + $0x10] sm:$0xff] }
 0x3ac   :  { %v2494_v30 = vpack.c.bf16 %v870_v23, %v869_v24  ;;  %v809_v31 = vadd.f32 %v808_v28, %v617_v8  ;;  %v672_v8 = vpop.permute.xlu1 %671  ;;  %v894_v24 = vpop.permute.xlu0 %893 }
 0x3ad   :  { %v872_v33 = vmax.f32 %v814_v27, 0.0 }
 0x3ae   :  { %v871_v34 = vmax.f32 %v809_v31, 0.0  ;;  %v2284_v35 = vpop.f32.mrb[10].mxu0  ;;  %2495 = vmatprep.subr.bf16.mxu1 %v2494_v30 }
 0x3af   :  { %v824_v36 = vadd.f32 %v2284_v35, %v632_v14  ;;  %v818_v37 = vpop.f32.mrb[11].mxu0  ;;  %2497 = vmatpush3.bf16.msra.mxu1 %v2494_v30 }
 0x3b0   :  { %v2498_v38 = vpack.c.bf16 %v872_v33, %v871_v34  ;;  %v819_v39 = vadd.f32 %v818_v37, %v627_v18  ;;  %v899_v23 = vpop.permute.xlu1 %898  ;;  %v904_v34 = vpop.permute.xlu0 %903 }
 0x3b1   :  { %v874_v40 = vmax.f32 %v824_v36, 0.0 }
 0x3b2   :  { %v873_v42 = vmax.f32 %v819_v39, 0.0  ;;  %v2287_v43 = vpop.f32.mrb[12].mxu0  ;;  %2499 = vmatprep.subr.bf16.mxu1 %v2498_v38 }
 0x3b3   :  { %v834_v45 = vadd.f32 %v2287_v43, %v642_v29  ;;  %v828_v46 = vpop.f32.mrb[13].mxu0  ;;  %2501 = vmatpush3.bf16.msra.mxu1 %v2498_v38 }
 0x3b4   :  { %v2502_v47 = vpack.c.bf16 %v874_v40, %v873_v42  ;;  %v829_v48 = vadd.f32 %v828_v46, %v637_v32  ;;  %v909_v31 = vpop.permute.xlu1 %908 }
 0x3b5   :  { %v876_v49 = vmax.f32 %v834_v45, 0.0 }
 0x3b6   :  { %v875_v51 = vmax.f32 %v829_v48, 0.0  ;;  %v2290_v52 = vpop.f32.mrb[14].mxu0  ;;  %2503 = vmatprep.subr.bf16.mxu1 %v2502_v47 }
 0x3b7   :  { %v844_v54 = vadd.f32 %v2290_v52, %v652_v41  ;;  %v838_v55 = vpop.f32.mrb[15].mxu0  ;;  %2505 = vmatpush3.bf16.msra.mxu1 %v2502_v47 }
 0x3b8   :  { %v2506_v57 = vpack.c.bf16 %v876_v49, %v875_v51  ;;  %v839_v59 = vadd.f32 %v838_v55, %v647_v44 }
 0x3b9   :  { %v878_v63 = vmax.f32 %v844_v54, 0.0  ;;  %v2034_v54 = vld [vmem:[%s3262_s7 + $0x80] sm:$0xff] }
 0x3ba   :  { %v877_v1 = vmax.f32 %v839_v59, 0.0  ;;  %v2293_v2 = vpop.f32.mrb[16].mxu0  ;;  %2507 = vmatprep.subr.bf16.mxu1 %v2506_v57  ;;  %v1182_v59 = vpop.permute.xlu1 %1181 }
 0x3bb   :  { %v854_v3 = vadd.f32 %v2293_v2, %v662_v56  ;;  %v848_v4 = vpop.f32.mrb[17].mxu0  ;;  %2509 = vmatpush3.bf16.msra.mxu1 %v2506_v57 }
 0x3bc   :  { %v2510_v5 = vpack.c.bf16 %v878_v63, %v877_v1  ;;  %v849_v6 = vadd.f32 %v848_v4, %v657_v61  ;;  %v1177_v61 = vpop.permute.xlu0 %1176 }
 0x3bd   :  { %v880_v7 = vmax.f32 %v854_v3, 0.0 }
 0x3be   :  { %v879_v9 = vmax.f32 %v849_v6, 0.0  ;;  %v2296_v11 = vpop.f32.mrb[18].mxu0  ;;  %2511 = vmatprep.subr.bf16.mxu1 %v2510_v5  ;;  %v1206_v1 = vpop.permute.xlu1 %1205 }
 0x3bf   :  { %v864_v13 = vadd.f32 %v2296_v11, %v672_v8  ;;  %v858_v10 = vpop.f32.mrb[19].mxu0  ;;  %2513 = vmatpush3.bf16.msra.mxu1 %v2510_v5 }
 0x3c0   :  { %v2514_v14 = vpack.c.bf16 %v880_v7, %v879_v9  ;;  %v859_v15 = vadd.f32 %v858_v10, %v667_v12  ;;  %v1201_v2 = vpop.permute.xlu0 %1200 }
 0x3c1   :  { %v882_v16 = vmax.f32 %v864_v13, 0.0 }
 0x3c2   :  { %v881_v18 = vmax.f32 %v859_v15, 0.0  ;;  %2515 = vmatprep.subr.bf16.mxu1 %v2514_v14  ;;  %v1192_v4 = vpop.permute.xlu1 %1191 }
 0x3c3   :  { %2517 = vmatpush3.bf16.msra.mxu1 %v2514_v14 }
 0x3c4   :  { %v2518_v19 = vpack.c.bf16 %v882_v16, %v881_v18  ;;  %v1187_v5 = vpop.permute.xlu0 %1186 }
 0x3c6   :  { %2519 = vmatprep.subr.bf16.mxu1 %v2518_v19  ;;  %v1216_v15 = vpop.permute.xlu1 %1215 }
 0x3c7   :  { %2521 = vmatpush3.bf16.msra.mxu1 %v2518_v19 }
 0x3c8   :  { %2528 = vmatprep.subr.bf16.mxu1 %v2642_v25  ;;  %v1211_v16 = vpop.permute.xlu0 %1210 }
 0x3ca   :  { %2330 = vmatmul.mubr.f32.vlgmr.msra.gmra.mrb[8].mxu1 %v884_v20 }
 0x3cb   :  { %2332 = vmatprep.mubr.f32.mxu1 %v885_v21 }
 0x3ce   :  { %2333 = vmatmul.mubr.f32.gmra.mrb[10].mxu1 %v886_v22 }
 0x3cf   :  { %2354 = vmatprep.mubr.msk.f32.mxu1 %vm2643_vm12, %v2640_v17 }
 0x49d   :  { %v2331_v26 = vpop.f32.mrb[8].mxu1 }
 0x49e   :  { %v983_v27 = vadd.f32 %v2331_v26, %v899_v23  ;;  %v977_v28 = vpop.f32.mrb[9].mxu1  ;;  %v2036_v26 = vld [vmem:[%s3262_s7 + $0x90] sm:$0xff] }
 0x49f   :  { %v978_v29 = vadd.f32 %v977_v28, %v894_v24  ;;  %v2035_v24 = vld [vmem:[%s3262_s7 + $0x88] sm:$0xff]  ;;  %v2038_v28 = vld [vmem:[%s3262_s7 + $0xa0] sm:$0xff] }
 0x4a0   :  { %v3113_v30 = vadd.f32 %v983_v27, %v3000_v50  ;;  %v2037_v27 = vld [vmem:[%s3262_s7 + $0x98] sm:$0xff] }
 0x4a1   :  { %v3116_v32 = vadd.f32 %v978_v29, %v3002_v53  ;;  %v2334_v33 = vpop.f32.mrb[10].mxu1  ;;  %v2039_v29 = vld [vmem:[%s3262_s7 + $0xa8] sm:$0xff] }
 0x4a2   :  { %v993_v35 = vadd.f32 %v2334_v33, %v909_v31  ;;  %v987_v36 = vpop.f32.mrb[11].mxu1  ;;  %v2040_v31 = vld [vmem:[%s3262_s7 + $0xb0] sm:$0xff]  ;;  %v2041_v33 = vld [vmem:[%s3262_s7 + $0xb8] sm:$0xff] }
 0x4a3   :  { %v2523_v37 = vpack.c.bf16 %v3113_v30, %v3116_v32  ;;  %v988_v38 = vadd.f32 %v987_v36, %v904_v34  ;;  %v2042_v34 = vld [vmem:[%s3262_s7 + $0xc0] sm:$0xff]  ;;  %v2044_v36 = vld [vmem:[%s3262_s7 + $0xd0] sm:$0xff] }
 0x4a4   :  { %v3121_v39 = vadd.f32 %v993_v35, %v3006_v58  ;;  %v2043_v35 = vld [vmem:[%s3262_s7 + $0xc8] sm:$0xff] }
 0x4a5   :  { %v3124_v40 = vadd.f32 %v988_v38, %v3008_v60  ;;  %2524 = vmatpush3.bf16.msra.mxu0 %v2523_v37  ;;  %v2045_v37 = vld [vmem:[%s3262_s7 + $0xd8] sm:$0xff]  ;;  %v2046_v38 = vld [vmem:[%s3262_s7 + $0xe0] sm:$0xff] }
 0x4a6   :  { %2525 = vmatprep.subr.bf16.mxu0 %v2642_v25 }
 0x4a7   :  { %v2526_v50 = vpack.c.bf16 %v3121_v39, %v3124_v40 }
 0x4a9   :  { %2527 = vmatpush3.bf16.msra.mxu0 %v2526_v50  ;;  %v2047_v50 = vld [vmem:[%s3262_s7 + $0xe8] sm:$0xff] }
 0x4ac   :  { %2344 = vmatmul.mubr.msk.f32.vlgmr.msra.gmra.mrb[20].mxu0 %vm346_vm13, %v2644_v62 }
 0x4ad   :  { %2365 = vmatprep.mubr.msk.f32.mxu0 %vm346_vm13, %v2034_v54 }
 0x57f   :  { %v1076_v53 = vpop.f32.mrb[20].mxu0 }
 0x580   :  { %v1080_v41 = vmul.f32 0.03125, %v1076_v53  ;;  %v2345_v42 = vpop.f32.mrb[21].mxu0  ;;  %v2048_v53 = vld [vmem:[%s3262_s7 + $0xf0] sm:$0xff] }
 0x581   :  { %v2082_v42 = vld [vmem:[%s3264_s9 + $0x20] sm:$0xff] }
 0x582   :  { %v1084_v43 = vrot.slane %v1080_v41, %v3019_v0  ;;  %v2049_v41 = vld [vmem:[%s3262_s7 + $0xf8] sm:$0xff] }
 0x584   :  { %v1085_v58 = vsub.f32 %v3116_v32, %v1084_v43  ;;  %v1086_v60 = vsub.f32 %v3113_v30, %v1084_v43  ;;  %v1087_v44 = vsub.f32 %v3124_v40, %v1084_v43  ;;  %v1088_v45 = vsub.f32 %v3121_v39, %v1084_v43  ;;  %v1264_v43 = vpop.permute.xlu1 %1263 }
 0x586   :  { %v1089_v46 = vmul.f32 %v1085_v58, %v1085_v58  ;;  %v1090_v47 = vmul.f32 %v1086_v60, %v1086_v60  ;;  %v1091_v49 = vmul.f32 %v1087_v44, %v1087_v44  ;;  %v1092_v51 = vmul.f32 %v1088_v45, %v1088_v45 }
 0x588   :  { %v2529_v48 = vpack.c.bf16 %v1090_v47, %v1089_v46  ;;  %v2532_v52 = vpack.c.bf16 %v1092_v51, %v1091_v49 }
 0x58a   :  { %2530 = vmatpush3.bf16.msra.mxu1 %v2529_v48 }
 0x58b   :  { %2531 = vmatprep.subr.bf16.mxu1 %v2642_v25 }
 0x58e   :  { %2533 = vmatpush3.bf16.msra.mxu1 %v2532_v52 }
 0x591   :  { %2355 = vmatmul.mubr.msk.f32.vlgmr.msra.gmra.mrb[12].mxu1 %vm346_vm13, %v2644_v62 }
 0x592   :  { %2421 = vmatprep.mubr.f32.mxu1 %v2082_v42 }
 0x664   :  { %v1159_v55 = vpop.f32.mrb[12].mxu1 }
 0x665   :  { %v1163_v56 = vmul.f32 0.03125, %v1159_v55  ;;  %v2356_v57 = vpop.f32.mrb[13].mxu1 }
 0x667   :  { %v1164_v63 = vadd.f32 1e-05, %v1163_v56 }
 0x669   :  { %2611 = vrsqrt.f32 %v1164_v63 }
 0x673   :  { %v2612_v3 = vpop.eup %2611 }
 0x674   :  { %v1169_v6 = vrot.slane %v2612_v3, %v3019_v0 }
 0x676   :  { %v1170_v7 = vmul.f32 %v1169_v6, %v1085_v58  ;;  %v1171_v8 = vmul.f32 %v1169_v6, %v1086_v60  ;;  %v1172_v9 = vmul.f32 %v1169_v6, %v1087_v44  ;;  %v1173_v11 = vmul.f32 %v1169_v6, %v1088_v45  ;;  %v1259_v58 = vpop.permute.xlu0 %1258  ;;  %v1274_v60 = vpop.permute.xlu1 %1273 }
 0x678   :  { %v1194_v12 = vmul.f32 %v1177_v61, %v1170_v7  ;;  %v1195_v13 = vmul.f32 %v1182_v59, %v1171_v8  ;;  %v1196_v10 = vmul.f32 %v1187_v5, %v1172_v9  ;;  %v1197_v14 = vmul.f32 %v1192_v4, %v1173_v11 }
 0x67a   :  { %v1218_v18 = vadd.f32 %v1201_v2, %v1194_v12  ;;  %v1219_v19 = vadd.f32 %v1206_v1, %v1195_v13  ;;  %v1220_v20 = vadd.f32 %v1211_v16, %v1196_v10  ;;  %v1221_v21 = vadd.f32 %v1216_v15, %v1197_v14  ;;  %v1269_v44 = vpop.permute.xlu0 %1268  ;;  %v1284_v45 = vpop.permute.xlu1 %1283 }
 0x67c   :  { %v2534_v22 = vpack.c.bf16 %v1219_v19, %v1218_v18  ;;  %v2538_v23 = vpack.c.bf16 %v1221_v21, %v1220_v20 }
 0x67e   :  { %2535 = vmatprep.subr.bf16.mxu0 %v2534_v22  ;;  %v1279_v46 = vpop.permute.xlu0 %1278  ;;  %v1294_v54 = vpop.permute.xlu1 %1293 }
 0x67f   :  { %2537 = vmatpush3.bf16.msra.mxu0 %v2534_v22 }
 0x680   :  { %2539 = vmatprep.subr.bf16.mxu0 %v2538_v23 }
 0x682   :  { %v1289_v57 = vpop.permute.xlu0 %1288  ;;  %v1304_v7 = vpop.permute.xlu1 %1303 }
 0x683   :  { %2541 = vmatpush3.bf16.msra.mxu0 %v2538_v23 }
 0x684   :  { %2574 = vmatprep.subr.bf16.mxu0 %v2642_v25 }
 0x686   :  { %2366 = vmatmul.mubr.msk.f32.vlgmr.msra.gmra.mrb[22].mxu0 %vm346_vm13, %v2035_v24  ;;  %v1299_v11 = vpop.permute.xlu0 %1298  ;;  %v1314_v20 = vpop.permute.xlu1 %1313 }
 0x687   :  { %2368 = vmatprep.mubr.msk.f32.mxu0 %vm346_vm13, %v2036_v26 }
 0x68a   :  { %2369 = vmatmul.mubr.msk.f32.gmra.mrb[24].mxu0 %vm346_vm13, %v2037_v27  ;;  %v1309_v23 = vpop.permute.xlu0 %1308 }
 0x68b   :  { %2371 = vmatprep.mubr.msk.f32.mxu0 %vm346_vm13, %v2038_v28 }
 0x68e   :  { %2372 = vmatmul.mubr.msk.f32.gmra.mrb[26].mxu0 %vm346_vm13, %v2039_v29 }
 0x68f   :  { %2374 = vmatprep.mubr.msk.f32.mxu0 %vm346_vm13, %v2040_v31 }
 0x692   :  { %2375 = vmatmul.mubr.msk.f32.gmra.mrb[28].mxu0 %vm346_vm13, %v2041_v33 }
 0x693   :  { %2377 = vmatprep.mubr.msk.f32.mxu0 %vm346_vm13, %v2042_v34 }
 0x696   :  { %2378 = vmatmul.mubr.msk.f32.gmra.mrb[30].mxu0 %vm346_vm13, %v2043_v35 }
 0x697   :  { %2380 = vmatprep.mubr.msk.f32.mxu0 %vm346_vm13, %v2044_v36  ;;  %v1324_v36 = vpop.permute.xlu1 %1323 }
 0x69a   :  { %2381 = vmatmul.mubr.msk.f32.gmra.mrb[32].mxu0 %vm346_vm13, %v2045_v37 }
 0x69b   :  { %2383 = vmatprep.mubr.msk.f32.mxu0 %vm346_vm13, %v2046_v38 }
 0x69e   :  { %2384 = vmatmul.mubr.msk.f32.gmra.mrb[34].mxu0 %vm346_vm13, %v2047_v50  ;;  %v1319_v50 = vpop.permute.xlu0 %1318 }
 0x69f   :  { %2386 = vmatprep.mubr.msk.f32.mxu0 %vm346_vm13, %v2048_v53 }
 0x6a2   :  { %2387 = vmatmul.mubr.msk.f32.gmra.mrb[36].mxu0 %vm346_vm13, %v2049_v41 }
 0x6a3   :  { %2435 = vmatprep.mubr.msk.f32.mxu0 %vm2643_vm12, %v2640_v17 }
 0x759   :  { %v2367_v47 = vpop.f32.mrb[22].mxu0 }
 0x75a   :  { %v1456_v48 = vadd.f32 %v2367_v47, %v1264_v43  ;;  %v1450_v49 = vpop.f32.mrb[23].mxu0 }
 0x75b   :  { %v1451_v51 = vadd.f32 %v1450_v49, %v1259_v58  ;;  %v1329_v49 = vpop.permute.xlu0 %1328 }
 0x75c   :  { %v1530_v52 = vmax.f32 %v1456_v48, 0.0 }
 0x75d   :  { %v1529_v55 = vmax.f32 %v1451_v51, 0.0  ;;  %v2370_v56 = vpop.f32.mrb[24].mxu0 }
 0x75e   :  { %v1466_v59 = vadd.f32 %v2370_v56, %v1274_v60  ;;  %v1460_v61 = vpop.f32.mrb[25].mxu0 }
 0x75f   :  { %v2542_v63 = vpack.c.bf16 %v1530_v52, %v1529_v55  ;;  %v1461_v1 = vadd.f32 %v1460_v61, %v1269_v44  ;;  %v2083_v61 = vld [vmem:[%s3264_s9 + $0x28] sm:$0xff] }
 0x760   :  { %v1532_v2 = vmax.f32 %v1466_v59, 0.0 }
 0x761   :  { %v1531_v3 = vmax.f32 %v1461_v1, 0.0  ;;  %v2373_v4 = vpop.f32.mrb[26].mxu0  ;;  %2543 = vmatprep.subr.bf16.mxu1 %v2542_v63  ;;  %v2085_v1 = vld [vmem:[%s3264_s9 + $0x38] sm:$0xff] }
 0x762   :  { %v1476_v5 = vadd.f32 %v2373_v4, %v1284_v45  ;;  %v1470_v6 = vpop.f32.mrb[27].mxu0  ;;  %2545 = vmatpush3.bf16.msra.mxu1 %v2542_v63  ;;  %v2084_v63 = vld [vmem:[%s3264_s9 + $0x30] sm:$0xff] }
 0x763   :  { %v2546_v8 = vpack.c.bf16 %v1532_v2, %v1531_v3  ;;  %v1471_v9 = vadd.f32 %v1470_v6, %v1279_v46  ;;  %v1334_v46 = vpop.permute.xlu1 %1333  ;;  %v1558_v3 = vpop.permute.xlu0 %1557 }
 0x764   :  { %v1534_v12 = vmax.f32 %v1476_v5, 0.0 }
 0x765   :  { %v1533_v13 = vmax.f32 %v1471_v9, 0.0  ;;  %v2376_v10 = vpop.f32.mrb[28].mxu0  ;;  %2547 = vmatprep.subr.bf16.mxu1 %v2546_v8 }
 0x766   :  { %v1486_v14 = vadd.f32 %v2376_v10, %v1294_v54  ;;  %v1480_v15 = vpop.f32.mrb[29].mxu0  ;;  %2549 = vmatpush3.bf16.msra.mxu1 %v2546_v8 }
 0x767   :  { %v2550_v16 = vpack.c.bf16 %v1534_v12, %v1533_v13  ;;  %v1481_v18 = vadd.f32 %v1480_v15, %v1289_v57  ;;  %v1563_v2 = vpop.permute.xlu1 %1562  ;;  %v1568_v13 = vpop.permute.xlu0 %1567 }
 0x768   :  { %v1536_v19 = vmax.f32 %v1486_v14, 0.0 }
 0x769   :  { %v1535_v21 = vmax.f32 %v1481_v18, 0.0  ;;  %v2379_v22 = vpop.f32.mrb[30].mxu0  ;;  %2551 = vmatprep.subr.bf16.mxu1 %v2550_v16 }
 0x76a   :  { %v1496_v24 = vadd.f32 %v2379_v22, %v1304_v7  ;;  %v1490_v26 = vpop.f32.mrb[31].mxu0  ;;  %2553 = vmatpush3.bf16.msra.mxu1 %v2550_v16 }
 0x76b   :  { %v2554_v27 = vpack.c.bf16 %v1536_v19, %v1535_v21  ;;  %v1491_v28 = vadd.f32 %v1490_v26, %v1299_v11  ;;  %v1573_v9 = vpop.permute.xlu1 %1572 }
 0x76c   :  { %v1538_v29 = vmax.f32 %v1496_v24, 0.0 }
 0x76d   :  { %v1537_v31 = vmax.f32 %v1491_v28, 0.0  ;;  %v2382_v33 = vpop.f32.mrb[32].mxu0  ;;  %2555 = vmatprep.subr.bf16.mxu1 %v2554_v27 }
 0x76e   :  { %v1506_v34 = vadd.f32 %v2382_v33, %v1314_v20  ;;  %v1500_v35 = vpop.f32.mrb[33].mxu0  ;;  %2557 = vmatpush3.bf16.msra.mxu1 %v2554_v27 }
 0x76f   :  { %v2558_v37 = vpack.c.bf16 %v1538_v29, %v1537_v31  ;;  %v1501_v38 = vadd.f32 %v1500_v35, %v1309_v23 }
 0x770   :  { %v1540_v53 = vmax.f32 %v1506_v34, 0.0 }
 0x771   :  { %v1539_v41 = vmax.f32 %v1501_v38, 0.0  ;;  %v2385_v42 = vpop.f32.mrb[34].mxu0  ;;  %2559 = vmatprep.subr.bf16.mxu1 %v2558_v37 }
 0x772   :  { %v1516_v43 = vadd.f32 %v2385_v42, %v1324_v36  ;;  %v1510_v58 = vpop.f32.mrb[35].mxu0  ;;  %2561 = vmatpush3.bf16.msra.mxu1 %v2558_v37  ;;  %v1844_v36 = vpop.permute.xlu1 %1843 }
 0x773   :  { %v2562_v60 = vpack.c.bf16 %v1540_v53, %v1539_v41  ;;  %v1511_v44 = vadd.f32 %v1510_v58, %v1319_v50  ;;  %v1839_v37 = vpop.permute.xlu0 %1838 }
 0x774   :  { %v1542_v45 = vmax.f32 %v1516_v43, 0.0 }
 0x775   :  { %v1541_v47 = vmax.f32 %v1511_v44, 0.0  ;;  %v2388_v48 = vpop.f32.mrb[36].mxu0  ;;  %2563 = vmatprep.subr.bf16.mxu1 %v2562_v60 }
 0x776   :  { %v1526_v51 = vadd.f32 %v2388_v48, %v1334_v46  ;;  %v1520_v52 = vpop.f32.mrb[37].mxu0  ;;  %2565 = vmatpush3.bf16.msra.mxu1 %v2562_v60  ;;  %v1868_v50 = vpop.permute.xlu1 %1867 }
 0x777   :  { %v2566_v54 = vpack.c.bf16 %v1542_v45, %v1541_v47  ;;  %v1521_v55 = vadd.f32 %v1520_v52, %v1329_v49  ;;  %v1863_v53 = vpop.permute.xlu0 %1862 }
 0x778   :  { %v1544_v56 = vmax.f32 %v1526_v51, 0.0 }
 0x779   :  { %v1543_v57 = vmax.f32 %v1521_v55, 0.0  ;;  %2567 = vmatprep.subr.bf16.mxu1 %v2566_v54 }
 0x77a   :  { %2569 = vmatpush3.bf16.msra.mxu1 %v2566_v54  ;;  %v1854_v42 = vpop.permute.xlu1 %1853 }
 0x77b   :  { %v2570_v59 = vpack.c.bf16 %v1544_v56, %v1543_v57  ;;  %v1849_v43 = vpop.permute.xlu0 %1848 }
 0x77d   :  { %2571 = vmatprep.subr.bf16.mxu1 %v2570_v59 }
 0x77e   :  { %2573 = vmatpush3.bf16.msra.mxu1 %v2570_v59  ;;  %v1878_v51 = vpop.permute.xlu1 %1877 }
 0x77f   :  { %2580 = vmatprep.subr.bf16.mxu1 %v2642_v25  ;;  %v1873_v52 = vpop.permute.xlu0 %1872 }
 0x781   :  { %2422 = vmatmul.mubr.f32.vlgmr.msra.gmra.mrb[14].mxu1 %v2083_v61 }
 0x782   :  { %2424 = vmatprep.mubr.f32.mxu1 %v2084_v63 }
 0x785   :  { %2425 = vmatmul.mubr.f32.gmra.mrb[16].mxu1 %v2085_v1 }
 0x786   :  { %2446 = vmatprep.mubr.msk.f32.mxu1 %vm2643_vm12, %v2640_v17 }
 0x854   :  { %v2423_v4 = vpop.f32.mrb[14].mxu1 }
 0x855   :  { %v1647_v5 = vadd.f32 %v2423_v4, %v1563_v2  ;;  %v1641_v6 = vpop.f32.mrb[15].mxu1  ;;  %v1888_v4 = vld [vmem:[%s3268_s13] sm:$0x1] }
 0x856   :  { %v1642_v7 = vadd.f32 %v1641_v6, %v1558_v3 }
 0x857   :  { %v1661_v8 = vadd.f32 %v1647_v5, %v3113_v30  ;;  %v1893_v5 = vpop.permute.xlu0 %1892 }
 0x858   :  { %v1660_v11 = vadd.f32 %v1642_v7, %v3116_v32  ;;  %v2426_v12 = vpop.f32.mrb[16].mxu1  ;;  %v1898_v6 = vrot.slane %v1893_v5, %v3019_v0 }
 0x859   :  { %v1657_v10 = vadd.f32 %v2426_v12, %v1573_v9  ;;  %v1651_v14 = vpop.f32.mrb[17].mxu1 }
 0x85a   :  { %v2575_v15 = vpack.c.bf16 %v1661_v8, %v1660_v11  ;;  %v1652_v16 = vadd.f32 %v1651_v14, %v1568_v13 }
 0x85b   :  { %v1663_v18 = vadd.f32 %v1657_v10, %v3121_v39 }
 0x85c   :  { %v1662_v19 = vadd.f32 %v1652_v16, %v3124_v40  ;;  %2576 = vmatpush3.bf16.msra.mxu0 %v2575_v15 }
 0x85d   :  { %2577 = vmatprep.subr.bf16.mxu0 %v2642_v25 }
 0x85e   :  { %v2578_v20 = vpack.c.bf16 %v1663_v18, %v1662_v19 }
 0x860   :  { %2579 = vmatpush3.bf16.msra.mxu0 %v2578_v20 }
 0x861   :  { %2586 = vmatprep.subr.bf16.mxu0 %v2642_v25 }
 0x863   :  { %2436 = vmatmul.mubr.msk.f32.vlgmr.msra.gmra.mrb[38].mxu0 %vm346_vm13, %v2644_v62 }
 0x864   :  { %2457 = vmatprep.mubr.msk.f32.mxu0 %vm2643_vm12, %v2640_v17 }
 0x936   :  { %v1738_v30 = vpop.f32.mrb[38].mxu0 }
 0x937   :  { %v1742_v32 = vmul.f32 0.03125, %v1738_v30  ;;  %v2437_v21 = vpop.f32.mrb[39].mxu0 }
 0x939   :  { %v1746_v39 = vrot.slane %v1742_v32, %v3019_v0 }
 0x93b   :  { %v1747_v22 = vsub.f32 %v1660_v11, %v1746_v39  ;;  %v1748_v40 = vsub.f32 %v1661_v8, %v1746_v39  ;;  %v1749_v23 = vsub.f32 %v1662_v19, %v1746_v39  ;;  %v1750_v24 = vsub.f32 %v1663_v18, %v1746_v39 }
 0x93d   :  { %v1751_v26 = vmul.f32 %v1747_v22, %v1747_v22  ;;  %v1752_v27 = vmul.f32 %v1748_v40, %v1748_v40  ;;  %v1753_v29 = vmul.f32 %v1749_v23, %v1749_v23  ;;  %v1754_v31 = vmul.f32 %v1750_v24, %v1750_v24 }
 0x93f   :  { %v2581_v28 = vpack.c.bf16 %v1752_v27, %v1751_v26  ;;  %v2584_v33 = vpack.c.bf16 %v1754_v31, %v1753_v29 }
 0x941   :  { %2582 = vmatpush3.bf16.msra.mxu1 %v2581_v28 }
 0x942   :  { %2583 = vmatprep.subr.bf16.mxu1 %v2642_v25 }
 0x945   :  { %2585 = vmatpush3.bf16.msra.mxu1 %v2584_v33 }
 0x948   :  { %2447 = vmatmul.mubr.msk.f32.vlgmr.msra.gmra.mrb[18].mxu1 %vm346_vm13, %v2644_v62 }
 0xa1b   :  { %v1821_v17 = vpop.f32.mrb[18].mxu1 }
 0xa1c   :  { %v1825_v34 = vmul.f32 0.03125, %v1821_v17  ;;  %v2448_v35 = vpop.f32.mrb[19].mxu1 }
 0xa1e   :  { %v1826_v38 = vadd.f32 1e-05, %v1825_v34 }
 0xa20   :  { %2613 = vrsqrt.f32 %v1826_v38 }
 0xa2a   :  { %v2614_v41 = vpop.eup %2613 }
 0xa2b   :  { %v1831_v58 = vrot.slane %v2614_v41, %v3019_v0 }
 0xa2d   :  { %v1832_v60 = vmul.f32 %v1831_v58, %v1747_v22  ;;  %v1833_v44 = vmul.f32 %v1831_v58, %v1748_v40  ;;  %v1834_v45 = vmul.f32 %v1831_v58, %v1749_v23  ;;  %v1835_v46 = vmul.f32 %v1831_v58, %v1750_v24 }
 0xa2f   :  { %v1856_v47 = vmul.f32 %v1839_v37, %v1832_v60  ;;  %v1857_v62 = vmul.f32 %v1844_v36, %v1833_v44  ;;  %v1858_v48 = vmul.f32 %v1849_v43, %v1834_v45  ;;  %v1859_v49 = vmul.f32 %v1854_v42, %v1835_v46 }
 0xa31   :  { %v1880_v54 = vadd.f32 %v1863_v53, %v1856_v47  ;;  %v1881_v55 = vadd.f32 %v1868_v50, %v1857_v62  ;;  %v1882_v56 = vadd.f32 %v1873_v52, %v1858_v48  ;;  %v1883_v57 = vadd.f32 %v1878_v51, %v1859_v49 }
 0xa33   :  { %v1884_v59 = vmax.f32 %v1880_v54, 0.0  ;;  %v1885_v61 = vmax.f32 %v1881_v55, 0.0  ;;  %v1886_v1 = vmax.f32 %v1882_v56, 0.0  ;;  %v1887_v2 = vmax.f32 %v1883_v57, 0.0 }
 0xa35   :  { %v2587_v63 = vpack.c.bf16 %v1885_v61, %v1884_v59  ;;  %v2590_v3 = vpack.c.bf16 %v1887_v2, %v1886_v1 }
 0xa37   :  { %2588 = vmatpush3.bf16.msra.mxu0 %v2587_v63 }
 0xa38   :  { %2589 = vmatprep.subr.bf16.mxu0 %v2642_v25 }
 0xa3b   :  { %2591 = vmatpush3.bf16.msra.mxu0 %v2590_v3 }
 0xa3e   :  { %2458 = vmatmul.mubr.msk.f32.vlgmr.msra.gmra.mrb[40].mxu0 %vm346_vm13, %v1888_v4 }
 0xb11   :  { %v1968_v7 = vpop.f32.mrb[40].mxu0 }
 0xb12   :  { %v1969_v8 = vadd.f32 %v1968_v7, %v1898_v6  ;;  %v2459_v9 = vpop.f32.mrb[41].mxu0 }
 0xb14   :  { %1972 = vst [vmem:[#allocation3] sm:$0x1] %v1969_v8 }
 0xb15   :  { %2626 = shalt.err (!%p2623_p4)
}
 0xb16   :  { %s2627_s18 = scalar_lea.hbm %s3270_s15, 16 }
 0xb17   :  { %p2628_p5 = scmp.ne.s32.totalorder %s3270_s15, %s2627_s18  ;;  %p2631_p6 = scmp.lt.u32.totalorder %s2627_s18, %s3270_s15 }
 0xb19   :  { %p2633_p7 = pnand %p2631_p6, %p2628_p5 }
 0xb1b   :  { %2636 = shalt.err (!%p2633_p7)
}
 0xb1c   :  { %1982 = dma.vmem_to_hbm [thread:$0]  %s1980_s11, 16, %s3270_s15, [#allocation4]  }
 0xb1d   :  { %2637 = dma.done.wait [#allocation4], 16  }
 0xb1e   :  { %2638 = vsyncadd [#allocation4], 4294967280 }
 0xb1f   :  { %1986 = vsyncpa [#allocation4], 1 }

// kernel: tpu_custom_call.1
= control target key start
LH: loop header
LB: loop body
LE: loop exit
PB: predicated region body
PF: predicated region fallthrough
CT: control target
= control target key end

     0   :  { %s3255_s0 = inlined_call_operand.vmem [shape: f32[20,8], index: 0, kind: input, shape index: {}]   ;;  %s3256_s1 = inlined_call_operand.vmem [shape: s32[3,8], index: 1, kind: input, shape index: {}]   ;;  %s3257_s2 = inlined_call_operand.vmem [shape: f32[32,20], index: 2, kind: input, shape index: {}]   ;;  %s3258_s3 = inlined_call_operand.vmem [shape: f32[32,1], index: 3, kind: input, shape index: {}]   ;;  %s3259_s4 = inlined_call_operand.vmem [shape: f32[32,15], index: 4, kind: input, shape index: {}]   ;;  %s3260_s5 = inlined_call_operand.vmem [shape: f32[2,32,1], index: 5, kind: input, shape index: {}]   ;;  %s3261_s6 = inlined_call_operand.vmem [shape: f32[2,32,1], index: 6, kind: input, shape index: {}]   ;;  %s3262_s7 = inlined_call_operand.vmem [shape: f32[2,128,32], index: 7, kind: input, shape index: {}]   ;;  %s3263_s8 = inlined_call_operand.vmem [shape: f32[2,128,1], index: 8, kind: input, shape index: {}]   ;;  %s3264_s9 = inlined_call_operand.vmem [shape: f32[2,32,128], index: 9, kind: input, shape index: {}]   ;;  %s3265_s10 = inlined_call_operand.vmem [shape: f32[2,32,1], index: 10, kind: input, shape index: {}]   ;;  %s3266_s11 = inlined_call_operand.vmem [shape: f32[32,1], index: 11, kind: input, shape index: {}]   ;;  %s3267_s12 = inlined_call_operand.vmem [shape: f32[32,1], index: 12, kind: input, shape index: {}]   ;;  %s3268_s13 = inlined_call_operand.vmem [shape: f32[1,32], index: 13, kind: input, shape index: {}]   ;;  %s3269_s14 = inlined_call_operand.<no memory space> [shape: f32[1,1], index: 14, kind: input, shape index: {}]   ;;  %s3270_s15 = inlined_call_operand.hbm [shape: f32[1,8], index: 15, kind: output, shape index: {}]  }
   0x1   :  { %v20_v0 = vstv %s3269_s14 }
   0x2   :  { %21 = vst [vmem:[#allocation2] sm:$0x1] %v20_v0 }
   0x3   :  { %v62_v1 = vld [vmem:[%s3258_s3 + $0x10] sm:$0xff]  ;;  %v60_v2 = vld [vmem:[%s3258_s3] sm:$0xff]  ;;  %v186_v3 = vlaneseq  ;;  %v2639_v4 = vmov 0   ;;  %v58_v6 = vld [vmem:[%s3255_s0 + $0x8] sm:$0xff]  ;;  %vm84_vm0 = vcmask 162816   ;;  %vm97_vm1 = vcmask 1043456  }
   0x4   :  { %2608 = vset.pattern.permute.xlu1 %v2639_v4  ;;  %2607 = vset.pattern.permute.xlu0 %v2639_v4  ;;  %v57_v5 = vld [vmem:[%s3255_s0] sm:$0xff]  ;;  %v63_v7 = vld [vmem:[%s3258_s3 + $0x18] sm:$0xff]  ;;  %v61_v8 = vld [vmem:[%s3258_s3 + $0x8] sm:$0xff]  ;;  %vm232_vm3 = vcmask 121856   ;;  %v2640_v17 = vmov 0.0   ;;  %vm245_vm9 = vcmask 1046528  }
   0x5   :  { %76 = vperm.xlu1 %2608, %v62_v1   ;;  %66 = vperm.xlu0 %2607, %v60_v2   ;;  %v2460_v9 = vpack.c.bf16 %v58_v6, %v57_v5  ;;  %v2747_v10 = vshrl.u32 %v186_v3, 7  ;;  %v59_v11 = vld [vmem:[%s3255_s0 + $0x10] sm:$0xf]  ;;  %v53_v12 = vld [vmem:[%s3257_s2] sm:$0xff]  ;;  %v339_v21 = vld [vmem:[%s3260_s5 + $0x8] sm:$0xff]  ;;  %vm2641_vm10 = vmmov 1  }
   0x6   :  { %v1992_v13 = vld [vmem:[%s3256_s1] ss:$0 sm:$0xff]  ;;  %2227 = vmatprep.mubr.msk.f32.mxu0 %vm84_vm0, %v53_v12  ;;  %v1995_v15 = vld [vmem:[%s3256_s1 + $0x1] ss:$0 sm:$0xff]  ;;  %v1998_v16 = vld [vmem:[%s3256_s1 + $0x2] ss:$0 sm:$0xff] }
   0x7   :  { %2461 = vmatprep.subr.bf16.mxu0 %v2460_v9  ;;  %v188_v14 = vadd.s32 8, %v2747_v10  ;;  %vm194_vm2 = vcmp.eq.s32.totalorder %v2747_v10, %v1992_v13  ;;  %vm207_vm4 = vcmp.eq.s32.totalorder %v2747_v10, %v1995_v15  ;;  %vm220_vm5 = vcmp.eq.s32.totalorder %v2747_v10, %v1998_v16  ;;  %v228_v20 = vld [vmem:[%s3259_s4] sm:$0xff]  ;;  %v54_v27 = vld [vmem:[%s3257_s2 + $0x8] sm:$0xff]  ;;  %v55_v31 = vld [vmem:[%s3257_s2 + $0x10] sm:$0xff] }
   0x8   :  { %2463 = vmatpush3.bf16.msra.mxu0 %v2460_v9  ;;  %v1993_v18 = vsel %vm194_vm2, 1.0, %v2640_v17  ;;  %v1996_v19 = vsel %vm207_vm4, 1.0, %v2640_v17  ;;  %v338_v22 = vld [vmem:[%s3260_s5] sm:$0xff]  ;;  %v1999_v26 = vsel %vm220_vm5, 1.0, %v2640_v17  ;;  %2237 = vmatprep.mubr.msk.f32.mxu1 %vm232_vm3, %v228_v20  ;;  %vm2465_vm11 = vmpackc.low %vm245_vm9, %vm2641_vm10  ;;  %v343_v33 = vld [vmem:[%s3261_s6 + $0x8] sm:$0xff] }
   0x9   :  { %81 = vperm.xlu1 %2608, %v63_v7   ;;  %71 = vperm.xlu0 %2607, %v61_v8   ;;  %vm195_vm6 = vcmp.eq.s32.totalorder %v188_v14, %v1992_v13  ;;  %vm208_vm7 = vcmp.eq.s32.totalorder %v188_v14, %v1995_v15  ;;  %vm221_vm8 = vcmp.eq.s32.totalorder %v188_v14, %v1998_v16  ;;  %v342_v35 = vld [vmem:[%s3261_s6] sm:$0xff]  ;;  %v56_v36 = vld [vmem:[%s3257_s2 + $0x18] sm:$0xff]  ;;  %v229_v37 = vld [vmem:[%s3259_s4 + $0x8] sm:$0xff] }
   0xa   :  { %2225 = vmatprep.subr.msk.mxu0 %vm97_vm1, %v59_v11  ;;  %v1994_v23 = vsel %vm195_vm6, 1.0, %v2640_v17  ;;  %v1997_v24 = vsel %vm208_vm7, 1.0, %v2640_v17  ;;  %v213_v25 = vadd.f32 %v1996_v19, %v1993_v18  ;;  %v2000_v29 = vsel %vm221_vm8, 1.0, %v2640_v17  ;;  %v341_v38 = vld [vmem:[%s3260_s5 + $0x18] sm:$0xff]  ;;  %v340_v39 = vld [vmem:[%s3260_s5 + $0x10] sm:$0xff]  ;;  %v579_v44 = vld [vmem:[%s3263_s8 + $0x8] sm:$0xff] }
   0xb   :  { %v214_v28 = vadd.f32 %v1997_v24, %v1994_v23  ;;  %v230_v40 = vld [vmem:[%s3259_s4 + $0x10] sm:$0xff]  ;;  %v231_v41 = vld [vmem:[%s3259_s4 + $0x18] sm:$0xff]  ;;  %v578_v45 = vld [vmem:[%s3263_s8] sm:$0xff] }
   0xc   :  { %2226 = vmatpush3.msk.msra.mxu0 %vm97_vm1, %v59_v11  ;;  %v226_v30 = vadd.f32 %v1999_v26, %v213_v25  ;;  %v345_v42 = vld [vmem:[%s3261_s6 + $0x18] sm:$0xff]  ;;  %v344_v43 = vld [vmem:[%s3261_s6 + $0x10] sm:$0xff] }
   0xd   :  { %521 = vperm.xlu1 %2608, %v339_v21   ;;  %516 = vperm.xlu0 %2607, %v338_v22   ;;  %v227_v32 = vadd.f32 %v2000_v29, %v214_v28  ;;  %v581_v46 = vld [vmem:[%s3263_s8 + $0x18] sm:$0xff]  ;;  %v580_v47 = vld [vmem:[%s3263_s8 + $0x10] sm:$0xff] }
   0xe   :  { %2228 = vmatmul.mubr.msk.f32.vlgmr.msra.gmra.mrb[0].mxu0 %vm84_vm0, %v54_v27 }
   0xf   :  { %v2464_v34 = vpack.c.bf16 %v227_v32, %v226_v30  ;;  %2230 = vmatprep.mubr.msk.f32.mxu0 %vm84_vm0, %v55_v31 }
  0x11   :  { %2466 = vmatprep.subr.msk.bf16.mxu1 %vm2465_vm11, %v2464_v34  ;;  %545 = vperm.xlu1 %2608, %v343_v33  }
  0x12   :  { %540 = vperm.xlu0 %2607, %v342_v35   ;;  %2469 = vmatpush3.bf16.msk.msra.mxu1 %vm2465_vm11, %v2464_v34 }
  0x13   :  { %2231 = vmatmul.mubr.msk.f32.gmra.mrb[2].mxu0 %vm84_vm0, %v56_v36 }
  0x15   :  { %2238 = vmatmul.mubr.msk.f32.vlgmr.msra.gmra.mrb[0].mxu1 %vm232_vm3, %v229_v37  ;;  %531 = vperm.xlu1 %2608, %v341_v38  }
  0x16   :  { %526 = vperm.xlu0 %2607, %v340_v39   ;;  %2240 = vmatprep.mubr.msk.f32.mxu1 %vm232_vm3, %v230_v40 }
  0x19   :  { %2241 = vmatmul.mubr.msk.f32.gmra.mrb[2].mxu1 %vm232_vm3, %v231_v41  ;;  %555 = vperm.xlu1 %2608, %v345_v42  }
  0x1a   :  { %550 = vperm.xlu0 %2607, %v344_v43  }
  0x1d   :  { %601 = vperm.xlu1 %2608, %v579_v44  }
  0x1e   :  { %596 = vperm.xlu0 %2607, %v578_v45  }
  0x1f   :  { %22 = vsyncpa [#allocation4], 0  ;;  %v583_v48 = vld [vmem:[%s3263_s8 + $0x28] sm:$0xff]  ;;  %v582_v49 = vld [vmem:[%s3263_s8 + $0x20] sm:$0xff]  ;;  %v2642_v25 = vmov 0.0|0.0   ;;  %vm2643_vm12 = vmmov 0  }
  0x20   :  { %v585_v50 = vld [vmem:[%s3263_s8 + $0x38] sm:$0xff]  ;;  %v584_v51 = vld [vmem:[%s3263_s8 + $0x30] sm:$0xff]  ;;  %v587_v52 = vld [vmem:[%s3263_s8 + $0x48] sm:$0xff]  ;;  %2470 = vmatprep.subr.bf16.mxu1 %v2642_v25  ;;  %2251 = vmatprep.mubr.msk.f32.mxu1 %vm2643_vm12, %v2640_v17  ;;  %vm346_vm13 = vcmask 261120   ;;  %s2645_s16 = smov [#allocation3]  }
  0x21   :  { %611 = vperm.xlu1 %2608, %v581_v46   ;;  %v586_v53 = vld [vmem:[%s3263_s8 + $0x40] sm:$0xff]  ;;  %v589_v54 = vld [vmem:[%s3263_s8 + $0x58] sm:$0xff]  ;;  %v588_v55 = vld [vmem:[%s3263_s8 + $0x50] sm:$0xff] }
  0x22   :  { %606 = vperm.xlu0 %2607, %v580_v47   ;;  %v591_v56 = vld [vmem:[%s3263_s8 + $0x68] sm:$0xff]  ;;  %v590_v57 = vld [vmem:[%s3263_s8 + $0x60] sm:$0xff]  ;;  %v593_v58 = vld [vmem:[%s3263_s8 + $0x78] sm:$0xff] }
  0x23   :  { %v592_v59 = vld [vmem:[%s3263_s8 + $0x70] sm:$0xff]  ;;  %v888_v60 = vld [vmem:[%s3265_s10 + $0x8] sm:$0xff]  ;;  %v887_v61 = vld [vmem:[%s3265_s10] sm:$0xff] }
  0x24   :  { %v890_v62 = vld [vmem:[%s3265_s10 + $0x18] sm:$0xff]  ;;  %v889_v63 = vld [vmem:[%s3265_s10 + $0x10] sm:$0xff]  ;;  %v2025_v0 = vld [vmem:[%s3260_s5 + $0x28] sm:$0xff] }
  0x25   :  { %621 = vperm.xlu1 %2608, %v583_v48   ;;  %v2024_v1 = vld [vmem:[%s3260_s5 + $0x20] sm:$0xff]  ;;  %v2029_v2 = vld [vmem:[%s3261_s6 + $0x28] sm:$0xff]  ;;  %v2027_v4 = vld [vmem:[%s3260_s5 + $0x38] sm:$0xff] }
  0x26   :  { %616 = vperm.xlu0 %2607, %v582_v49   ;;  %v2028_v3 = vld [vmem:[%s3261_s6 + $0x20] sm:$0xff]  ;;  %v2026_v5 = vld [vmem:[%s3260_s5 + $0x30] sm:$0xff]  ;;  %v2031_v6 = vld [vmem:[%s3261_s6 + $0x38] sm:$0xff] }
  0x27   :  { %v2030_v7 = vld [vmem:[%s3261_s6 + $0x30] sm:$0xff]  ;;  %v2051_v8 = vld [vmem:[%s3263_s8 + $0x88] sm:$0xff]  ;;  %v2050_v9 = vld [vmem:[%s3263_s8 + $0x80] sm:$0xff] }
  0x28   :  { %v2053_v11 = vld [vmem:[%s3263_s8 + $0x98] sm:$0xff]  ;;  %v2052_v12 = vld [vmem:[%s3263_s8 + $0x90] sm:$0xff]  ;;  %v2055_v13 = vld [vmem:[%s3263_s8 + $0xa8] sm:$0xff] }
  0x29   :  { %631 = vperm.xlu1 %2608, %v585_v50   ;;  %v2054_v14 = vld [vmem:[%s3263_s8 + $0xa0] sm:$0xff]  ;;  %v2057_v15 = vld [vmem:[%s3263_s8 + $0xb8] sm:$0xff]  ;;  %v2056_v16 = vld [vmem:[%s3263_s8 + $0xb0] sm:$0xff] }
  0x2a   :  { %626 = vperm.xlu0 %2607, %v584_v51   ;;  %v2059_v18 = vld [vmem:[%s3263_s8 + $0xc8] sm:$0xff]  ;;  %v2058_v19 = vld [vmem:[%s3263_s8 + $0xc0] sm:$0xff]  ;;  %v2061_v20 = vld [vmem:[%s3263_s8 + $0xd8] sm:$0xff] }
  0x2b   :  { %v2060_v21 = vld [vmem:[%s3263_s8 + $0xd0] sm:$0xff]  ;;  %v2063_v22 = vld [vmem:[%s3263_s8 + $0xe8] sm:$0xff]  ;;  %v2062_v23 = vld [vmem:[%s3263_s8 + $0xe0] sm:$0xff] }
  0x2c   :  { %v2065_v24 = vld [vmem:[%s3263_s8 + $0xf8] sm:$0xff]  ;;  %v2064_v26 = vld [vmem:[%s3263_s8 + $0xf0] sm:$0xff]  ;;  %v2087_v27 = vld [vmem:[%s3265_s10 + $0x28] sm:$0xff] }
  0x2d   :  { %641 = vperm.xlu1 %2608, %v587_v52   ;;  %v2086_v28 = vld [vmem:[%s3265_s10 + $0x20] sm:$0xff]  ;;  %v2089_v29 = vld [vmem:[%s3265_s10 + $0x38] sm:$0xff]  ;;  %v2088_v30 = vld [vmem:[%s3265_s10 + $0x30] sm:$0xff] }
  0x2e   :  { %636 = vperm.xlu0 %2607, %v586_v53   ;;  %v1665_v31 = vld [vmem:[%s3266_s11 + $0x8] sm:$0xff]  ;;  %v1664_v32 = vld [vmem:[%s3266_s11] sm:$0xff]  ;;  %v1667_v35 = vld [vmem:[%s3266_s11 + $0x18] sm:$0xff] }
  0x2f   :  { %v1669_v33 = vld [vmem:[%s3267_s12 + $0x8] sm:$0xff]  ;;  %v1668_v34 = vld [vmem:[%s3267_s12] sm:$0xff]  ;;  %v1666_v36 = vld [vmem:[%s3266_s11 + $0x10] sm:$0xff]  ;;  %s1979_s11 = sshll.u32 %s2645_s16, 4  ;;  %s1980_s11 = int_to_ptr.vmem [resolvable:$true] %s1979_s11 }
  0x30   :  { %v1671_v37 = vld [vmem:[%s3267_s12 + $0x18] sm:$0xff]  ;;  %v1670_v38 = vld [vmem:[%s3267_s12 + $0x10] sm:$0xff]  ;;  %v1889_v39 = vld [vmem:[#allocation2] sm:$0x1]  ;;  %s2615_s12 = scalar_lea.vmem %s1980_s11, 16  ;;  %s2619_s6 = scalar_lea.vmem %s1980_s11, 32 }
  0x31   :  { %651 = vperm.xlu1 %2608, %v589_v54   ;;  %p2616_p0 = scmp.ne.s32.totalorder %s1980_s11, %s2615_s12  ;;  %p2620_p1 = scmp.lt.s32.totalorder %s1980_s11, %s1980_s11 }
  0x32   :  { %646 = vperm.xlu0 %2607, %v588_v55   ;;  %p2621_p2 = scmp.lt.s32.totalorder %s2619_s6, %s2615_s12 }
  0x34   :  { %p2622_p3 = por %p2621_p2, %p2620_p1 }
  0x35   :  { %661 = vperm.xlu1 %2608, %v591_v56  }
  0x36   :  { %656 = vperm.xlu0 %2607, %v590_v57   ;;  %p2623_p4 = pnand %p2622_p3, %p2616_p0 }
  0x39   :  { %671 = vperm.xlu1 %2608, %v593_v58  }
  0x3a   :  { %666 = vperm.xlu0 %2607, %v592_v59  }
  0x3d   :  { %898 = vperm.xlu1 %2608, %v888_v60  }
  0x3e   :  { %893 = vperm.xlu0 %2607, %v887_v61  }
  0x41   :  { %908 = vperm.xlu1 %2608, %v890_v62   ;;  %v2644_v62 = vmov 1.0  }
  0x42   :  { %903 = vperm.xlu0 %2607, %v889_v63  }
  0x45   :  { %1181 = vperm.xlu1 %2608, %v2025_v0   ;;  %v3019_v0 = vsub.s32 0, %v2747_v10 }
  0x46   :  { %1176 = vperm.xlu0 %2607, %v2024_v1  }
  0x49   :  { %1205 = vperm.xlu1 %2608, %v2029_v2  }
  0x4a   :  { %1200 = vperm.xlu0 %2607, %v2028_v3  }
  0x4d   :  { %1191 = vperm.xlu1 %2608, %v2027_v4  }
  0x4e   :  { %1186 = vperm.xlu0 %2607, %v2026_v5  }
  0x51   :  { %1215 = vperm.xlu1 %2608, %v2031_v6  }
  0x52   :  { %1210 = vperm.xlu0 %2607, %v2030_v7  }
  0x55   :  { %1263 = vperm.xlu1 %2608, %v2051_v8  }
  0x56   :  { %1258 = vperm.xlu0 %2607, %v2050_v9  }
  0x59   :  { %1273 = vperm.xlu1 %2608, %v2053_v11  }
  0x5a   :  { %1268 = vperm.xlu0 %2607, %v2052_v12  }
  0x5d   :  { %1283 = vperm.xlu1 %2608, %v2055_v13  }
  0x5e   :  { %1278 = vperm.xlu0 %2607, %v2054_v14   ;;  %v562_v14 = vld [vmem:[%s3262_s7] sm:$0xff] }
  0x5f   :  { %2273 = vmatprep.mubr.msk.f32.mxu0 %vm346_vm13, %v562_v14 }
  0x61   :  { %1293 = vperm.xlu1 %2608, %v2057_v15  }
  0x62   :  { %1288 = vperm.xlu0 %2607, %v2056_v16  }
  0x65   :  { %1303 = vperm.xlu1 %2608, %v2059_v18  }
  0x66   :  { %1298 = vperm.xlu0 %2607, %v2058_v19  }
  0x69   :  { %1313 = vperm.xlu1 %2608, %v2061_v20  }
  0x6a   :  { %1308 = vperm.xlu0 %2607, %v2060_v21  }
  0x6d   :  { %1323 = vperm.xlu1 %2608, %v2063_v22  }
  0x6e   :  { %1318 = vperm.xlu0 %2607, %v2062_v23  }
  0x71   :  { %1333 = vperm.xlu1 %2608, %v2065_v24  }
  0x72   :  { %1328 = vperm.xlu0 %2607, %v2064_v26  }
  0x75   :  { %1562 = vperm.xlu1 %2608, %v2087_v27  }
  0x76   :  { %1557 = vperm.xlu0 %2607, %v2086_v28  }
  0x79   :  { %1572 = vperm.xlu1 %2608, %v2089_v29  }
  0x7a   :  { %1567 = vperm.xlu0 %2607, %v2088_v30  }
  0x7d   :  { %1843 = vperm.xlu1 %2608, %v1665_v31  }
  0x7e   :  { %1838 = vperm.xlu0 %2607, %v1664_v32  }
  0x81   :  { %1867 = vperm.xlu1 %2608, %v1669_v33  }
  0x82   :  { %1862 = vperm.xlu0 %2607, %v1668_v34  }
  0x84   :  { %v67_v40 = vpop.permute.xlu0 %66  ;;  %v77_v43 = vpop.permute.xlu1 %76 }
  0x85   :  { %1853 = vperm.xlu1 %2608, %v1667_v35  }
  0x86   :  { %1848 = vperm.xlu0 %2607, %v1666_v36  }
  0x88   :  { %v72_v44 = vpop.permute.xlu0 %71  ;;  %v82_v52 = vpop.permute.xlu1 %81 }
  0x89   :  { %1877 = vperm.xlu1 %2608, %v1671_v37  }
  0x8a   :  { %1872 = vperm.xlu0 %2607, %v1670_v38  }
  0x8c   :  { %v522_v19 = vpop.permute.xlu1 %521  ;;  %v517_v20 = vpop.permute.xlu0 %516 }
  0x8e   :  { %1892 = vperm.xlu0 %2607, %v1889_v39  }
  0x90   :  { %v546_v22 = vpop.permute.xlu1 %545 }
  0x91   :  { %v541_v23 = vpop.permute.xlu0 %540 }
  0x94   :  { %v532_v26 = vpop.permute.xlu1 %531 }
  0x95   :  { %v527_v27 = vpop.permute.xlu0 %526 }
  0x98   :  { %v556_v37 = vpop.permute.xlu1 %555 }
  0x99   :  { %v551_v38 = vpop.permute.xlu0 %550 }
  0xe1   :  { %v2229_v41 = vpop.f32.mrb[0].mxu0 }
  0xe2   :  { %v167_v42 = vpop.f32.mrb[1].mxu0  ;;  %v173_v46 = vadd.f32 %v2229_v41, %v72_v44 }
  0xe3   :  { %v168_v48 = vadd.f32 %v167_v42, %v67_v40 }
  0xe6   :  { %v2232_v45 = vpop.f32.mrb[2].mxu0 }
  0xe7   :  { %v177_v47 = vpop.f32.mrb[3].mxu0  ;;  %v183_v54 = vadd.f32 %v2232_v45, %v82_v52  ;;  %v563_v45 = vld [vmem:[%s3262_s7 + $0x8] sm:$0xff]  ;;  %v569_v52 = vld [vmem:[%s3262_s7 + $0x38] sm:$0xff] }
  0xe8   :  { %v2239_v49 = vpop.f32.mrb[0].mxu1  ;;  %v178_v55 = vadd.f32 %v177_v47, %v77_v43  ;;  %v565_v47 = vld [vmem:[%s3262_s7 + $0x18] sm:$0xff] }
  0xe9   :  { %v3000_v50 = vadd.f32 %v2239_v49, %v173_v46  ;;  %v315_v51 = vpop.f32.mrb[1].mxu1  ;;  %v564_v46 = vld [vmem:[%s3262_s7 + $0x10] sm:$0xff]  ;;  %v567_v49 = vld [vmem:[%s3262_s7 + $0x28] sm:$0xff] }
  0xea   :  { %v3002_v53 = vadd.f32 %v315_v51, %v168_v48  ;;  %v566_v48 = vld [vmem:[%s3262_s7 + $0x20] sm:$0xff]  ;;  %v568_v51 = vld [vmem:[%s3262_s7 + $0x30] sm:$0xff] }
  0xec   :  { %v2471_v56 = vpack.c.bf16 %v3000_v50, %v3002_v53  ;;  %v2242_v57 = vpop.f32.mrb[2].mxu1 }
  0xed   :  { %v3006_v58 = vadd.f32 %v2242_v57, %v183_v54  ;;  %v325_v59 = vpop.f32.mrb[3].mxu1  ;;  %v570_v54 = vld [vmem:[%s3262_s7 + $0x40] sm:$0xff]  ;;  %v573_v57 = vld [vmem:[%s3262_s7 + $0x58] sm:$0xff] }
  0xee   :  { %v3008_v60 = vadd.f32 %v325_v59, %v178_v55  ;;  %2472 = vmatpush3.bf16.msra.mxu1 %v2471_v56  ;;  %v571_v55 = vld [vmem:[%s3262_s7 + $0x48] sm:$0xff]  ;;  %v572_v56 = vld [vmem:[%s3262_s7 + $0x50] sm:$0xff]  ;;  %v574_v59 = vld [vmem:[%s3262_s7 + $0x60] sm:$0xff] }
  0xef   :  { %2473 = vmatprep.subr.bf16.mxu1 %v2642_v25 }
  0xf0   :  { %v2474_v61 = vpack.c.bf16 %v3006_v58, %v3008_v60 }
  0xf2   :  { %2475 = vmatpush3.bf16.msra.mxu1 %v2474_v61  ;;  %v575_v61 = vld [vmem:[%s3262_s7 + $0x68] sm:$0xff] }
  0xf3   :  { %2476 = vmatprep.subr.bf16.mxu1 %v2642_v25 }
  0xf5   :  { %2252 = vmatmul.mubr.msk.f32.vlgmr.msra.gmra.mrb[4].mxu1 %vm346_vm13, %v2644_v62 }
  0xf6   :  { %2262 = vmatprep.mubr.msk.f32.mxu1 %vm2643_vm12, %v2640_v17 }
 0x1c8   :  { %v416_v63 = vpop.f32.mrb[4].mxu1 }
 0x1c9   :  { %v420_v1 = vmul.f32 0.03125, %v416_v63  ;;  %v2253_v2 = vpop.f32.mrb[5].mxu1  ;;  %v576_v63 = vld [vmem:[%s3262_s7 + $0x70] sm:$0xff] }
 0x1ca   :  { %v883_v2 = vld [vmem:[%s3264_s9] sm:$0xff] }
 0x1cb   :  { %v424_v3 = vrot.slane %v420_v1, %v3019_v0  ;;  %v577_v1 = vld [vmem:[%s3262_s7 + $0x78] sm:$0xff] }
 0x1cd   :  { %v425_v4 = vsub.f32 %v3002_v53, %v424_v3  ;;  %v426_v5 = vsub.f32 %v3000_v50, %v424_v3  ;;  %v427_v6 = vsub.f32 %v3008_v60, %v424_v3  ;;  %v428_v7 = vsub.f32 %v3006_v58, %v424_v3  ;;  %v602_v3 = vpop.permute.xlu1 %601 }
 0x1cf   :  { %v429_v8 = vmul.f32 %v425_v4, %v425_v4  ;;  %v430_v9 = vmul.f32 %v426_v5, %v426_v5  ;;  %v431_v12 = vmul.f32 %v427_v6, %v427_v6  ;;  %v432_v13 = vmul.f32 %v428_v7, %v428_v7 }
 0x1d1   :  { %v2477_v11 = vpack.c.bf16 %v430_v9, %v429_v8  ;;  %v2480_v10 = vpack.c.bf16 %v432_v13, %v431_v12 }
 0x1d3   :  { %2478 = vmatpush3.bf16.msra.mxu1 %v2477_v11 }
 0x1d4   :  { %2479 = vmatprep.subr.bf16.mxu1 %v2642_v25 }
 0x1d7   :  { %2481 = vmatpush3.bf16.msra.mxu1 %v2480_v10 }
 0x1da   :  { %2263 = vmatmul.mubr.msk.f32.vlgmr.msra.gmra.mrb[6].mxu1 %vm346_vm13, %v2644_v62 }
 0x1db   :  { %2329 = vmatprep.mubr.f32.mxu1 %v883_v2 }
 0x2ad   :  { %v499_v15 = vpop.f32.mrb[6].mxu1 }
 0x2ae   :  { %v503_v16 = vmul.f32 0.03125, %v499_v15  ;;  %v2264_v18 = vpop.f32.mrb[7].mxu1 }
 0x2b0   :  { %v504_v21 = vadd.f32 1e-05, %v503_v16 }
 0x2b2   :  { %2609 = vrsqrt.f32 %v504_v21 }
 0x2bc   :  { %v2610_v24 = vpop.eup %2609 }
 0x2bd   :  { %v509_v28 = vrot.slane %v2610_v24, %v3019_v0 }
 0x2bf   :  { %v510_v29 = vmul.f32 %v509_v28, %v425_v4  ;;  %v511_v30 = vmul.f32 %v509_v28, %v426_v5  ;;  %v512_v31 = vmul.f32 %v509_v28, %v427_v6  ;;  %v513_v32 = vmul.f32 %v509_v28, %v428_v7  ;;  %v597_v4 = vpop.permute.xlu0 %596  ;;  %v612_v5 = vpop.permute.xlu1 %611 }
 0x2c1   :  { %v534_v33 = vmul.f32 %v517_v20, %v510_v29  ;;  %v535_v34 = vmul.f32 %v522_v19, %v511_v30  ;;  %v536_v35 = vmul.f32 %v527_v27, %v512_v31  ;;  %v537_v36 = vmul.f32 %v532_v26, %v513_v32 }
 0x2c3   :  { %v558_v39 = vadd.f32 %v541_v23, %v534_v33  ;;  %v559_v40 = vadd.f32 %v546_v22, %v535_v34  ;;  %v560_v41 = vadd.f32 %v551_v38, %v536_v35  ;;  %v561_v42 = vadd.f32 %v556_v37, %v537_v36  ;;  %v607_v6 = vpop.permute.xlu0 %606  ;;  %v622_v7 = vpop.permute.xlu1 %621 }
 0x2c5   :  { %v2482_v43 = vpack.c.bf16 %v559_v40, %v558_v39  ;;  %v2486_v44 = vpack.c.bf16 %v561_v42, %v560_v41 }
 0x2c7   :  { %2483 = vmatprep.subr.bf16.mxu0 %v2482_v43  ;;  %v617_v8 = vpop.permute.xlu0 %616  ;;  %v632_v14 = vpop.permute.xlu1 %631 }
 0x2c8   :  { %2485 = vmatpush3.bf16.msra.mxu0 %v2482_v43 }
 0x2c9   :  { %2487 = vmatprep.subr.bf16.mxu0 %v2486_v44 }
 0x2cb   :  { %v627_v18 = vpop.permute.xlu0 %626  ;;  %v642_v29 = vpop.permute.xlu1 %641 }
 0x2cc   :  { %2489 = vmatpush3.bf16.msra.mxu0 %v2486_v44 }
 0x2cd   :  { %2522 = vmatprep.subr.bf16.mxu0 %v2642_v25 }
 0x2cf   :  { %2274 = vmatmul.mubr.msk.f32.vlgmr.msra.gmra.mrb[4].mxu0 %vm346_vm13, %v563_v45  ;;  %v637_v32 = vpop.permute.xlu0 %636  ;;  %v652_v41 = vpop.permute.xlu1 %651 }
 0x2d0   :  { %2276 = vmatprep.mubr.msk.f32.mxu0 %vm346_vm13, %v564_v46 }
 0x2d3   :  { %2277 = vmatmul.mubr.msk.f32.gmra.mrb[6].mxu0 %vm346_vm13, %v565_v47  ;;  %v647_v44 = vpop.permute.xlu0 %646 }
 0x2d4   :  { %2279 = vmatprep.mubr.msk.f32.mxu0 %vm346_vm13, %v566_v48 }
 0x2d7   :  { %2280 = vmatmul.mubr.msk.f32.gmra.mrb[8].mxu0 %vm346_vm13, %v567_v49 }
 0x2d8   :  { %2282 = vmatprep.mubr.msk.f32.mxu0 %vm346_vm13, %v568_v51 }
 0x2db   :  { %2283 = vmatmul.mubr.msk.f32.gmra.mrb[10].mxu0 %vm346_vm13, %v569_v52 }
 0x2dc   :  { %2285 = vmatprep.mubr.msk.f32.mxu0 %vm346_vm13, %v570_v54 }
 0x2df   :  { %2286 = vmatmul.mubr.msk.f32.gmra.mrb[12].mxu0 %vm346_vm13, %v571_v55 }
 0x2e0   :  { %2288 = vmatprep.mubr.msk.f32.mxu0 %vm346_vm13, %v572_v56  ;;  %v662_v56 = vpop.permute.xlu1 %661 }
 0x2e3   :  { %2289 = vmatmul.mubr.msk.f32.gmra.mrb[14].mxu0 %vm346_vm13, %v573_v57 }
 0x2e4   :  { %2291 = vmatprep.mubr.msk.f32.mxu0 %vm346_vm13, %v574_v59 }
 0x2e7   :  { %2292 = vmatmul.mubr.msk.f32.gmra.mrb[16].mxu0 %vm346_vm13, %v575_v61  ;;  %v657_v61 = vpop.permute.xlu0 %656 }
 0x2e8   :  { %2294 = vmatprep.mubr.msk.f32.mxu0 %vm346_vm13, %v576_v63 }
 0x2eb   :  { %2295 = vmatmul.mubr.msk.f32.gmra.mrb[18].mxu0 %vm346_vm13, %v577_v1 }
 0x2ec   :  { %2343 = vmatprep.mubr.msk.f32.mxu0 %vm2643_vm12, %v2640_v17 }
 0x3a2   :  { %v2275_v9 = vpop.f32.mrb[4].mxu0 }
 0x3a3   :  { %v794_v11 = vadd.f32 %v2275_v9, %v602_v3  ;;  %v788_v12 = vpop.f32.mrb[5].mxu0 }
 0x3a4   :  { %v789_v13 = vadd.f32 %v788_v12, %v597_v4  ;;  %v667_v12 = vpop.permute.xlu0 %666 }
 0x3a5   :  { %v868_v10 = vmax.f32 %v794_v11, 0.0 }
 0x3a6   :  { %v867_v15 = vmax.f32 %v789_v13, 0.0  ;;  %v2278_v16 = vpop.f32.mrb[6].mxu0 }
 0x3a7   :  { %v804_v19 = vadd.f32 %v2278_v16, %v612_v5  ;;  %v798_v20 = vpop.f32.mrb[7].mxu0 }
 0x3a8   :  { %v2490_v21 = vpack.c.bf16 %v868_v10, %v867_v15  ;;  %v799_v22 = vadd.f32 %v798_v20, %v607_v6  ;;  %v884_v20 = vld [vmem:[%s3264_s9 + $0x8] sm:$0xff] }
 0x3a9   :  { %v870_v23 = vmax.f32 %v804_v19, 0.0 }
 0x3aa   :  { %v869_v24 = vmax.f32 %v799_v22, 0.0  ;;  %v2281_v26 = vpop.f32.mrb[8].mxu0  ;;  %2491 = vmatprep.subr.bf16.mxu1 %v2490_v21  ;;  %v886_v22 = vld [vmem:[%s3264_s9 + $0x18] sm:$0xff] }
 0x3ab   :  { %v814_v27 = vadd.f32 %v2281_v26, %v622_v7  ;;  %v808_v28 = vpop.f32.mrb[9].mxu0  ;;  %2493 = vmatpush3.bf16.msra.mxu1 %v2490_v21  ;;  %v885_v21 = vld [vmem:[%s3264_s9 + $0x10] sm:$0xff] }
 0x3ac   :  { %v2494_v30 = vpack.c.bf16 %v870_v23, %v869_v24  ;;  %v809_v31 = vadd.f32 %v808_v28, %v617_v8  ;;  %v672_v8 = vpop.permute.xlu1 %671  ;;  %v894_v24 = vpop.permute.xlu0 %893 }
 0x3ad   :  { %v872_v33 = vmax.f32 %v814_v27, 0.0 }
 0x3ae   :  { %v871_v34 = vmax.f32 %v809_v31, 0.0  ;;  %v2284_v35 = vpop.f32.mrb[10].mxu0  ;;  %2495 = vmatprep.subr.bf16.mxu1 %v2494_v30 }
 0x3af   :  { %v824_v36 = vadd.f32 %v2284_v35, %v632_v14  ;;  %v818_v37 = vpop.f32.mrb[11].mxu0  ;;  %2497 = vmatpush3.bf16.msra.mxu1 %v2494_v30 }
 0x3b0   :  { %v2498_v38 = vpack.c.bf16 %v872_v33, %v871_v34  ;;  %v819_v39 = vadd.f32 %v818_v37, %v627_v18  ;;  %v899_v23 = vpop.permute.xlu1 %898  ;;  %v904_v34 = vpop.permute.xlu0 %903 }
 0x3b1   :  { %v874_v40 = vmax.f32 %v824_v36, 0.0 }
 0x3b2   :  { %v873_v42 = vmax.f32 %v819_v39, 0.0  ;;  %v2287_v43 = vpop.f32.mrb[12].mxu0  ;;  %2499 = vmatprep.subr.bf16.mxu1 %v2498_v38 }
 0x3b3   :  { %v834_v45 = vadd.f32 %v2287_v43, %v642_v29  ;;  %v828_v46 = vpop.f32.mrb[13].mxu0  ;;  %2501 = vmatpush3.bf16.msra.mxu1 %v2498_v38 }
 0x3b4   :  { %v2502_v47 = vpack.c.bf16 %v874_v40, %v873_v42  ;;  %v829_v48 = vadd.f32 %v828_v46, %v637_v32  ;;  %v909_v31 = vpop.permute.xlu1 %908 }
 0x3b5   :  { %v876_v49 = vmax.f32 %v834_v45, 0.0 }
 0x3b6   :  { %v875_v51 = vmax.f32 %v829_v48, 0.0  ;;  %v2290_v52 = vpop.f32.mrb[14].mxu0  ;;  %2503 = vmatprep.subr.bf16.mxu1 %v2502_v47 }
 0x3b7   :  { %v844_v54 = vadd.f32 %v2290_v52, %v652_v41  ;;  %v838_v55 = vpop.f32.mrb[15].mxu0  ;;  %2505 = vmatpush3.bf16.msra.mxu1 %v2502_v47 }
 0x3b8   :  { %v2506_v57 = vpack.c.bf16 %v876_v49, %v875_v51  ;;  %v839_v59 = vadd.f32 %v838_v55, %v647_v44 }
 0x3b9   :  { %v878_v63 = vmax.f32 %v844_v54, 0.0  ;;  %v2034_v54 = vld [vmem:[%s3262_s7 + $0x80] sm:$0xff] }
 0x3ba   :  { %v877_v1 = vmax.f32 %v839_v59, 0.0  ;;  %v2293_v2 = vpop.f32.mrb[16].mxu0  ;;  %2507 = vmatprep.subr.bf16.mxu1 %v2506_v57  ;;  %v1182_v59 = vpop.permute.xlu1 %1181 }
 0x3bb   :  { %v854_v3 = vadd.f32 %v2293_v2, %v662_v56  ;;  %v848_v4 = vpop.f32.mrb[17].mxu0  ;;  %2509 = vmatpush3.bf16.msra.mxu1 %v2506_v57 }
 0x3bc   :  { %v2510_v5 = vpack.c.bf16 %v878_v63, %v877_v1  ;;  %v849_v6 = vadd.f32 %v848_v4, %v657_v61  ;;  %v1177_v61 = vpop.permute.xlu0 %1176 }
 0x3bd   :  { %v880_v7 = vmax.f32 %v854_v3, 0.0 }
 0x3be   :  { %v879_v9 = vmax.f32 %v849_v6, 0.0  ;;  %v2296_v11 = vpop.f32.mrb[18].mxu0  ;;  %2511 = vmatprep.subr.bf16.mxu1 %v2510_v5  ;;  %v1206_v1 = vpop.permute.xlu1 %1205 }
 0x3bf   :  { %v864_v13 = vadd.f32 %v2296_v11, %v672_v8  ;;  %v858_v10 = vpop.f32.mrb[19].mxu0  ;;  %2513 = vmatpush3.bf16.msra.mxu1 %v2510_v5 }
 0x3c0   :  { %v2514_v14 = vpack.c.bf16 %v880_v7, %v879_v9  ;;  %v859_v15 = vadd.f32 %v858_v10, %v667_v12  ;;  %v1201_v2 = vpop.permute.xlu0 %1200 }
 0x3c1   :  { %v882_v16 = vmax.f32 %v864_v13, 0.0 }
 0x3c2   :  { %v881_v18 = vmax.f32 %v859_v15, 0.0  ;;  %2515 = vmatprep.subr.bf16.mxu1 %v2514_v14  ;;  %v1192_v4 = vpop.permute.xlu1 %1191 }
 0x3c3   :  { %2517 = vmatpush3.bf16.msra.mxu1 %v2514_v14 }
 0x3c4   :  { %v2518_v19 = vpack.c.bf16 %v882_v16, %v881_v18  ;;  %v1187_v5 = vpop.permute.xlu0 %1186 }
 0x3c6   :  { %2519 = vmatprep.subr.bf16.mxu1 %v2518_v19  ;;  %v1216_v15 = vpop.permute.xlu1 %1215 }
 0x3c7   :  { %2521 = vmatpush3.bf16.msra.mxu1 %v2518_v19 }
 0x3c8   :  { %2528 = vmatprep.subr.bf16.mxu1 %v2642_v25  ;;  %v1211_v16 = vpop.permute.xlu0 %1210 }
 0x3ca   :  { %2330 = vmatmul.mubr.f32.vlgmr.msra.gmra.mrb[8].mxu1 %v884_v20 }
 0x3cb   :  { %2332 = vmatprep.mubr.f32.mxu1 %v885_v21 }
 0x3ce   :  { %2333 = vmatmul.mubr.f32.gmra.mrb[10].mxu1 %v886_v22 }
 0x3cf   :  { %2354 = vmatprep.mubr.msk.f32.mxu1 %vm2643_vm12, %v2640_v17 }
 0x49d   :  { %v2331_v26 = vpop.f32.mrb[8].mxu1 }
 0x49e   :  { %v983_v27 = vadd.f32 %v2331_v26, %v899_v23  ;;  %v977_v28 = vpop.f32.mrb[9].mxu1  ;;  %v2036_v26 = vld [vmem:[%s3262_s7 + $0x90] sm:$0xff] }
 0x49f   :  { %v978_v29 = vadd.f32 %v977_v28, %v894_v24  ;;  %v2035_v24 = vld [vmem:[%s3262_s7 + $0x88] sm:$0xff]  ;;  %v2038_v28 = vld [vmem:[%s3262_s7 + $0xa0] sm:$0xff] }
 0x4a0   :  { %v3113_v30 = vadd.f32 %v983_v27, %v3000_v50  ;;  %v2037_v27 = vld [vmem:[%s3262_s7 + $0x98] sm:$0xff] }
 0x4a1   :  { %v3116_v32 = vadd.f32 %v978_v29, %v3002_v53  ;;  %v2334_v33 = vpop.f32.mrb[10].mxu1  ;;  %v2039_v29 = vld [vmem:[%s3262_s7 + $0xa8] sm:$0xff] }
 0x4a2   :  { %v993_v35 = vadd.f32 %v2334_v33, %v909_v31  ;;  %v987_v36 = vpop.f32.mrb[11].mxu1  ;;  %v2040_v31 = vld [vmem:[%s3262_s7 + $0xb0] sm:$0xff]  ;;  %v2041_v33 = vld [vmem:[%s3262_s7 + $0xb8] sm:$0xff] }
 0x4a3   :  { %v2523_v37 = vpack.c.bf16 %v3113_v30, %v3116_v32  ;;  %v988_v38 = vadd.f32 %v987_v36, %v904_v34  ;;  %v2042_v34 = vld [vmem:[%s3262_s7 + $0xc0] sm:$0xff]  ;;  %v2044_v36 = vld [vmem:[%s3262_s7 + $0xd0] sm:$0xff] }
 0x4a4   :  { %v3121_v39 = vadd.f32 %v993_v35, %v3006_v58  ;;  %v2043_v35 = vld [vmem:[%s3262_s7 + $0xc8] sm:$0xff] }
 0x4a5   :  { %v3124_v40 = vadd.f32 %v988_v38, %v3008_v60  ;;  %2524 = vmatpush3.bf16.msra.mxu0 %v2523_v37  ;;  %v2045_v37 = vld [vmem:[%s3262_s7 + $0xd8] sm:$0xff]  ;;  %v2046_v38 = vld [vmem:[%s3262_s7 + $0xe0] sm:$0xff] }
 0x4a6   :  { %2525 = vmatprep.subr.bf16.mxu0 %v2642_v25 }
 0x4a7   :  { %v2526_v50 = vpack.c.bf16 %v3121_v39, %v3124_v40 }
 0x4a9   :  { %2527 = vmatpush3.bf16.msra.mxu0 %v2526_v50  ;;  %v2047_v50 = vld [vmem:[%s3262_s7 + $0xe8] sm:$0xff] }
 0x4ac   :  { %2344 = vmatmul.mubr.msk.f32.vlgmr.msra.gmra.mrb[20].mxu0 %vm346_vm13, %v2644_v62 }
 0x4ad   :  { %2365 = vmatprep.mubr.msk.f32.mxu0 %vm346_vm13, %v2034_v54 }
 0x57f   :  { %v1076_v53 = vpop.f32.mrb[20].mxu0 }
 0x580   :  { %v1080_v41 = vmul.f32 0.03125, %v1076_v53  ;;  %v2345_v42 = vpop.f32.mrb[21].mxu0  ;;  %v2048_v53 = vld [vmem:[%s3262_s7 + $0xf0] sm:$0xff] }
 0x581   :  { %v2082_v42 = vld [vmem:[%s3264_s9 + $0x20] sm:$0xff] }
 0x582   :  { %v1084_v43 = vrot.slane %v1080_v41, %v3019_v0  ;;  %v2049_v41 = vld [vmem:[%s3262_s7 + $0xf8] sm:$0xff] }
 0x584   :  { %v1085_v58 = vsub.f32 %v3116_v32, %v1084_v43  ;;  %v1086_v60 = vsub.f32 %v3113_v30, %v1084_v43  ;;  %v1087_v44 = vsub.f32 %v3124_v40, %v1084_v43  ;;  %v1088_v45 = vsub.f32 %v3121_v39, %v1084_v43  ;;  %v1264_v43 = vpop.permute.xlu1 %1263 }
 0x586   :  { %v1089_v46 = vmul.f32 %v1085_v58, %v1085_v58  ;;  %v1090_v47 = vmul.f32 %v1086_v60, %v1086_v60  ;;  %v1091_v49 = vmul.f32 %v1087_v44, %v1087_v44  ;;  %v1092_v51 = vmul.f32 %v1088_v45, %v1088_v45 }
 0x588   :  { %v2529_v48 = vpack.c.bf16 %v1090_v47, %v1089_v46  ;;  %v2532_v52 = vpack.c.bf16 %v1092_v51, %v1091_v49 }
 0x58a   :  { %2530 = vmatpush3.bf16.msra.mxu1 %v2529_v48 }
 0x58b   :  { %2531 = vmatprep.subr.bf16.mxu1 %v2642_v25 }
 0x58e   :  { %2533 = vmatpush3.bf16.msra.mxu1 %v2532_v52 }
 0x591   :  { %2355 = vmatmul.mubr.msk.f32.vlgmr.msra.gmra.mrb[12].mxu1 %vm346_vm13, %v2644_v62 }
 0x592   :  { %2421 = vmatprep.mubr.f32.mxu1 %v2082_v42 }
 0x664   :  { %v1159_v55 = vpop.f32.mrb[12].mxu1 }
 0x665   :  { %v1163_v56 = vmul.f32 0.03125, %v1159_v55  ;;  %v2356_v57 = vpop.f32.mrb[13].mxu1 }
 0x667   :  { %v1164_v63 = vadd.f32 1e-05, %v1163_v56 }
 0x669   :  { %2611 = vrsqrt.f32 %v1164_v63 }
 0x673   :  { %v2612_v3 = vpop.eup %2611 }
 0x674   :  { %v1169_v6 = vrot.slane %v2612_v3, %v3019_v0 }
 0x676   :  { %v1170_v7 = vmul.f32 %v1169_v6, %v1085_v58  ;;  %v1171_v8 = vmul.f32 %v1169_v6, %v1086_v60  ;;  %v1172_v9 = vmul.f32 %v1169_v6, %v1087_v44  ;;  %v1173_v11 = vmul.f32 %v1169_v6, %v1088_v45  ;;  %v1259_v58 = vpop.permute.xlu0 %1258  ;;  %v1274_v60 = vpop.permute.xlu1 %1273 }
 0x678   :  { %v1194_v12 = vmul.f32 %v1177_v61, %v1170_v7  ;;  %v1195_v13 = vmul.f32 %v1182_v59, %v1171_v8  ;;  %v1196_v10 = vmul.f32 %v1187_v5, %v1172_v9  ;;  %v1197_v14 = vmul.f32 %v1192_v4, %v1173_v11 }
 0x67a   :  { %v1218_v18 = vadd.f32 %v1201_v2, %v1194_v12  ;;  %v1219_v19 = vadd.f32 %v1206_v1, %v1195_v13  ;;  %v1220_v20 = vadd.f32 %v1211_v16, %v1196_v10  ;;  %v1221_v21 = vadd.f32 %v1216_v15, %v1197_v14  ;;  %v1269_v44 = vpop.permute.xlu0 %1268  ;;  %v1284_v45 = vpop.permute.xlu1 %1283 }
 0x67c   :  { %v2534_v22 = vpack.c.bf16 %v1219_v19, %v1218_v18  ;;  %v2538_v23 = vpack.c.bf16 %v1221_v21, %v1220_v20 }
 0x67e   :  { %2535 = vmatprep.subr.bf16.mxu0 %v2534_v22  ;;  %v1279_v46 = vpop.permute.xlu0 %1278  ;;  %v1294_v54 = vpop.permute.xlu1 %1293 }
 0x67f   :  { %2537 = vmatpush3.bf16.msra.mxu0 %v2534_v22 }
 0x680   :  { %2539 = vmatprep.subr.bf16.mxu0 %v2538_v23 }
 0x682   :  { %v1289_v57 = vpop.permute.xlu0 %1288  ;;  %v1304_v7 = vpop.permute.xlu1 %1303 }
 0x683   :  { %2541 = vmatpush3.bf16.msra.mxu0 %v2538_v23 }
 0x684   :  { %2574 = vmatprep.subr.bf16.mxu0 %v2642_v25 }
 0x686   :  { %2366 = vmatmul.mubr.msk.f32.vlgmr.msra.gmra.mrb[22].mxu0 %vm346_vm13, %v2035_v24  ;;  %v1299_v11 = vpop.permute.xlu0 %1298  ;;  %v1314_v20 = vpop.permute.xlu1 %1313 }
 0x687   :  { %2368 = vmatprep.mubr.msk.f32.mxu0 %vm346_vm13, %v2036_v26 }
 0x68a   :  { %2369 = vmatmul.mubr.msk.f32.gmra.mrb[24].mxu0 %vm346_vm13, %v2037_v27  ;;  %v1309_v23 = vpop.permute.xlu0 %1308 }
 0x68b   :  { %2371 = vmatprep.mubr.msk.f32.mxu0 %vm346_vm13, %v2038_v28 }
 0x68e   :  { %2372 = vmatmul.mubr.msk.f32.gmra.mrb[26].mxu0 %vm346_vm13, %v2039_v29 }
 0x68f   :  { %2374 = vmatprep.mubr.msk.f32.mxu0 %vm346_vm13, %v2040_v31 }
 0x692   :  { %2375 = vmatmul.mubr.msk.f32.gmra.mrb[28].mxu0 %vm346_vm13, %v2041_v33 }
 0x693   :  { %2377 = vmatprep.mubr.msk.f32.mxu0 %vm346_vm13, %v2042_v34 }
 0x696   :  { %2378 = vmatmul.mubr.msk.f32.gmra.mrb[30].mxu0 %vm346_vm13, %v2043_v35 }
 0x697   :  { %2380 = vmatprep.mubr.msk.f32.mxu0 %vm346_vm13, %v2044_v36  ;;  %v1324_v36 = vpop.permute.xlu1 %1323 }
 0x69a   :  { %2381 = vmatmul.mubr.msk.f32.gmra.mrb[32].mxu0 %vm346_vm13, %v2045_v37 }
 0x69b   :  { %2383 = vmatprep.mubr.msk.f32.mxu0 %vm346_vm13, %v2046_v38 }
 0x69e   :  { %2384 = vmatmul.mubr.msk.f32.gmra.mrb[34].mxu0 %vm346_vm13, %v2047_v50  ;;  %v1319_v50 = vpop.permute.xlu0 %1318 }
 0x69f   :  { %2386 = vmatprep.mubr.msk.f32.mxu0 %vm346_vm13, %v2048_v53 }
 0x6a2   :  { %2387 = vmatmul.mubr.msk.f32.gmra.mrb[36].mxu0 %vm346_vm13, %v2049_v41 }
 0x6a3   :  { %2435 = vmatprep.mubr.msk.f32.mxu0 %vm2643_vm12, %v2640_v17 }
 0x759   :  { %v2367_v47 = vpop.f32.mrb[22].mxu0 }
 0x75a   :  { %v1456_v48 = vadd.f32 %v2367_v47, %v1264_v43  ;;  %v1450_v49 = vpop.f32.mrb[23].mxu0 }
 0x75b   :  { %v1451_v51 = vadd.f32 %v1450_v49, %v1259_v58  ;;  %v1329_v49 = vpop.permute.xlu0 %1328 }
 0x75c   :  { %v1530_v52 = vmax.f32 %v1456_v48, 0.0 }
 0x75d   :  { %v1529_v55 = vmax.f32 %v1451_v51, 0.0  ;;  %v2370_v56 = vpop.f32.mrb[24].mxu0 }
 0x75e   :  { %v1466_v59 = vadd.f32 %v2370_v56, %v1274_v60  ;;  %v1460_v61 = vpop.f32.mrb[25].mxu0 }
 0x75f   :  { %v2542_v63 = vpack.c.bf16 %v1530_v52, %v1529_v55  ;;  %v1461_v1 = vadd.f32 %v1460_v61, %v1269_v44  ;;  %v2083_v61 = vld [vmem:[%s3264_s9 + $0x28] sm:$0xff] }
 0x760   :  { %v1532_v2 = vmax.f32 %v1466_v59, 0.0 }
 0x761   :  { %v1531_v3 = vmax.f32 %v1461_v1, 0.0  ;;  %v2373_v4 = vpop.f32.mrb[26].mxu0  ;;  %2543 = vmatprep.subr.bf16.mxu1 %v2542_v63  ;;  %v2085_v1 = vld [vmem:[%s3264_s9 + $0x38] sm:$0xff] }
 0x762   :  { %v1476_v5 = vadd.f32 %v2373_v4, %v1284_v45  ;;  %v1470_v6 = vpop.f32.mrb[27].mxu0  ;;  %2545 = vmatpush3.bf16.msra.mxu1 %v2542_v63  ;;  %v2084_v63 = vld [vmem:[%s3264_s9 + $0x30] sm:$0xff] }
 0x763   :  { %v2546_v8 = vpack.c.bf16 %v1532_v2, %v1531_v3  ;;  %v1471_v9 = vadd.f32 %v1470_v6, %v1279_v46  ;;  %v1334_v46 = vpop.permute.xlu1 %1333  ;;  %v1558_v3 = vpop.permute.xlu0 %1557 }
 0x764   :  { %v1534_v12 = vmax.f32 %v1476_v5, 0.0 }
 0x765   :  { %v1533_v13 = vmax.f32 %v1471_v9, 0.0  ;;  %v2376_v10 = vpop.f32.mrb[28].mxu0  ;;  %2547 = vmatprep.subr.bf16.mxu1 %v2546_v8 }
 0x766   :  { %v1486_v14 = vadd.f32 %v2376_v10, %v1294_v54  ;;  %v1480_v15 = vpop.f32.mrb[29].mxu0  ;;  %2549 = vmatpush3.bf16.msra.mxu1 %v2546_v8 }
 0x767   :  { %v2550_v16 = vpack.c.bf16 %v1534_v12, %v1533_v13  ;;  %v1481_v18 = vadd.f32 %v1480_v15, %v1289_v57  ;;  %v1563_v2 = vpop.permute.xlu1 %1562  ;;  %v1568_v13 = vpop.permute.xlu0 %1567 }
 0x768   :  { %v1536_v19 = vmax.f32 %v1486_v14, 0.0 }
 0x769   :  { %v1535_v21 = vmax.f32 %v1481_v18, 0.0  ;;  %v2379_v22 = vpop.f32.mrb[30].mxu0  ;;  %2551 = vmatprep.subr.bf16.mxu1 %v2550_v16 }
 0x76a   :  { %v1496_v24 = vadd.f32 %v2379_v22, %v1304_v7  ;;  %v1490_v26 = vpop.f32.mrb[31].mxu0  ;;  %2553 = vmatpush3.bf16.msra.mxu1 %v2550_v16 }
 0x76b   :  { %v2554_v27 = vpack.c.bf16 %v1536_v19, %v1535_v21  ;;  %v1491_v28 = vadd.f32 %v1490_v26, %v1299_v11  ;;  %v1573_v9 = vpop.permute.xlu1 %1572 }
 0x76c   :  { %v1538_v29 = vmax.f32 %v1496_v24, 0.0 }
 0x76d   :  { %v1537_v31 = vmax.f32 %v1491_v28, 0.0  ;;  %v2382_v33 = vpop.f32.mrb[32].mxu0  ;;  %2555 = vmatprep.subr.bf16.mxu1 %v2554_v27 }
 0x76e   :  { %v1506_v34 = vadd.f32 %v2382_v33, %v1314_v20  ;;  %v1500_v35 = vpop.f32.mrb[33].mxu0  ;;  %2557 = vmatpush3.bf16.msra.mxu1 %v2554_v27 }
 0x76f   :  { %v2558_v37 = vpack.c.bf16 %v1538_v29, %v1537_v31  ;;  %v1501_v38 = vadd.f32 %v1500_v35, %v1309_v23 }
 0x770   :  { %v1540_v53 = vmax.f32 %v1506_v34, 0.0 }
 0x771   :  { %v1539_v41 = vmax.f32 %v1501_v38, 0.0  ;;  %v2385_v42 = vpop.f32.mrb[34].mxu0  ;;  %2559 = vmatprep.subr.bf16.mxu1 %v2558_v37 }
 0x772   :  { %v1516_v43 = vadd.f32 %v2385_v42, %v1324_v36  ;;  %v1510_v58 = vpop.f32.mrb[35].mxu0  ;;  %2561 = vmatpush3.bf16.msra.mxu1 %v2558_v37  ;;  %v1844_v36 = vpop.permute.xlu1 %1843 }
 0x773   :  { %v2562_v60 = vpack.c.bf16 %v1540_v53, %v1539_v41  ;;  %v1511_v44 = vadd.f32 %v1510_v58, %v1319_v50  ;;  %v1839_v37 = vpop.permute.xlu0 %1838 }
 0x774   :  { %v1542_v45 = vmax.f32 %v1516_v43, 0.0 }
 0x775   :  { %v1541_v47 = vmax.f32 %v1511_v44, 0.0  ;;  %v2388_v48 = vpop.f32.mrb[36].mxu0  ;;  %2563 = vmatprep.subr.bf16.mxu1 %v2562_v60 }
 0x776   :  { %v1526_v51 = vadd.f32 %v2388_v48, %v1334_v46  ;;  %v1520_v52 = vpop.f32.mrb[37].mxu0  ;;  %2565 = vmatpush3.bf16.msra.mxu1 %v2562_v60  ;;  %v1868_v50 = vpop.permute.xlu1 %1867 }
 0x777   :  { %v2566_v54 = vpack.c.bf16 %v1542_v45, %v1541_v47  ;;  %v1521_v55 = vadd.f32 %v1520_v52, %v1329_v49  ;;  %v1863_v53 = vpop.permute.xlu0 %1862 }
 0x778   :  { %v1544_v56 = vmax.f32 %v1526_v51, 0.0 }
 0x779   :  { %v1543_v57 = vmax.f32 %v1521_v55, 0.0  ;;  %2567 = vmatprep.subr.bf16.mxu1 %v2566_v54 }
 0x77a   :  { %2569 = vmatpush3.bf16.msra.mxu1 %v2566_v54  ;;  %v1854_v42 = vpop.permute.xlu1 %1853 }
 0x77b   :  { %v2570_v59 = vpack.c.bf16 %v1544_v56, %v1543_v57  ;;  %v1849_v43 = vpop.permute.xlu0 %1848 }
 0x77d   :  { %2571 = vmatprep.subr.bf16.mxu1 %v2570_v59 }
 0x77e   :  { %2573 = vmatpush3.bf16.msra.mxu1 %v2570_v59  ;;  %v1878_v51 = vpop.permute.xlu1 %1877 }
 0x77f   :  { %2580 = vmatprep.subr.bf16.mxu1 %v2642_v25  ;;  %v1873_v52 = vpop.permute.xlu0 %1872 }
 0x781   :  { %2422 = vmatmul.mubr.f32.vlgmr.msra.gmra.mrb[14].mxu1 %v2083_v61 }
 0x782   :  { %2424 = vmatprep.mubr.f32.mxu1 %v2084_v63 }
 0x785   :  { %2425 = vmatmul.mubr.f32.gmra.mrb[16].mxu1 %v2085_v1 }
 0x786   :  { %2446 = vmatprep.mubr.msk.f32.mxu1 %vm2643_vm12, %v2640_v17 }
 0x854   :  { %v2423_v4 = vpop.f32.mrb[14].mxu1 }
 0x855   :  { %v1647_v5 = vadd.f32 %v2423_v4, %v1563_v2  ;;  %v1641_v6 = vpop.f32.mrb[15].mxu1  ;;  %v1888_v4 = vld [vmem:[%s3268_s13] sm:$0x1] }
 0x856   :  { %v1642_v7 = vadd.f32 %v1641_v6, %v1558_v3 }
 0x857   :  { %v1661_v8 = vadd.f32 %v1647_v5, %v3113_v30  ;;  %v1893_v5 = vpop.permute.xlu0 %1892 }
 0x858   :  { %v1660_v11 = vadd.f32 %v1642_v7, %v3116_v32  ;;  %v2426_v12 = vpop.f32.mrb[16].mxu1  ;;  %v1898_v6 = vrot.slane %v1893_v5, %v3019_v0 }
 0x859   :  { %v1657_v10 = vadd.f32 %v2426_v12, %v1573_v9  ;;  %v1651_v14 = vpop.f32.mrb[17].mxu1 }
 0x85a   :  { %v2575_v15 = vpack.c.bf16 %v1661_v8, %v1660_v11  ;;  %v1652_v16 = vadd.f32 %v1651_v14, %v1568_v13 }
 0x85b   :  { %v1663_v18 = vadd.f32 %v1657_v10, %v3121_v39 }
 0x85c   :  { %v1662_v19 = vadd.f32 %v1652_v16, %v3124_v40  ;;  %2576 = vmatpush3.bf16.msra.mxu0 %v2575_v15 }
 0x85d   :  { %2577 = vmatprep.subr.bf16.mxu0 %v2642_v25 }
 0x85e   :  { %v2578_v20 = vpack.c.bf16 %v1663_v18, %v1662_v19 }
 0x860   :  { %2579 = vmatpush3.bf16.msra.mxu0 %v2578_v20 }
 0x861   :  { %2586 = vmatprep.subr.bf16.mxu0 %v2642_v25 }
 0x863   :  { %2436 = vmatmul.mubr.msk.f32.vlgmr.msra.gmra.mrb[38].mxu0 %vm346_vm13, %v2644_v62 }
 0x864   :  { %2457 = vmatprep.mubr.msk.f32.mxu0 %vm2643_vm12, %v2640_v17 }
 0x936   :  { %v1738_v30 = vpop.f32.mrb[38].mxu0 }
 0x937   :  { %v1742_v32 = vmul.f32 0.03125, %v1738_v30  ;;  %v2437_v21 = vpop.f32.mrb[39].mxu0 }
 0x939   :  { %v1746_v39 = vrot.slane %v1742_v32, %v3019_v0 }
 0x93b   :  { %v1747_v22 = vsub.f32 %v1660_v11, %v1746_v39  ;;  %v1748_v40 = vsub.f32 %v1661_v8, %v1746_v39  ;;  %v1749_v23 = vsub.f32 %v1662_v19, %v1746_v39  ;;  %v1750_v24 = vsub.f32 %v1663_v18, %v1746_v39 }
 0x93d   :  { %v1751_v26 = vmul.f32 %v1747_v22, %v1747_v22  ;;  %v1752_v27 = vmul.f32 %v1748_v40, %v1748_v40  ;;  %v1753_v29 = vmul.f32 %v1749_v23, %v1749_v23  ;;  %v1754_v31 = vmul.f32 %v1750_v24, %v1750_v24 }
 0x93f   :  { %v2581_v28 = vpack.c.bf16 %v1752_v27, %v1751_v26  ;;  %v2584_v33 = vpack.c.bf16 %v1754_v31, %v1753_v29 }
 0x941   :  { %2582 = vmatpush3.bf16.msra.mxu1 %v2581_v28 }
 0x942   :  { %2583 = vmatprep.subr.bf16.mxu1 %v2642_v25 }
 0x945   :  { %2585 = vmatpush3.bf16.msra.mxu1 %v2584_v33 }
 0x948   :  { %2447 = vmatmul.mubr.msk.f32.vlgmr.msra.gmra.mrb[18].mxu1 %vm346_vm13, %v2644_v62 }
 0xa1b   :  { %v1821_v17 = vpop.f32.mrb[18].mxu1 }
 0xa1c   :  { %v1825_v34 = vmul.f32 0.03125, %v1821_v17  ;;  %v2448_v35 = vpop.f32.mrb[19].mxu1 }
 0xa1e   :  { %v1826_v38 = vadd.f32 1e-05, %v1825_v34 }
 0xa20   :  { %2613 = vrsqrt.f32 %v1826_v38 }
 0xa2a   :  { %v2614_v41 = vpop.eup %2613 }
 0xa2b   :  { %v1831_v58 = vrot.slane %v2614_v41, %v3019_v0 }
 0xa2d   :  { %v1832_v60 = vmul.f32 %v1831_v58, %v1747_v22  ;;  %v1833_v44 = vmul.f32 %v1831_v58, %v1748_v40  ;;  %v1834_v45 = vmul.f32 %v1831_v58, %v1749_v23  ;;  %v1835_v46 = vmul.f32 %v1831_v58, %v1750_v24 }
 0xa2f   :  { %v1856_v47 = vmul.f32 %v1839_v37, %v1832_v60  ;;  %v1857_v62 = vmul.f32 %v1844_v36, %v1833_v44  ;;  %v1858_v48 = vmul.f32 %v1849_v43, %v1834_v45  ;;  %v1859_v49 = vmul.f32 %v1854_v42, %v1835_v46 }
 0xa31   :  { %v1880_v54 = vadd.f32 %v1863_v53, %v1856_v47  ;;  %v1881_v55 = vadd.f32 %v1868_v50, %v1857_v62  ;;  %v1882_v56 = vadd.f32 %v1873_v52, %v1858_v48  ;;  %v1883_v57 = vadd.f32 %v1878_v51, %v1859_v49 }
 0xa33   :  { %v1884_v59 = vmax.f32 %v1880_v54, 0.0  ;;  %v1885_v61 = vmax.f32 %v1881_v55, 0.0  ;;  %v1886_v1 = vmax.f32 %v1882_v56, 0.0  ;;  %v1887_v2 = vmax.f32 %v1883_v57, 0.0 }
 0xa35   :  { %v2587_v63 = vpack.c.bf16 %v1885_v61, %v1884_v59  ;;  %v2590_v3 = vpack.c.bf16 %v1887_v2, %v1886_v1 }
 0xa37   :  { %2588 = vmatpush3.bf16.msra.mxu0 %v2587_v63 }
 0xa38   :  { %2589 = vmatprep.subr.bf16.mxu0 %v2642_v25 }
 0xa3b   :  { %2591 = vmatpush3.bf16.msra.mxu0 %v2590_v3 }
 0xa3e   :  { %2458 = vmatmul.mubr.msk.f32.vlgmr.msra.gmra.mrb[40].mxu0 %vm346_vm13, %v1888_v4 }
 0xb11   :  { %v1968_v7 = vpop.f32.mrb[40].mxu0 }
 0xb12   :  { %v1969_v8 = vadd.f32 %v1968_v7, %v1898_v6  ;;  %v2459_v9 = vpop.f32.mrb[41].mxu0 }
 0xb14   :  { %1972 = vst [vmem:[#allocation3] sm:$0x1] %v1969_v8 }
 0xb15   :  { %2626 = shalt.err (!%p2623_p4)
}
 0xb16   :  { %s2627_s18 = scalar_lea.hbm %s3270_s15, 16 }
 0xb17   :  { %p2628_p5 = scmp.ne.s32.totalorder %s3270_s15, %s2627_s18  ;;  %p2631_p6 = scmp.lt.u32.totalorder %s2627_s18, %s3270_s15 }
 0xb19   :  { %p2633_p7 = pnand %p2631_p6, %p2628_p5 }
 0xb1b   :  { %2636 = shalt.err (!%p2633_p7)
}
 0xb1c   :  { %1982 = dma.vmem_to_hbm [thread:$0]  %s1980_s11, 16, %s3270_s15, [#allocation4]  }
 0xb1d   :  { %2637 = dma.done.wait [#allocation4], 16  }
 0xb1e   :  { %2638 = vsyncadd [#allocation4], 4294967280 }
 0xb1f   :  { %1986 = vsyncpa [#allocation4], 1 }

</bundles_post_ra>
